<compile_context>
chip_gen: v7x
topology: tpu7x:2x2x1
jax: 0.10.0
libtpu: 0.0.40
codegen_flags: <defaults>
</compile_context>

<pallas_src>
import numpy as np
import jax
import jax.numpy as jnp
from jax import lax
from jax.experimental import pallas as pl
from jax.experimental.pallas import tpu as pltpu

# ---- module hyper-parameters (from AttenFeatNet.__init__ defaults) ----
C_ANGLE = 6
C_RDIR = 3
FEAT_DIM = 128
IN_DIM = FEAT_DIM + C_RDIR + 1          # 132
HIDDEN = 256
NUM_HEADS = 6
HEAD_DIM = IN_DIM // NUM_HEADS          # 22
SEQ = C_ANGLE                           # tokens per attention group
LN_EPS = 1e-5
NEG_INF = -1e30


def _round_up(x, m):
    return (x + m - 1) // m * m


# ---------------------------------------------------------------------------
# Kernel: LayerNorm -> Mlp(GELU) -> LayerNorm -> block-diag multi-head attention
# operating on a flat (TILE_ROWS, 132) slab of tokens (many batch elems / step)
# ---------------------------------------------------------------------------
def _layernorm(x, gamma, beta):
    mu = jnp.mean(x, axis=-1, keepdims=True)
    var = jnp.mean((x - mu) ** 2, axis=-1, keepdims=True)
    return (x - mu) * lax.rsqrt(var + LN_EPS) * gamma + beta


def _gelu_exact(x):
    # nn.GELU default (erf-based, not tanh approximation)
    return 0.5 * x * (1.0 + lax.erf(x * np.float32(1.0 / np.sqrt(2.0))))


def atten_feat_kernel(x_ref, mask_ref,
                      g1_ref, b1_ref,          # norm1
                      w1_ref, c1_ref,          # mlp.fc1
                      w2_ref, c2_ref,          # mlp.fc2
                      g2_ref, b2_ref,          # norm2
                      wq_ref, wk_ref, wv_ref,  # attention.qkv, head-major (H, C, Dh)
                      wp_ref, cp_ref,          # attention.proj, head-major (H, Dh, C)
                      o_ref):
    x = x_ref[...]                                                  # (TR, C)

    # norm1 + Mlp (dense M=TR matmuls)
    xn = _layernorm(x, g1_ref[...], b1_ref[...])
    h = jnp.dot(xn, w1_ref[...], preferred_element_type=jnp.float32) + c1_ref[...]
    h = _gelu_exact(h)
    y = jnp.dot(h, w2_ref[...], preferred_element_type=jnp.float32) + c2_ref[...]

    # norm2 + multi-head attention (block-diagonal over 6-token groups)
    yn = _layernorm(y, g2_ref[...], b2_ref[...])

    bias = mask_ref[...]                        # (TR, TR): 0 in-group, -1e30 across
    scale = np.float32(HEAD_DIM ** -0.5)
    out = jnp.zeros(x.shape, jnp.float32)
    for hd in range(NUM_HEADS):                 # static unroll, leading-dim slices
        q = jnp.dot(yn, wq_ref[hd], preferred_element_type=jnp.float32) * scale
        k = jnp.dot(yn, wk_ref[hd], preferred_element_type=jnp.float32)
        v = jnp.dot(yn, wv_ref[hd], preferred_element_type=jnp.float32)
        # scores for every token against every token of the tile, masked to its
        # own 6-token group (one dense NT matmul instead of TB tiny matmuls)
        s = lax.dot_general(q, k, (((1,), (1,)), ((), ())),
                            preferred_element_type=jnp.float32) + bias   # (TR, TR)
        s = s - jnp.max(s, axis=-1, keepdims=True)
        p = jnp.exp(s)                                                   # masked -> 0
        p = p / jnp.sum(p, axis=-1, keepdims=True)
        o_h = jnp.dot(p, v, preferred_element_type=jnp.float32)          # (TR, Dh)
        out = out + jnp.dot(o_h, wp_ref[hd], preferred_element_type=jnp.float32)

    o_ref[...] = out + cp_ref[...]


# ---------------------------------------------------------------------------
# Wrapper: flatten tokens, pick row tile, head-major weight layout, pallas_call
# ---------------------------------------------------------------------------
def run_atten_feat(inputs, params, tile_rows=192):
    B, N, C = inputs.shape
    assert N == SEQ and C == IN_DIM
    total = B * N
    unit = 24                               # lcm(6 tokens, 8 sublanes)

    tr = max(unit, min(_round_up(tile_rows, unit), _round_up(total, unit)))
    # prefer >= 2 grid steps when there is enough work (v7x has 2 TensorCores)
    if _round_up(total, tr) // tr < 2 and total > unit:
        tr = max(unit, _round_up(pl.cdiv(total, 2), unit))
    padded = _round_up(total, tr)
    grid = padded // tr

    # flat, sublane-dense token layout; zero-pad to a whole number of tiles
    x2d = inputs.reshape(total, C)
    if padded != total:
        x2d = jnp.pad(x2d, ((0, padded - total), (0, 0)))

    # additive block-diagonal attention bias (same for every tile -> DMA'd once)
    g = np.arange(tr) // SEQ
    mask = jnp.asarray(
        np.where(g[:, None] == g[None, :], 0.0, NEG_INF).astype(np.float32))

    # head-major weight layouts (leading-dim head slicing is free in-kernel)
    wqkv = params["wqkv"]                                           # (C, 3C)
    wq = wqkv[:, 0 * IN_DIM:1 * IN_DIM].reshape(C, NUM_HEADS, HEAD_DIM).transpose(1, 0, 2)
    wk = wqkv[:, 1 * IN_DIM:2 * IN_DIM].reshape(C, NUM_HEADS, HEAD_DIM).transpose(1, 0, 2)
    wv = wqkv[:, 2 * IN_DIM:3 * IN_DIM].reshape(C, NUM_HEADS, HEAD_DIM).transpose(1, 0, 2)
    wp = params["wproj"].reshape(NUM_HEADS, HEAD_DIM, C)

    weights = [params["g1"], params["b1"],
               params["w1"], params["c1"],
               params["w2"], params["c2"],
               params["g2"], params["b2"],
               wq, wk, wv, wp, params["cproj"]]

    in_specs = [pl.BlockSpec((tr, C), lambda i: (i, 0)),
                pl.BlockSpec((tr, tr), lambda i: (0, 0))]
    for w in weights:
        nd = w.ndim
        in_specs.append(pl.BlockSpec(w.shape, lambda i, _n=nd: (0,) * _n))
    out_specs = pl.BlockSpec((tr, C), lambda i: (i, 0))

    flops = (2 * padded * (C * HIDDEN + HIDDEN * C + 4 * C * C)
             + 2 * grid * NUM_HEADS * (2 * tr * tr * HEAD_DIM))
    transcendentals = padded * HIDDEN + grid * NUM_HEADS * tr * tr
    bytes_accessed = 4 * (2 * padded * C + tr * tr
                          + sum(int(np.prod(w.shape)) for w in weights))

    out2d = pl.pallas_call(
        atten_feat_kernel,
        out_shape=jax.ShapeDtypeStruct((padded, C), jnp.float32),
        grid=(grid,),
        in_specs=in_specs,
        out_specs=out_specs,
        compiler_params=pltpu.CompilerParams(dimension_semantics=("parallel",)),
        cost_estimate=pl.CostEstimate(flops=int(flops),
                                      transcendentals=int(transcendentals),
                                      bytes_accessed=int(bytes_accessed)),
    )(x2d, mask, *weights)

    return out2d[:total].reshape(B, N, C)


# ---------------------------------------------------------------------------
# Plain-JAX glue: geometric preprocessing (AttenFeatNet.forward prologue)
# ---------------------------------------------------------------------------
def preprocess(feats, dirs, angle):
    dirs = dirs[..., 0:3]
    dirs = dirs / jnp.linalg.norm(dirs, axis=-1, keepdims=True)
    # TODO(synk): matches torch.norm(angle, dim=-1) on the flat (B, 18) input;
    # if the real caller passes (B, 6, 3) angles this normalizes per-3-vector.
    angle = angle / jnp.linalg.norm(angle, axis=-1, keepdims=True)
    ang = jnp.sum(dirs[:, None, :] * angle.reshape(-1, C_ANGLE, 3),
                  axis=-1, keepdims=True)                          # (B, 6, 1)
    dirs_r = jnp.broadcast_to(dirs[:, None, :], (dirs.shape[0], C_ANGLE, 3))
    return jnp.concatenate([feats, dirs_r, ang], axis=-1)          # (B, 6, 132)


# ---------------------------------------------------------------------------
# Deterministic synthetic parameters (PyTorch Linear stored transposed: (in, out))
# ---------------------------------------------------------------------------
def init_params(key):
    ks = jax.random.split(key, 7)
    s = 0.02
    return {
        "g1": jnp.ones((1, IN_DIM), jnp.float32),
        "b1": jnp.zeros((1, IN_DIM), jnp.float32),
        "w1": s * jax.random.normal(ks[0], (IN_DIM, HIDDEN), jnp.float32),
        "c1": s * jax.random.normal(ks[1], (1, HIDDEN), jnp.float32),
        "w2": s * jax.random.normal(ks[2], (HIDDEN, IN_DIM), jnp.float32),
        "c2": s * jax.random.normal(ks[3], (1, IN_DIM), jnp.float32),
        "g2": jnp.ones((1, IN_DIM), jnp.float32),
        "b2": jnp.zeros((1, IN_DIM), jnp.float32),
        "wqkv": s * jax.random.normal(ks[4], (IN_DIM, 3 * IN_DIM), jnp.float32),
        "wproj": s * jax.random.normal(ks[5], (IN_DIM, IN_DIM), jnp.float32),
        "cproj": s * jax.random.normal(ks[6], (1, IN_DIM), jnp.float32),
    }


# ---------------------------------------------------------------------------
# Pure-JAX reference for correctness
# ---------------------------------------------------------------------------
def reference(inputs, p):
    def ln(x, g, b):
        mu = jnp.mean(x, -1, keepdims=True)
        var = jnp.mean((x - mu) ** 2, -1, keepdims=True)
        return (x - mu) / jnp.sqrt(var + LN_EPS) * g + b

    xn = ln(inputs, p["g1"][0], p["b1"][0])
    h = xn @ p["w1"] + p["c1"][0]
    h = 0.5 * h * (1.0 + jax.scipy.special.erf(h / jnp.sqrt(2.0)))
    y = h @ p["w2"] + p["c2"][0]
    yn = ln(y, p["g2"][0], p["b2"][0])

    B, N, C = yn.shape
    qkv = yn @ p["wqkv"]
    q, k, v = jnp.split(qkv, 3, axis=-1)
    q = q.reshape(B, N, NUM_HEADS, HEAD_DIM).transpose(0, 2, 1, 3)
    k = k.reshape(B, N, NUM_HEADS, HEAD_DIM).transpose(0, 2, 1, 3)
    v = v.reshape(B, N, NUM_HEADS, HEAD_DIM).transpose(0, 2, 1, 3)
    attn = jnp.einsum("bhqd,bhkd->bhqk", q, k) * HEAD_DIM ** -0.5
    attn = jax.nn.softmax(attn, axis=-1)
    o = jnp.einsum("bhqk,bhkd->bhqd", attn, v).transpose(0, 2, 1, 3).reshape(B, N, C)
    return o @ p["wproj"] + p["cproj"][0]


if __name__ == "__main__":
    key = jax.random.PRNGKey(0)
    k_feat, k_dir, k_ang, k_par = jax.random.split(key, 4)
    params = init_params(k_par)

    # small correctness run (single tile)
    B = 2
    feats = jax.random.normal(k_feat, (B, C_ANGLE, FEAT_DIM), jnp.float32)
    dirs = jax.random.normal(k_dir, (B, 4), jnp.float32)
    angle = jax.random.normal(k_ang, (B, C_ANGLE * 3), jnp.float32)
    inputs = preprocess(feats, dirs, angle)                         # (2, 6, 132)

    out = run_atten_feat(inputs, params)
    out = jax.block_until_ready(out)
    ref = reference(inputs, params)
    assert out.shape == (B, C_ANGLE, IN_DIM)
    np.testing.assert_allclose(np.asarray(out), np.asarray(ref), rtol=2e-4, atol=2e-4)

    # multi-tile + row-padding path (2 grid steps)
    B2 = 20
    feats2 = jax.random.normal(k_feat, (B2, C_ANGLE, FEAT_DIM), jnp.float32)
    dirs2 = jax.random.normal(k_dir, (B2, 4), jnp.float32)
    angle2 = jax.random.normal(k_ang, (B2, C_ANGLE * 3), jnp.float32)
    inputs2 = preprocess(feats2, dirs2, angle2)
    out2 = jax.block_until_ready(run_atten_feat(inputs2, params))
    ref2 = reference(inputs2, params)
    np.testing.assert_allclose(np.asarray(out2), np.asarray(ref2), rtol=2e-4, atol=2e-4)

    print("KERNEL_OK")
</pallas_src>

<mosaic_0001>
module attributes {stable_mosaic.version = 11 : i64} {
  func.func @atten_feat_kernel(%arg0: i32, %arg1: memref<24x132xf32, #tpu.memory_space<vmem>>, %arg2: memref<24x24xf32, #tpu.memory_space<vmem>>, %arg3: memref<1x132xf32, #tpu.memory_space<vmem>>, %arg4: memref<1x132xf32, #tpu.memory_space<vmem>>, %arg5: memref<132x256xf32, #tpu.memory_space<vmem>>, %arg6: memref<1x256xf32, #tpu.memory_space<vmem>>, %arg7: memref<256x132xf32, #tpu.memory_space<vmem>>, %arg8: memref<1x132xf32, #tpu.memory_space<vmem>>, %arg9: memref<1x132xf32, #tpu.memory_space<vmem>>, %arg10: memref<1x132xf32, #tpu.memory_space<vmem>>, %arg11: memref<6x132x22xf32, #tpu.memory_space<vmem>>, %arg12: memref<6x132x22xf32, #tpu.memory_space<vmem>>, %arg13: memref<6x132x22xf32, #tpu.memory_space<vmem>>, %arg14: memref<6x22x132xf32, #tpu.memory_space<vmem>>, %arg15: memref<1x132xf32, #tpu.memory_space<vmem>>, %arg16: memref<24x132xf32, #tpu.memory_space<vmem>>) attributes {dimension_semantics = [#tpu.dimension_semantics<parallel>], iteration_bounds = array<i64: 1>, scalar_prefetch = 0 : i64, scratch_operands = 0 : i64, tpu.core_type = #tpu.core_type<tc>, window_params = [{transform_indices = @transform_0, window_bounds = array<i64: 24, 132>}, {pipeline_mode = #tpu.pipeline_mode<synchronous>, transform_indices = @transform_1, window_bounds = array<i64: 24, 24>}, {pipeline_mode = #tpu.pipeline_mode<synchronous>, transform_indices = @transform_2, window_bounds = array<i64: 1, 132>}, {pipeline_mode = #tpu.pipeline_mode<synchronous>, transform_indices = @transform_3, window_bounds = array<i64: 1, 132>}, {pipeline_mode = #tpu.pipeline_mode<synchronous>, transform_indices = @transform_4, window_bounds = array<i64: 132, 256>}, {pipeline_mode = #tpu.pipeline_mode<synchronous>, transform_indices = @transform_5, window_bounds = array<i64: 1, 256>}, {pipeline_mode = #tpu.pipeline_mode<synchronous>, transform_indices = @transform_6, window_bounds = array<i64: 256, 132>}, {pipeline_mode = #tpu.pipeline_mode<synchronous>, transform_indices = @transform_7, window_bounds = array<i64: 1, 132>}, {pipeline_mode = #tpu.pipeline_mode<synchronous>, transform_indices = @transform_8, window_bounds = array<i64: 1, 132>}, {pipeline_mode = #tpu.pipeline_mode<synchronous>, transform_indices = @transform_9, window_bounds = array<i64: 1, 132>}, {pipeline_mode = #tpu.pipeline_mode<synchronous>, transform_indices = @transform_10, window_bounds = array<i64: 6, 132, 22>}, {pipeline_mode = #tpu.pipeline_mode<synchronous>, transform_indices = @transform_11, window_bounds = array<i64: 6, 132, 22>}, {pipeline_mode = #tpu.pipeline_mode<synchronous>, transform_indices = @transform_12, window_bounds = array<i64: 6, 132, 22>}, {pipeline_mode = #tpu.pipeline_mode<synchronous>, transform_indices = @transform_13, window_bounds = array<i64: 6, 22, 132>}, {pipeline_mode = #tpu.pipeline_mode<synchronous>, transform_indices = @transform_14, window_bounds = array<i64: 1, 132>}, {transform_indices = @transform_15, window_bounds = array<i64: 24, 132>}]} {
    %c0 = arith.constant 0 : index
    %c0_0 = arith.constant 0 : index
    %0 = vector.load %arg1[%c0, %c0_0] : memref<24x132xf32, #tpu.memory_space<vmem>>, vector<24x132xf32>
    %c0_1 = arith.constant 0 : index
    %c0_2 = arith.constant 0 : index
    %1 = vector.load %arg3[%c0_1, %c0_2] : memref<1x132xf32, #tpu.memory_space<vmem>>, vector<1x132xf32>
    %c0_3 = arith.constant 0 : index
    %c0_4 = arith.constant 0 : index
    %2 = vector.load %arg4[%c0_3, %c0_4] : memref<1x132xf32, #tpu.memory_space<vmem>>, vector<1x132xf32>
    %cst = arith.constant dense<0.000000e+00> : vector<24xf32>
    %3 = vector.multi_reduction <add>, %0, %cst [1] : vector<24x132xf32> to vector<24xf32>
    %4 = vector.shape_cast %3 : vector<24xf32> to vector<24x1xf32>
    %cst_5 = arith.constant 1.320000e+02 : f32
    %5 = vector.broadcast %cst_5 : f32 to vector<24x1xf32>
    %6 = arith.divf %4, %5 : vector<24x1xf32>
    %7 = vector.broadcast %6 : vector<24x1xf32> to vector<24x132xf32>
    %8 = arith.subf %0, %7 : vector<24x132xf32>
    %9 = arith.mulf %8, %8 : vector<24x132xf32>
    %cst_6 = arith.constant dense<0.000000e+00> : vector<24xf32>
    %10 = vector.multi_reduction <add>, %9, %cst_6 [1] : vector<24x132xf32> to vector<24xf32>
    %11 = vector.shape_cast %10 : vector<24xf32> to vector<24x1xf32>
    %cst_7 = arith.constant 1.320000e+02 : f32
    %12 = vector.broadcast %cst_7 : f32 to vector<24x1xf32>
    %13 = arith.divf %11, %12 : vector<24x1xf32>
    %14 = vector.broadcast %6 : vector<24x1xf32> to vector<24x132xf32>
    %15 = arith.subf %0, %14 : vector<24x132xf32>
    %cst_8 = arith.constant 9.99999974E-6 : f32
    %16 = vector.broadcast %cst_8 : f32 to vector<24x1xf32>
    %17 = arith.addf %13, %16 : vector<24x1xf32>
    %18 = math.rsqrt %17 : vector<24x1xf32>
    %19 = vector.broadcast %18 : vector<24x1xf32> to vector<24x132xf32>
    %20 = arith.mulf %15, %19 : vector<24x132xf32>
    %21 = vector.broadcast %1 : vector<1x132xf32> to vector<24x132xf32>
    %22 = arith.mulf %20, %21 : vector<24x132xf32>
    %23 = vector.broadcast %2 : vector<1x132xf32> to vector<24x132xf32>
    %24 = arith.addf %22, %23 : vector<24x132xf32>
    %c0_9 = arith.constant 0 : index
    %c0_10 = arith.constant 0 : index
    %25 = vector.load %arg5[%c0_9, %c0_10] : memref<132x256xf32, #tpu.memory_space<vmem>>, vector<132x256xf32>
    %cst_11 = arith.constant dense<0.000000e+00> : vector<24x256xf32>
    %26 = tpu.matmul %24, %25, %cst_11 {dimension_numbers = #tpu.dot_dimension_numbers<[1], [0], [0], [1], [0, 0, 1, 1], [], []>} : vector<24x132xf32>, vector<132x256xf32>, vector<24x256xf32> -> vector<24x256xf32>
    %c0_12 = arith.constant 0 : index
    %c0_13 = arith.constant 0 : index
    %27 = vector.load %arg6[%c0_12, %c0_13] : memref<1x256xf32, #tpu.memory_space<vmem>>, vector<1x256xf32>
    %28 = vector.broadcast %27 : vector<1x256xf32> to vector<24x256xf32>
    %29 = arith.addf %26, %28 : vector<24x256xf32>
    %cst_14 = arith.constant 5.000000e-01 : f32
    %30 = vector.broadcast %cst_14 : f32 to vector<24x256xf32>
    %31 = arith.mulf %30, %29 : vector<24x256xf32>
    %cst_15 = arith.constant 0.707106769 : f32
    %32 = vector.broadcast %cst_15 : f32 to vector<24x256xf32>
    %33 = arith.mulf %29, %32 : vector<24x256xf32>
    %34 = math.erf %33 : vector<24x256xf32>
    %cst_16 = arith.constant 1.000000e+00 : f32
    %35 = vector.broadcast %cst_16 : f32 to vector<24x256xf32>
    %36 = arith.addf %35, %34 : vector<24x256xf32>
    %37 = arith.mulf %31, %36 : vector<24x256xf32>
    %c0_17 = arith.constant 0 : index
    %c0_18 = arith.constant 0 : index
    %38 = vector.load %arg7[%c0_17, %c0_18] : memref<256x132xf32, #tpu.memory_space<vmem>>, vector<256x132xf32>
    %cst_19 = arith.constant dense<0.000000e+00> : vector<24x132xf32>
    %39 = tpu.matmul %37, %38, %cst_19 {dimension_numbers = #tpu.dot_dimension_numbers<[1], [0], [0], [1], [0, 0, 1, 1], [], []>} : vector<24x256xf32>, vector<256x132xf32>, vector<24x132xf32> -> vector<24x132xf32>
    %c0_20 = arith.constant 0 : index
    %c0_21 = arith.constant 0 : index
    %40 = vector.load %arg8[%c0_20, %c0_21] : memref<1x132xf32, #tpu.memory_space<vmem>>, vector<1x132xf32>
    %41 = vector.broadcast %40 : vector<1x132xf32> to vector<24x132xf32>
    %42 = arith.addf %39, %41 : vector<24x132xf32>
    %c0_22 = arith.constant 0 : index
    %c0_23 = arith.constant 0 : index
    %43 = vector.load %arg9[%c0_22, %c0_23] : memref<1x132xf32, #tpu.memory_space<vmem>>, vector<1x132xf32>
    %c0_24 = arith.constant 0 : index
    %c0_25 = arith.constant 0 : index
    %44 = vector.load %arg10[%c0_24, %c0_25] : memref<1x132xf32, #tpu.memory_space<vmem>>, vector<1x132xf32>
    %cst_26 = arith.constant dense<0.000000e+00> : vector<24xf32>
    %45 = vector.multi_reduction <add>, %42, %cst_26 [1] : vector<24x132xf32> to vector<24xf32>
    %46 = vector.shape_cast %45 : vector<24xf32> to vector<24x1xf32>
    %cst_27 = arith.constant 1.320000e+02 : f32
    %47 = vector.broadcast %cst_27 : f32 to vector<24x1xf32>
    %48 = arith.divf %46, %47 : vector<24x1xf32>
    %49 = vector.broadcast %48 : vector<24x1xf32> to vector<24x132xf32>
    %50 = arith.subf %42, %49 : vector<24x132xf32>
    %51 = arith.mulf %50, %50 : vector<24x132xf32>
    %cst_28 = arith.constant dense<0.000000e+00> : vector<24xf32>
    %52 = vector.multi_reduction <add>, %51, %cst_28 [1] : vector<24x132xf32> to vector<24xf32>
    %53 = vector.shape_cast %52 : vector<24xf32> to vector<24x1xf32>
    %cst_29 = arith.constant 1.320000e+02 : f32
    %54 = vector.broadcast %cst_29 : f32 to vector<24x1xf32>
    %55 = arith.divf %53, %54 : vector<24x1xf32>
    %56 = vector.broadcast %48 : vector<24x1xf32> to vector<24x132xf32>
    %57 = arith.subf %42, %56 : vector<24x132xf32>
    %cst_30 = arith.constant 9.99999974E-6 : f32
    %58 = vector.broadcast %cst_30 : f32 to vector<24x1xf32>
    %59 = arith.addf %55, %58 : vector<24x1xf32>
    %60 = math.rsqrt %59 : vector<24x1xf32>
    %61 = vector.broadcast %60 : vector<24x1xf32> to vector<24x132xf32>
    %62 = arith.mulf %57, %61 : vector<24x132xf32>
    %63 = vector.broadcast %43 : vector<1x132xf32> to vector<24x132xf32>
    %64 = arith.mulf %62, %63 : vector<24x132xf32>
    %65 = vector.broadcast %44 : vector<1x132xf32> to vector<24x132xf32>
    %66 = arith.addf %64, %65 : vector<24x132xf32>
    %c0_31 = arith.constant 0 : index
    %c0_32 = arith.constant 0 : index
    %67 = vector.load %arg2[%c0_31, %c0_32] : memref<24x24xf32, #tpu.memory_space<vmem>>, vector<24x24xf32>
    %cst_33 = arith.constant 0.000000e+00 : f32
    %68 = vector.broadcast %cst_33 : f32 to vector<24x132xf32>
    %c0_34 = arith.constant 0 : index
    %c0_35 = arith.constant 0 : index
    %c0_36 = arith.constant 0 : index
    %69 = vector.load %arg11[%c0_34, %c0_35, %c0_36] : memref<6x132x22xf32, #tpu.memory_space<vmem>>, vector<1x132x22xf32>
    %70 = vector.shape_cast %69 : vector<1x132x22xf32> to vector<132x22xf32>
    %cst_37 = arith.constant dense<0.000000e+00> : vector<24x22xf32>
    %71 = tpu.matmul %66, %70, %cst_37 {dimension_numbers = #tpu.dot_dimension_numbers<[1], [0], [0], [1], [0, 0, 1, 1], [], []>} : vector<24x132xf32>, vector<132x22xf32>, vector<24x22xf32> -> vector<24x22xf32>
    %cst_38 = arith.constant 0.213200718 : f32
    %72 = vector.broadcast %cst_38 : f32 to vector<24x22xf32>
    %73 = arith.mulf %71, %72 : vector<24x22xf32>
    %c0_39 = arith.constant 0 : index
    %c0_40 = arith.constant 0 : index
    %c0_41 = arith.constant 0 : index
    %74 = vector.load %arg12[%c0_39, %c0_40, %c0_41] : memref<6x132x22xf32, #tpu.memory_space<vmem>>, vector<1x132x22xf32>
    %75 = vector.shape_cast %74 : vector<1x132x22xf32> to vector<132x22xf32>
    %cst_42 = arith.constant dense<0.000000e+00> : vector<24x22xf32>
    %76 = tpu.matmul %66, %75, %cst_42 {dimension_numbers = #tpu.dot_dimension_numbers<[1], [0], [0], [1], [0, 0, 1, 1], [], []>} : vector<24x132xf32>, vector<132x22xf32>, vector<24x22xf32> -> vector<24x22xf32>
    %c0_43 = arith.constant 0 : index
    %c0_44 = arith.constant 0 : index
    %c0_45 = arith.constant 0 : index
    %77 = vector.load %arg13[%c0_43, %c0_44, %c0_45] : memref<6x132x22xf32, #tpu.memory_space<vmem>>, vector<1x132x22xf32>
    %78 = vector.shape_cast %77 : vector<1x132x22xf32> to vector<132x22xf32>
    %cst_46 = arith.constant dense<0.000000e+00> : vector<24x22xf32>
    %79 = tpu.matmul %66, %78, %cst_46 {dimension_numbers = #tpu.dot_dimension_numbers<[1], [0], [0], [1], [0, 0, 1, 1], [], []>} : vector<24x132xf32>, vector<132x22xf32>, vector<24x22xf32> -> vector<24x22xf32>
    %cst_47 = arith.constant dense<0.000000e+00> : vector<24x24xf32>
    %80 = tpu.matmul %73, %76, %cst_47 {dimension_numbers = #tpu.dot_dimension_numbers<[1], [1], [0], [0], [0, 0, 1, 0], [], []>} : vector<24x22xf32>, vector<24x22xf32>, vector<24x24xf32> -> vector<24x24xf32>
    %81 = arith.addf %80, %67 : vector<24x24xf32>
    %cst_48 = arith.constant dense<0xFF800000> : vector<24xf32>
    %82 = vector.multi_reduction <maximumf>, %81, %cst_48 [1] : vector<24x24xf32> to vector<24xf32>
    %83 = vector.shape_cast %82 : vector<24xf32> to vector<24x1xf32>
    %84 = vector.broadcast %83 : vector<24x1xf32> to vector<24x24xf32>
    %85 = arith.subf %81, %84 : vector<24x24xf32>
    %86 = math.exp %85 : vector<24x24xf32>
    %cst_49 = arith.constant dense<0.000000e+00> : vector<24xf32>
    %87 = vector.multi_reduction <add>, %86, %cst_49 [1] : vector<24x24xf32> to vector<24xf32>
    %88 = vector.shape_cast %87 : vector<24xf32> to vector<24x1xf32>
    %89 = vector.broadcast %88 : vector<24x1xf32> to vector<24x24xf32>
    %90 = arith.divf %86, %89 : vector<24x24xf32>
    %cst_50 = arith.constant dense<0.000000e+00> : vector<24x22xf32>
    %91 = tpu.matmul %90, %79, %cst_50 {dimension_numbers = #tpu.dot_dimension_numbers<[1], [0], [0], [1], [0, 0, 1, 1], [], []>} : vector<24x24xf32>, vector<24x22xf32>, vector<24x22xf32> -> vector<24x22xf32>
    %c0_51 = arith.constant 0 : index
    %c0_52 = arith.constant 0 : index
    %c0_53 = arith.constant 0 : index
    %92 = vector.load %arg14[%c0_51, %c0_52, %c0_53] : memref<6x22x132xf32, #tpu.memory_space<vmem>>, vector<1x22x132xf32>
    %93 = vector.shape_cast %92 : vector<1x22x132xf32> to vector<22x132xf32>
    %cst_54 = arith.constant dense<0.000000e+00> : vector<24x132xf32>
    %94 = tpu.matmul %91, %93, %cst_54 {dimension_numbers = #tpu.dot_dimension_numbers<[1], [0], [0], [1], [0, 0, 1, 1], [], []>} : vector<24x22xf32>, vector<22x132xf32>, vector<24x132xf32> -> vector<24x132xf32>
    %95 = arith.addf %68, %94 : vector<24x132xf32>
    %c1 = arith.constant 1 : index
    %c0_55 = arith.constant 0 : index
    %c0_56 = arith.constant 0 : index
    %96 = vector.load %arg11[%c1, %c0_55, %c0_56] : memref<6x132x22xf32, #tpu.memory_space<vmem>>, vector<1x132x22xf32>
    %97 = vector.shape_cast %96 : vector<1x132x22xf32> to vector<132x22xf32>
    %cst_57 = arith.constant dense<0.000000e+00> : vector<24x22xf32>
    %98 = tpu.matmul %66, %97, %cst_57 {dimension_numbers = #tpu.dot_dimension_numbers<[1], [0], [0], [1], [0, 0, 1, 1], [], []>} : vector<24x132xf32>, vector<132x22xf32>, vector<24x22xf32> -> vector<24x22xf32>
    %cst_58 = arith.constant 0.213200718 : f32
    %99 = vector.broadcast %cst_58 : f32 to vector<24x22xf32>
    %100 = arith.mulf %98, %99 : vector<24x22xf32>
    %c1_59 = arith.constant 1 : index
    %c0_60 = arith.constant 0 : index
    %c0_61 = arith.constant 0 : index
    %101 = vector.load %arg12[%c1_59, %c0_60, %c0_61] : memref<6x132x22xf32, #tpu.memory_space<vmem>>, vector<1x132x22xf32>
    %102 = vector.shape_cast %101 : vector<1x132x22xf32> to vector<132x22xf32>
    %cst_62 = arith.constant dense<0.000000e+00> : vector<24x22xf32>
    %103 = tpu.matmul %66, %102, %cst_62 {dimension_numbers = #tpu.dot_dimension_numbers<[1], [0], [0], [1], [0, 0, 1, 1], [], []>} : vector<24x132xf32>, vector<132x22xf32>, vector<24x22xf32> -> vector<24x22xf32>
    %c1_63 = arith.constant 1 : index
    %c0_64 = arith.constant 0 : index
    %c0_65 = arith.constant 0 : index
    %104 = vector.load %arg13[%c1_63, %c0_64, %c0_65] : memref<6x132x22xf32, #tpu.memory_space<vmem>>, vector<1x132x22xf32>
    %105 = vector.shape_cast %104 : vector<1x132x22xf32> to vector<132x22xf32>
    %cst_66 = arith.constant dense<0.000000e+00> : vector<24x22xf32>
    %106 = tpu.matmul %66, %105, %cst_66 {dimension_numbers = #tpu.dot_dimension_numbers<[1], [0], [0], [1], [0, 0, 1, 1], [], []>} : vector<24x132xf32>, vector<132x22xf32>, vector<24x22xf32> -> vector<24x22xf32>
    %cst_67 = arith.constant dense<0.000000e+00> : vector<24x24xf32>
    %107 = tpu.matmul %100, %103, %cst_67 {dimension_numbers = #tpu.dot_dimension_numbers<[1], [1], [0], [0], [0, 0, 1, 0], [], []>} : vector<24x22xf32>, vector<24x22xf32>, vector<24x24xf32> -> vector<24x24xf32>
    %108 = arith.addf %107, %67 : vector<24x24xf32>
    %cst_68 = arith.constant dense<0xFF800000> : vector<24xf32>
    %109 = vector.multi_reduction <maximumf>, %108, %cst_68 [1] : vector<24x24xf32> to vector<24xf32>
    %110 = vector.shape_cast %109 : vector<24xf32> to vector<24x1xf32>
    %111 = vector.broadcast %110 : vector<24x1xf32> to vector<24x24xf32>
    %112 = arith.subf %108, %111 : vector<24x24xf32>
    %113 = math.exp %112 : vector<24x24xf32>
    %cst_69 = arith.constant dense<0.000000e+00> : vector<24xf32>
    %114 = vector.multi_reduction <add>, %113, %cst_69 [1] : vector<24x24xf32> to vector<24xf32>
    %115 = vector.shape_cast %114 : vector<24xf32> to vector<24x1xf32>
    %116 = vector.broadcast %115 : vector<24x1xf32> to vector<24x24xf32>
    %117 = arith.divf %113, %116 : vector<24x24xf32>
    %cst_70 = arith.constant dense<0.000000e+00> : vector<24x22xf32>
    %118 = tpu.matmul %117, %106, %cst_70 {dimension_numbers = #tpu.dot_dimension_numbers<[1], [0], [0], [1], [0, 0, 1, 1], [], []>} : vector<24x24xf32>, vector<24x22xf32>, vector<24x22xf32> -> vector<24x22xf32>
    %c1_71 = arith.constant 1 : index
    %c0_72 = arith.constant 0 : index
    %c0_73 = arith.constant 0 : index
    %119 = vector.load %arg14[%c1_71, %c0_72, %c0_73] : memref<6x22x132xf32, #tpu.memory_space<vmem>>, vector<1x22x132xf32>
    %120 = vector.shape_cast %119 : vector<1x22x132xf32> to vector<22x132xf32>
    %cst_74 = arith.constant dense<0.000000e+00> : vector<24x132xf32>
    %121 = tpu.matmul %118, %120, %cst_74 {dimension_numbers = #tpu.dot_dimension_numbers<[1], [0], [0], [1], [0, 0, 1, 1], [], []>} : vector<24x22xf32>, vector<22x132xf32>, vector<24x132xf32> -> vector<24x132xf32>
    %122 = arith.addf %95, %121 : vector<24x132xf32>
    %c2 = arith.constant 2 : index
    %c0_75 = arith.constant 0 : index
    %c0_76 = arith.constant 0 : index
    %123 = vector.load %arg11[%c2, %c0_75, %c0_76] : memref<6x132x22xf32, #tpu.memory_space<vmem>>, vector<1x132x22xf32>
    %124 = vector.shape_cast %123 : vector<1x132x22xf32> to vector<132x22xf32>
    %cst_77 = arith.constant dense<0.000000e+00> : vector<24x22xf32>
    %125 = tpu.matmul %66, %124, %cst_77 {dimension_numbers = #tpu.dot_dimension_numbers<[1], [0], [0], [1], [0, 0, 1, 1], [], []>} : vector<24x132xf32>, vector<132x22xf32>, vector<24x22xf32> -> vector<24x22xf32>
    %cst_78 = arith.constant 0.213200718 : f32
    %126 = vector.broadcast %cst_78 : f32 to vector<24x22xf32>
    %127 = arith.mulf %125, %126 : vector<24x22xf32>
    %c2_79 = arith.constant 2 : index
    %c0_80 = arith.constant 0 : index
    %c0_81 = arith.constant 0 : index
    %128 = vector.load %arg12[%c2_79, %c0_80, %c0_81] : memref<6x132x22xf32, #tpu.memory_space<vmem>>, vector<1x132x22xf32>
    %129 = vector.shape_cast %128 : vector<1x132x22xf32> to vector<132x22xf32>
    %cst_82 = arith.constant dense<0.000000e+00> : vector<24x22xf32>
    %130 = tpu.matmul %66, %129, %cst_82 {dimension_numbers = #tpu.dot_dimension_numbers<[1], [0], [0], [1], [0, 0, 1, 1], [], []>} : vector<24x132xf32>, vector<132x22xf32>, vector<24x22xf32> -> vector<24x22xf32>
    %c2_83 = arith.constant 2 : index
    %c0_84 = arith.constant 0 : index
    %c0_85 = arith.constant 0 : index
    %131 = vector.load %arg13[%c2_83, %c0_84, %c0_85] : memref<6x132x22xf32, #tpu.memory_space<vmem>>, vector<1x132x22xf32>
    %132 = vector.shape_cast %131 : vector<1x132x22xf32> to vector<132x22xf32>
    %cst_86 = arith.constant dense<0.000000e+00> : vector<24x22xf32>
    %133 = tpu.matmul %66, %132, %cst_86 {dimension_numbers = #tpu.dot_dimension_numbers<[1], [0], [0], [1], [0, 0, 1, 1], [], []>} : vector<24x132xf32>, vector<132x22xf32>, vector<24x22xf32> -> vector<24x22xf32>
    %cst_87 = arith.constant dense<0.000000e+00> : vector<24x24xf32>
    %134 = tpu.matmul %127, %130, %cst_87 {dimension_numbers = #tpu.dot_dimension_numbers<[1], [1], [0], [0], [0, 0, 1, 0], [], []>} : vector<24x22xf32>, vector<24x22xf32>, vector<24x24xf32> -> vector<24x24xf32>
    %135 = arith.addf %134, %67 : vector<24x24xf32>
    %cst_88 = arith.constant dense<0xFF800000> : vector<24xf32>
    %136 = vector.multi_reduction <maximumf>, %135, %cst_88 [1] : vector<24x24xf32> to vector<24xf32>
    %137 = vector.shape_cast %136 : vector<24xf32> to vector<24x1xf32>
    %138 = vector.broadcast %137 : vector<24x1xf32> to vector<24x24xf32>
    %139 = arith.subf %135, %138 : vector<24x24xf32>
    %140 = math.exp %139 : vector<24x24xf32>
    %cst_89 = arith.constant dense<0.000000e+00> : vector<24xf32>
    %141 = vector.multi_reduction <add>, %140, %cst_89 [1] : vector<24x24xf32> to vector<24xf32>
    %142 = vector.shape_cast %141 : vector<24xf32> to vector<24x1xf32>
    %143 = vector.broadcast %142 : vector<24x1xf32> to vector<24x24xf32>
    %144 = arith.divf %140, %143 : vector<24x24xf32>
    %cst_90 = arith.constant dense<0.000000e+00> : vector<24x22xf32>
    %145 = tpu.matmul %144, %133, %cst_90 {dimension_numbers = #tpu.dot_dimension_numbers<[1], [0], [0], [1], [0, 0, 1, 1], [], []>} : vector<24x24xf32>, vector<24x22xf32>, vector<24x22xf32> -> vector<24x22xf32>
    %c2_91 = arith.constant 2 : index
    %c0_92 = arith.constant 0 : index
    %c0_93 = arith.constant 0 : index
    %146 = vector.load %arg14[%c2_91, %c0_92, %c0_93] : memref<6x22x132xf32, #tpu.memory_space<vmem>>, vector<1x22x132xf32>
    %147 = vector.shape_cast %146 : vector<1x22x132xf32> to vector<22x132xf32>
    %cst_94 = arith.constant dense<0.000000e+00> : vector<24x132xf32>
    %148 = tpu.matmul %145, %147, %cst_94 {dimension_numbers = #tpu.dot_dimension_numbers<[1], [0], [0], [1], [0, 0, 1, 1], [], []>} : vector<24x22xf32>, vector<22x132xf32>, vector<24x132xf32> -> vector<24x132xf32>
    %149 = arith.addf %122, %148 : vector<24x132xf32>
    %c3 = arith.constant 3 : index
    %c0_95 = arith.constant 0 : index
    %c0_96 = arith.constant 0 : index
    %150 = vector.load %arg11[%c3, %c0_95, %c0_96] : memref<6x132x22xf32, #tpu.memory_space<vmem>>, vector<1x132x22xf32>
    %151 = vector.shape_cast %150 : vector<1x132x22xf32> to vector<132x22xf32>
    %cst_97 = arith.constant dense<0.000000e+00> : vector<24x22xf32>
    %152 = tpu.matmul %66, %151, %cst_97 {dimension_numbers = #tpu.dot_dimension_numbers<[1], [0], [0], [1], [0, 0, 1, 1], [], []>} : vector<24x132xf32>, vector<132x22xf32>, vector<24x22xf32> -> vector<24x22xf32>
    %cst_98 = arith.constant 0.213200718 : f32
    %153 = vector.broadcast %cst_98 : f32 to vector<24x22xf32>
    %154 = arith.mulf %152, %153 : vector<24x22xf32>
    %c3_99 = arith.constant 3 : index
    %c0_100 = arith.constant 0 : index
    %c0_101 = arith.constant 0 : index
    %155 = vector.load %arg12[%c3_99, %c0_100, %c0_101] : memref<6x132x22xf32, #tpu.memory_space<vmem>>, vector<1x132x22xf32>
    %156 = vector.shape_cast %155 : vector<1x132x22xf32> to vector<132x22xf32>
    %cst_102 = arith.constant dense<0.000000e+00> : vector<24x22xf32>
    %157 = tpu.matmul %66, %156, %cst_102 {dimension_numbers = #tpu.dot_dimension_numbers<[1], [0], [0], [1], [0, 0, 1, 1], [], []>} : vector<24x132xf32>, vector<132x22xf32>, vector<24x22xf32> -> vector<24x22xf32>
    %c3_103 = arith.constant 3 : index
    %c0_104 = arith.constant 0 : index
    %c0_105 = arith.constant 0 : index
    %158 = vector.load %arg13[%c3_103, %c0_104, %c0_105] : memref<6x132x22xf32, #tpu.memory_space<vmem>>, vector<1x132x22xf32>
    %159 = vector.shape_cast %158 : vector<1x132x22xf32> to vector<132x22xf32>
    %cst_106 = arith.constant dense<0.000000e+00> : vector<24x22xf32>
    %160 = tpu.matmul %66, %159, %cst_106 {dimension_numbers = #tpu.dot_dimension_numbers<[1], [0], [0], [1], [0, 0, 1, 1], [], []>} : vector<24x132xf32>, vector<132x22xf32>, vector<24x22xf32> -> vector<24x22xf32>
    %cst_107 = arith.constant dense<0.000000e+00> : vector<24x24xf32>
    %161 = tpu.matmul %154, %157, %cst_107 {dimension_numbers = #tpu.dot_dimension_numbers<[1], [1], [0], [0], [0, 0, 1, 0], [], []>} : vector<24x22xf32>, vector<24x22xf32>, vector<24x24xf32> -> vector<24x24xf32>
    %162 = arith.addf %161, %67 : vector<24x24xf32>
    %cst_108 = arith.constant dense<0xFF800000> : vector<24xf32>
    %163 = vector.multi_reduction <maximumf>, %162, %cst_108 [1] : vector<24x24xf32> to vector<24xf32>
    %164 = vector.shape_cast %163 : vector<24xf32> to vector<24x1xf32>
    %165 = vector.broadcast %164 : vector<24x1xf32> to vector<24x24xf32>
    %166 = arith.subf %162, %165 : vector<24x24xf32>
    %167 = math.exp %166 : vector<24x24xf32>
    %cst_109 = arith.constant dense<0.000000e+00> : vector<24xf32>
    %168 = vector.multi_reduction <add>, %167, %cst_109 [1] : vector<24x24xf32> to vector<24xf32>
    %169 = vector.shape_cast %168 : vector<24xf32> to vector<24x1xf32>
    %170 = vector.broadcast %169 : vector<24x1xf32> to vector<24x24xf32>
    %171 = arith.divf %167, %170 : vector<24x24xf32>
    %cst_110 = arith.constant dense<0.000000e+00> : vector<24x22xf32>
    %172 = tpu.matmul %171, %160, %cst_110 {dimension_numbers = #tpu.dot_dimension_numbers<[1], [0], [0], [1], [0, 0, 1, 1], [], []>} : vector<24x24xf32>, vector<24x22xf32>, vector<24x22xf32> -> vector<24x22xf32>
    %c3_111 = arith.constant 3 : index
    %c0_112 = arith.constant 0 : index
    %c0_113 = arith.constant 0 : index
    %173 = vector.load %arg14[%c3_111, %c0_112, %c0_113] : memref<6x22x132xf32, #tpu.memory_space<vmem>>, vector<1x22x132xf32>
    %174 = vector.shape_cast %173 : vector<1x22x132xf32> to vector<22x132xf32>
    %cst_114 = arith.constant dense<0.000000e+00> : vector<24x132xf32>
    %175 = tpu.matmul %172, %174, %cst_114 {dimension_numbers = #tpu.dot_dimension_numbers<[1], [0], [0], [1], [0, 0, 1, 1], [], []>} : vector<24x22xf32>, vector<22x132xf32>, vector<24x132xf32> -> vector<24x132xf32>
    %176 = arith.addf %149, %175 : vector<24x132xf32>
    %c4 = arith.constant 4 : index
    %c0_115 = arith.constant 0 : index
    %c0_116 = arith.constant 0 : index
    %177 = vector.load %arg11[%c4, %c0_115, %c0_116] : memref<6x132x22xf32, #tpu.memory_space<vmem>>, vector<1x132x22xf32>
    %178 = vector.shape_cast %177 : vector<1x132x22xf32> to vector<132x22xf32>
    %cst_117 = arith.constant dense<0.000000e+00> : vector<24x22xf32>
    %179 = tpu.matmul %66, %178, %cst_117 {dimension_numbers = #tpu.dot_dimension_numbers<[1], [0], [0], [1], [0, 0, 1, 1], [], []>} : vector<24x132xf32>, vector<132x22xf32>, vector<24x22xf32> -> vector<24x22xf32>
    %cst_118 = arith.constant 0.213200718 : f32
    %180 = vector.broadcast %cst_118 : f32 to vector<24x22xf32>
    %181 = arith.mulf %179, %180 : vector<24x22xf32>
    %c4_119 = arith.constant 4 : index
    %c0_120 = arith.constant 0 : index
    %c0_121 = arith.constant 0 : index
    %182 = vector.load %arg12[%c4_119, %c0_120, %c0_121] : memref<6x132x22xf32, #tpu.memory_space<vmem>>, vector<1x132x22xf32>
    %183 = vector.shape_cast %182 : vector<1x132x22xf32> to vector<132x22xf32>
    %cst_122 = arith.constant dense<0.000000e+00> : vector<24x22xf32>
    %184 = tpu.matmul %66, %183, %cst_122 {dimension_numbers = #tpu.dot_dimension_numbers<[1], [0], [0], [1], [0, 0, 1, 1], [], []>} : vector<24x132xf32>, vector<132x22xf32>, vector<24x22xf32> -> vector<24x22xf32>
    %c4_123 = arith.constant 4 : index
    %c0_124 = arith.constant 0 : index
    %c0_125 = arith.constant 0 : index
    %185 = vector.load %arg13[%c4_123, %c0_124, %c0_125] : memref<6x132x22xf32, #tpu.memory_space<vmem>>, vector<1x132x22xf32>
    %186 = vector.shape_cast %185 : vector<1x132x22xf32> to vector<132x22xf32>
    %cst_126 = arith.constant dense<0.000000e+00> : vector<24x22xf32>
    %187 = tpu.matmul %66, %186, %cst_126 {dimension_numbers = #tpu.dot_dimension_numbers<[1], [0], [0], [1], [0, 0, 1, 1], [], []>} : vector<24x132xf32>, vector<132x22xf32>, vector<24x22xf32> -> vector<24x22xf32>
    %cst_127 = arith.constant dense<0.000000e+00> : vector<24x24xf32>
    %188 = tpu.matmul %181, %184, %cst_127 {dimension_numbers = #tpu.dot_dimension_numbers<[1], [1], [0], [0], [0, 0, 1, 0], [], []>} : vector<24x22xf32>, vector<24x22xf32>, vector<24x24xf32> -> vector<24x24xf32>
    %189 = arith.addf %188, %67 : vector<24x24xf32>
    %cst_128 = arith.constant dense<0xFF800000> : vector<24xf32>
    %190 = vector.multi_reduction <maximumf>, %189, %cst_128 [1] : vector<24x24xf32> to vector<24xf32>
    %191 = vector.shape_cast %190 : vector<24xf32> to vector<24x1xf32>
    %192 = vector.broadcast %191 : vector<24x1xf32> to vector<24x24xf32>
    %193 = arith.subf %189, %192 : vector<24x24xf32>
    %194 = math.exp %193 : vector<24x24xf32>
    %cst_129 = arith.constant dense<0.000000e+00> : vector<24xf32>
    %195 = vector.multi_reduction <add>, %194, %cst_129 [1] : vector<24x24xf32> to vector<24xf32>
    %196 = vector.shape_cast %195 : vector<24xf32> to vector<24x1xf32>
    %197 = vector.broadcast %196 : vector<24x1xf32> to vector<24x24xf32>
    %198 = arith.divf %194, %197 : vector<24x24xf32>
    %cst_130 = arith.constant dense<0.000000e+00> : vector<24x22xf32>
    %199 = tpu.matmul %198, %187, %cst_130 {dimension_numbers = #tpu.dot_dimension_numbers<[1], [0], [0], [1], [0, 0, 1, 1], [], []>} : vector<24x24xf32>, vector<24x22xf32>, vector<24x22xf32> -> vector<24x22xf32>
    %c4_131 = arith.constant 4 : index
    %c0_132 = arith.constant 0 : index
    %c0_133 = arith.constant 0 : index
    %200 = vector.load %arg14[%c4_131, %c0_132, %c0_133] : memref<6x22x132xf32, #tpu.memory_space<vmem>>, vector<1x22x132xf32>
    %201 = vector.shape_cast %200 : vector<1x22x132xf32> to vector<22x132xf32>
    %cst_134 = arith.constant dense<0.000000e+00> : vector<24x132xf32>
    %202 = tpu.matmul %199, %201, %cst_134 {dimension_numbers = #tpu.dot_dimension_numbers<[1], [0], [0], [1], [0, 0, 1, 1], [], []>} : vector<24x22xf32>, vector<22x132xf32>, vector<24x132xf32> -> vector<24x132xf32>
    %203 = arith.addf %176, %202 : vector<24x132xf32>
    %c5 = arith.constant 5 : index
    %c0_135 = arith.constant 0 : index
    %c0_136 = arith.constant 0 : index
    %204 = vector.load %arg11[%c5, %c0_135, %c0_136] : memref<6x132x22xf32, #tpu.memory_space<vmem>>, vector<1x132x22xf32>
    %205 = vector.shape_cast %204 : vector<1x132x22xf32> to vector<132x22xf32>
    %cst_137 = arith.constant dense<0.000000e+00> : vector<24x22xf32>
    %206 = tpu.matmul %66, %205, %cst_137 {dimension_numbers = #tpu.dot_dimension_numbers<[1], [0], [0], [1], [0, 0, 1, 1], [], []>} : vector<24x132xf32>, vector<132x22xf32>, vector<24x22xf32> -> vector<24x22xf32>
    %cst_138 = arith.constant 0.213200718 : f32
    %207 = vector.broadcast %cst_138 : f32 to vector<24x22xf32>
    %208 = arith.mulf %206, %207 : vector<24x22xf32>
    %c5_139 = arith.constant 5 : index
    %c0_140 = arith.constant 0 : index
    %c0_141 = arith.constant 0 : index
    %209 = vector.load %arg12[%c5_139, %c0_140, %c0_141] : memref<6x132x22xf32, #tpu.memory_space<vmem>>, vector<1x132x22xf32>
    %210 = vector.shape_cast %209 : vector<1x132x22xf32> to vector<132x22xf32>
    %cst_142 = arith.constant dense<0.000000e+00> : vector<24x22xf32>
    %211 = tpu.matmul %66, %210, %cst_142 {dimension_numbers = #tpu.dot_dimension_numbers<[1], [0], [0], [1], [0, 0, 1, 1], [], []>} : vector<24x132xf32>, vector<132x22xf32>, vector<24x22xf32> -> vector<24x22xf32>
    %c5_143 = arith.constant 5 : index
    %c0_144 = arith.constant 0 : index
    %c0_145 = arith.constant 0 : index
    %212 = vector.load %arg13[%c5_143, %c0_144, %c0_145] : memref<6x132x22xf32, #tpu.memory_space<vmem>>, vector<1x132x22xf32>
    %213 = vector.shape_cast %212 : vector<1x132x22xf32> to vector<132x22xf32>
    %cst_146 = arith.constant dense<0.000000e+00> : vector<24x22xf32>
    %214 = tpu.matmul %66, %213, %cst_146 {dimension_numbers = #tpu.dot_dimension_numbers<[1], [0], [0], [1], [0, 0, 1, 1], [], []>} : vector<24x132xf32>, vector<132x22xf32>, vector<24x22xf32> -> vector<24x22xf32>
    %cst_147 = arith.constant dense<0.000000e+00> : vector<24x24xf32>
    %215 = tpu.matmul %208, %211, %cst_147 {dimension_numbers = #tpu.dot_dimension_numbers<[1], [1], [0], [0], [0, 0, 1, 0], [], []>} : vector<24x22xf32>, vector<24x22xf32>, vector<24x24xf32> -> vector<24x24xf32>
    %216 = arith.addf %215, %67 : vector<24x24xf32>
    %cst_148 = arith.constant dense<0xFF800000> : vector<24xf32>
    %217 = vector.multi_reduction <maximumf>, %216, %cst_148 [1] : vector<24x24xf32> to vector<24xf32>
    %218 = vector.shape_cast %217 : vector<24xf32> to vector<24x1xf32>
    %219 = vector.broadcast %218 : vector<24x1xf32> to vector<24x24xf32>
    %220 = arith.subf %216, %219 : vector<24x24xf32>
    %221 = math.exp %220 : vector<24x24xf32>
    %cst_149 = arith.constant dense<0.000000e+00> : vector<24xf32>
    %222 = vector.multi_reduction <add>, %221, %cst_149 [1] : vector<24x24xf32> to vector<24xf32>
    %223 = vector.shape_cast %222 : vector<24xf32> to vector<24x1xf32>
    %224 = vector.broadcast %223 : vector<24x1xf32> to vector<24x24xf32>
    %225 = arith.divf %221, %224 : vector<24x24xf32>
    %cst_150 = arith.constant dense<0.000000e+00> : vector<24x22xf32>
    %226 = tpu.matmul %225, %214, %cst_150 {dimension_numbers = #tpu.dot_dimension_numbers<[1], [0], [0], [1], [0, 0, 1, 1], [], []>} : vector<24x24xf32>, vector<24x22xf32>, vector<24x22xf32> -> vector<24x22xf32>
    %c5_151 = arith.constant 5 : index
    %c0_152 = arith.constant 0 : index
    %c0_153 = arith.constant 0 : index
    %227 = vector.load %arg14[%c5_151, %c0_152, %c0_153] : memref<6x22x132xf32, #tpu.memory_space<vmem>>, vector<1x22x132xf32>
    %228 = vector.shape_cast %227 : vector<1x22x132xf32> to vector<22x132xf32>
    %cst_154 = arith.constant dense<0.000000e+00> : vector<24x132xf32>
    %229 = tpu.matmul %226, %228, %cst_154 {dimension_numbers = #tpu.dot_dimension_numbers<[1], [0], [0], [1], [0, 0, 1, 1], [], []>} : vector<24x22xf32>, vector<22x132xf32>, vector<24x132xf32> -> vector<24x132xf32>
    %230 = arith.addf %203, %229 : vector<24x132xf32>
    %c0_155 = arith.constant 0 : index
    %c0_156 = arith.constant 0 : index
    %231 = vector.load %arg15[%c0_155, %c0_156] : memref<1x132xf32, #tpu.memory_space<vmem>>, vector<1x132xf32>
    %232 = vector.broadcast %231 : vector<1x132xf32> to vector<24x132xf32>
    %233 = arith.addf %230, %232 : vector<24x132xf32>
    %c0_157 = arith.constant 0 : index
    %c0_158 = arith.constant 0 : index
    %234 = vector.load %arg16[%c0_157, %c0_158] : memref<24x132xf32, #tpu.memory_space<vmem>>, vector<24x132xf32>
    tpu.vector_store %arg16[%c0_157, %c0_158], %233 {strides = array<i32>} : memref<24x132xf32, #tpu.memory_space<vmem>>, vector<24x132xf32>,
    return
  }
  func.func @transform_0(%arg0: i32) -> (i32, i32) {
    %c0_i32 = arith.constant 0 : i32
    %c0_i32_0 = arith.constant 0 : i32
    return %arg0, %c0_i32 : i32, i32
  }
  func.func @transform_1(%arg0: i32) -> (i32, i32) {
    %c0_i32 = arith.constant 0 : i32
    %c0_i32_0 = arith.constant 0 : i32
    %c0_i32_1 = arith.constant 0 : i32
    return %c0_i32, %c0_i32_0 : i32, i32
  }
  func.func @transform_2(%arg0: i32) -> (i32, i32) {
    %c0_i32 = arith.constant 0 : i32
    %c0_i32_0 = arith.constant 0 : i32
    %c0_i32_1 = arith.constant 0 : i32
    return %c0_i32, %c0_i32_0 : i32, i32
  }
  func.func @transform_3(%arg0: i32) -> (i32, i32) {
    %c0_i32 = arith.constant 0 : i32
    %c0_i32_0 = arith.constant 0 : i32
    %c0_i32_1 = arith.constant 0 : i32
    return %c0_i32, %c0_i32_0 : i32, i32
  }
  func.func @transform_4(%arg0: i32) -> (i32, i32) {
    %c0_i32 = arith.constant 0 : i32
    %c0_i32_0 = arith.constant 0 : i32
    %c0_i32_1 = arith.constant 0 : i32
    return %c0_i32, %c0_i32_0 : i32, i32
  }
  func.func @transform_5(%arg0: i32) -> (i32, i32) {
    %c0_i32 = arith.constant 0 : i32
    %c0_i32_0 = arith.constant 0 : i32
    %c0_i32_1 = arith.constant 0 : i32
    return %c0_i32, %c0_i32_0 : i32, i32
  }
  func.func @transform_6(%arg0: i32) -> (i32, i32) {
    %c0_i32 = arith.constant 0 : i32
    %c0_i32_0 = arith.constant 0 : i32
    %c0_i32_1 = arith.constant 0 : i32
    return %c0_i32, %c0_i32_0 : i32, i32
  }
  func.func @transform_7(%arg0: i32) -> (i32, i32) {
    %c0_i32 = arith.constant 0 : i32
    %c0_i32_0 = arith.constant 0 : i32
    %c0_i32_1 = arith.constant 0 : i32
    return %c0_i32, %c0_i32_0 : i32, i32
  }
  func.func @transform_8(%arg0: i32) -> (i32, i32) {
    %c0_i32 = arith.constant 0 : i32
    %c0_i32_0 = arith.constant 0 : i32
    %c0_i32_1 = arith.constant 0 : i32
    return %c0_i32, %c0_i32_0 : i32, i32
  }
  func.func @transform_9(%arg0: i32) -> (i32, i32) {
    %c0_i32 = arith.constant 0 : i32
    %c0_i32_0 = arith.constant 0 : i32
    %c0_i32_1 = arith.constant 0 : i32
    return %c0_i32, %c0_i32_0 : i32, i32
  }
  func.func @transform_10(%arg0: i32) -> (i32, i32, i32) {
    %c0_i32 = arith.constant 0 : i32
    %c0_i32_0 = arith.constant 0 : i32
    %c0_i32_1 = arith.constant 0 : i32
    %c0_i32_2 = arith.constant 0 : i32
    return %c0_i32, %c0_i32_0, %c0_i32_1 : i32, i32, i32
  }
  func.func @transform_11(%arg0: i32) -> (i32, i32, i32) {
    %c0_i32 = arith.constant 0 : i32
    %c0_i32_0 = arith.constant 0 : i32
    %c0_i32_1 = arith.constant 0 : i32
    %c0_i32_2 = arith.constant 0 : i32
    return %c0_i32, %c0_i32_0, %c0_i32_1 : i32, i32, i32
  }
  func.func @transform_12(%arg0: i32) -> (i32, i32, i32) {
    %c0_i32 = arith.constant 0 : i32
    %c0_i32_0 = arith.constant 0 : i32
    %c0_i32_1 = arith.constant 0 : i32
    %c0_i32_2 = arith.constant 0 : i32
    return %c0_i32, %c0_i32_0, %c0_i32_1 : i32, i32, i32
  }
  func.func @transform_13(%arg0: i32) -> (i32, i32, i32) {
    %c0_i32 = arith.constant 0 : i32
    %c0_i32_0 = arith.constant 0 : i32
    %c0_i32_1 = arith.constant 0 : i32
    %c0_i32_2 = arith.constant 0 : i32
    return %c0_i32, %c0_i32_0, %c0_i32_1 : i32, i32, i32
  }
  func.func @transform_14(%arg0: i32) -> (i32, i32) {
    %c0_i32 = arith.constant 0 : i32
    %c0_i32_0 = arith.constant 0 : i32
    %c0_i32_1 = arith.constant 0 : i32
    return %c0_i32, %c0_i32_0 : i32, i32
  }
  func.func @transform_15(%arg0: i32) -> (i32, i32) {
    %c0_i32 = arith.constant 0 : i32
    %c0_i32_0 = arith.constant 0 : i32
    return %arg0, %c0_i32 : i32, i32
  }
}

</mosaic_0001>

<bundles_post_ra>
// kernel: tpu_custom_call.1
= control target key start
LH: loop header
LB: loop body
LE: loop exit
PB: predicated region body
PF: predicated region fallthrough
CT: control target
= control target key end

     0   :  { %vm59_vm0 = vcmask 31744   ;;  %s8200_s0 = inlined_call_operand.vmem [shape: f32[24,132], index: 0, kind: input, shape index: {}]   ;;  %s8201_s1 = inlined_call_operand.vmem [shape: f32[24,24], index: 1, kind: input, shape index: {}]   ;;  %s8202_s2 = inlined_call_operand.vmem [shape: f32[1,132], index: 2, kind: input, shape index: {}]   ;;  %s8203_s3 = inlined_call_operand.vmem [shape: f32[1,132], index: 3, kind: input, shape index: {}]   ;;  %s8204_s4 = inlined_call_operand.vmem [shape: f32[132,256], index: 4, kind: input, shape index: {}]   ;;  %s8205_s5 = inlined_call_operand.vmem [shape: f32[1,256], index: 5, kind: input, shape index: {}]   ;;  %s8206_s6 = inlined_call_operand.vmem [shape: f32[256,132], index: 6, kind: input, shape index: {}]   ;;  %s8207_s7 = inlined_call_operand.vmem [shape: f32[1,132], index: 7, kind: input, shape index: {}]   ;;  %s8208_s8 = inlined_call_operand.vmem [shape: f32[1,132], index: 8, kind: input, shape index: {}]   ;;  %s8209_s9 = inlined_call_operand.vmem [shape: f32[1,132], index: 9, kind: input, shape index: {}]   ;;  %s8210_s10 = inlined_call_operand.vmem [shape: f32[6,132,22], index: 10, kind: input, shape index: {}]   ;;  %s8211_s11 = inlined_call_operand.vmem [shape: f32[6,132,22], index: 11, kind: input, shape index: {}]   ;;  %s8212_s12 = inlined_call_operand.vmem [shape: f32[6,132,22], index: 12, kind: input, shape index: {}]   ;;  %s8213_s13 = inlined_call_operand.vmem [shape: f32[6,22,132], index: 13, kind: input, shape index: {}]   ;;  %s8214_s14 = inlined_call_operand.vmem [shape: f32[1,132], index: 14, kind: input, shape index: {}]   ;;  %s8215_s15 = inlined_call_operand.hbm [shape: f32[24,132], index: 15, kind: output, shape index: {}]  }
   0x1   :  { %v51_v0 = vld [vmem:[%s8200_s0] sm:$0xff]  ;;  %v52_v1 = vld [vmem:[%s8200_s0 + $0x8] sm:$0xff]  ;;  %v53_v5 = vld [vmem:[%s8200_s0 + $0x10] sm:$0xff] }
   0x2   :  { %v55_v2 = vld [vmem:[%s8200_s0 + $0x20] sm:$0xff]  ;;  %v60_v3 = vsel %vm59_vm0, %v52_v1, 0.0  ;;  %v56_v4 = vld [vmem:[%s8200_s0 + $0x28] sm:$0xff]  ;;  %v54_v6 = vld [vmem:[%s8200_s0 + $0x18] sm:$0xff] }
   0x3   :  { %v61_v7 = vadd.f32 %v60_v3, %v51_v0  ;;  %v68_v8 = vsel %vm59_vm0, %v56_v4, 0.0  ;;  %v64_v9 = vsel %vm59_vm0, %v54_v6, 0.0 }
   0x4   :  { %20 = vsyncpa [#allocation3], 0  ;;  %v69_v10 = vadd.f32 %v68_v8, %v55_v2  ;;  %v65_v11 = vadd.f32 %v64_v9, %v53_v5  ;;  %v150_v12 = vld [vmem:[%s8204_s4 + $0x8] sm:$0xff]  ;;  %v152_v13 = vld [vmem:[%s8204_s4 + $0x18] sm:$0xff]  ;;  %vm204_vm1 = vcmask 1043456   ;;  %vm5887_vm2 = vmmov 0  }
   0x5   :  { %62 = vadd.xlane.f32.xlu0 %v61_v7  ;;  %v149_v14 = vld [vmem:[%s8204_s4] sm:$0xff]  ;;  %v5132_v15 = vpack.c.bf16 %v152_v13, %v150_v12  ;;  %v151_v16 = vld [vmem:[%s8204_s4 + $0x10] sm:$0xff]  ;;  %v154_v17 = vld [vmem:[%s8204_s4 + $0x28] sm:$0xff]  ;;  %vm888_vm3 = vcmask 179200   ;;  %vm987_vm5 = vcmask 195584   ;;  %vm1658_vm6 = vcmask 1045504  }
   0x6   :  { %70 = vadd.xlane.f32.xlu1 %v69_v10  ;;  %v156_v18 = vld [vmem:[%s8204_s4 + $0x38] sm:$0xff]  ;;  %v5134_v19 = vpack.c.bf16 %v151_v16, %v149_v14  ;;  %v153_v21 = vld [vmem:[%s8204_s4 + $0x20] sm:$0xff]  ;;  %v155_v22 = vld [vmem:[%s8204_s4 + $0x30] sm:$0xff]  ;;  %s5888_s16 = smov [#allocation2]  }
   0x7   :  { %v5136_v20 = vpack.c.bf16 %v156_v18, %v154_v17  ;;  %v158_v23 = vld [vmem:[%s8204_s4 + $0x48] sm:$0xff]  ;;  %5133 = vmatprep.subr.bf16.mxu0 %v5132_v15  ;;  %v160_v24 = vld [vmem:[%s8204_s4 + $0x58] sm:$0xff]  ;;  %v5138_v25 = vpack.c.bf16 %v155_v22, %v153_v21  ;;  %v157_v27 = vld [vmem:[%s8204_s4 + $0x40] sm:$0xff]  ;;  %s4423_s17 = sshll.u32 %s5888_s16, 4  ;;  %s4424_s17 = int_to_ptr.vmem [resolvable:$true] %s4423_s17 }
   0x8   :  { %5135 = vmatpush1.bf16.msra.mxu0 %v5134_v19  ;;  %v5140_v26 = vpack.c.bf16 %v160_v24, %v158_v23  ;;  %v159_v28 = vld [vmem:[%s8204_s4 + $0x50] sm:$0xff]  ;;  %v162_v54 = vld [vmem:[%s8204_s4 + $0x68] sm:$0xff]  ;;  %v164_v55 = vld [vmem:[%s8204_s4 + $0x78] sm:$0xff]  ;;  %p5866_p1 = scmp.lt.s32.totalorder %s4424_s17, %s4424_s17 }
   0x9   :  { %66 = vadd.xlane.f32.xlu0 %v65_v11  ;;  %5137 = vmatprep.subr.bf16.mxu0 %v5136_v20  ;;  %v5142_v29 = vpack.c.bf16 %v159_v28, %v157_v27  ;;  %v5144_v56 = vpack.c.bf16 %v164_v55, %v162_v54  ;;  %v161_v57 = vld [vmem:[%s8204_s4 + $0x60] sm:$0xff]  ;;  %v163_v58 = vld [vmem:[%s8204_s4 + $0x70] sm:$0xff]  ;;  %v166_v60 = vld [vmem:[%s8204_s4 + $0x88] sm:$0xff] }
   0xa   :  { %v5146_v59 = vpack.c.bf16 %v163_v58, %v161_v57  ;;  %v168_v61 = vld [vmem:[%s8204_s4 + $0x98] sm:$0xff]  ;;  %v165_v63 = vld [vmem:[%s8204_s4 + $0x80] sm:$0xff]  ;;  %v174_v8 = vld [vmem:[%s8204_s4 + $0xc8] sm:$0xff] }
   0xb   :  { %v5148_v62 = vpack.c.bf16 %v168_v61, %v166_v60  ;;  %v172_v3 = vld [vmem:[%s8204_s4 + $0xb8] sm:$0xff]  ;;  %v173_v10 = vld [vmem:[%s8204_s4 + $0xc0] sm:$0xff]  ;;  %v175_v12 = vld [vmem:[%s8204_s4 + $0xd0] sm:$0xff] }
   0xc   :  { %5139 = vmatpush1.bf16.msra.mxu0 %v5138_v25  ;;  %v176_v9 = vld [vmem:[%s8204_s4 + $0xd8] sm:$0xff]  ;;  %v178_v13 = vld [vmem:[%s8204_s4 + $0xe8] sm:$0xff]  ;;  %v5158_v15 = vpack.c.bf16 %v175_v12, %v173_v10  ;;  %v177_v17 = vld [vmem:[%s8204_s4 + $0xe0] sm:$0xff] }
   0xd   :  { %5141 = vmatprep.subr.bf16.mxu0 %v5140_v26  ;;  %v5156_v11 = vpack.c.bf16 %v176_v9, %v174_v8  ;;  %v180_v14 = vld [vmem:[%s8204_s4 + $0xf8] sm:$0xff]  ;;  %v179_v18 = vld [vmem:[%s8204_s4 + $0xf0] sm:$0xff]  ;;  %v182_v20 = vld [vmem:[%s8204_s4 + $0x108] sm:$0xf] }
   0xe   :  { %v5160_v16 = vpack.c.bf16 %v180_v14, %v178_v13  ;;  %v5162_v19 = vpack.c.bf16 %v179_v18, %v177_v17  ;;  %v181_v21 = vld [vmem:[%s8204_s4 + $0x100] sm:$0xf]  ;;  %v325_v22 = vld [vmem:[%s8206_s6 + $0x8] sm:$0xff]  ;;  %v327_v23 = vld [vmem:[%s8206_s6 + $0x18] sm:$0xff] }
   0xf   :  { %v324_v24 = vld [vmem:[%s8206_s6] sm:$0xff]  ;;  %v5164_v25 = vpack.c.bf16 %v327_v23, %v325_v22  ;;  %v326_v26 = vld [vmem:[%s8206_s6 + $0x10] sm:$0xff]  ;;  %v329_v27 = vld [vmem:[%s8206_s6 + $0x28] sm:$0xff] }
  0x10   :  { %5143 = vmatpush1.bf16.msra.mxu0 %v5142_v29  ;;  %v331_v28 = vld [vmem:[%s8206_s6 + $0x38] sm:$0xff]  ;;  %v5166_v29 = vpack.c.bf16 %v326_v26, %v324_v24  ;;  %v340_v55 = vld [vmem:[%s8206_s6 + $0x80] sm:$0xff]  ;;  %v345_v57 = vld [vmem:[%s8206_s6 + $0xa8] sm:$0xff] }
  0x11   :  { %5145 = vmatprep.subr.bf16.mxu0 %v5144_v56  ;;  %5165 = vmatprep.subr.bf16.mxu1 %v5164_v25  ;;  %v342_v56 = vld [vmem:[%s8206_s6 + $0x90] sm:$0xff]  ;;  %v347_v58 = vld [vmem:[%s8206_s6 + $0xb8] sm:$0xff]  ;;  %v344_v61 = vld [vmem:[%s8206_s6 + $0xa0] sm:$0xff] }
  0x12   :  { %5167 = vmatpush1.bf16.msra.mxu1 %v5166_v29  ;;  %v5184_v60 = vpack.c.bf16 %v347_v58, %v345_v57  ;;  %v352_v9 = vld [vmem:[%s8206_s6 + $0xe0] sm:$0xff]  ;;  %v354_v10 = vld [vmem:[%s8206_s6 + $0xf0] sm:$0xff]  ;;  %v359_v12 = vld [vmem:[%s8206_s6 + $0x118] sm:$0xff] }
  0x13   :  { %v5194_v13 = vpack.c.bf16 %v354_v10, %v352_v9  ;;  %v361_v17 = vld [vmem:[%s8206_s6 + $0x128] sm:$0xff]  ;;  %v363_v18 = vld [vmem:[%s8206_s6 + $0x138] sm:$0xff]  ;;  %v362_v22 = vld [vmem:[%s8206_s6 + $0x130] sm:$0xff] }
  0x14   :  { %5147 = vmatpush1.bf16.msra.mxu0 %v5146_v59  ;;  %v5182_v59 = vpack.c.bf16 %v342_v56, %v340_v55  ;;  %v365_v23 = vld [vmem:[%s8206_s6 + $0x148] sm:$0xff]  ;;  %v367_v24 = vld [vmem:[%s8206_s6 + $0x158] sm:$0xff]  ;;  %v368_v9 = vld [vmem:[%s8206_s6 + $0x160] sm:$0xff] }
  0x15   :  { %5149 = vmatprep.subr.bf16.mxu0 %v5148_v62  ;;  %v346_v62 = vld [vmem:[%s8206_s6 + $0xb0] sm:$0xff]  ;;  %v5204_v26 = vpack.c.bf16 %v367_v24, %v365_v23  ;;  %v381_v24 = vld [vmem:[%s8206_s6 + $0x1c8] sm:$0xff]  ;;  %vm6624_vm4 = vmpackc.low %vm888_vm3, %vm888_vm3 }
  0x16   :  { %v370_v10 = vld [vmem:[%s8206_s6 + $0x170] sm:$0xff] }
  0x92   :  { %v63_v30 = vpop.xlane.xlu0 %62 }
  0x93   :  { %v73_v31 = vmul.f32 0.007575758, %v63_v30  ;;  %v71_v32 = vpop.xlane.xlu1 %70  ;;  %v5168_v30 = vpack.c.bf16 %v331_v28, %v329_v27  ;;  %v364_v27 = vld [vmem:[%s8206_s6 + $0x140] sm:$0xff]  ;;  %v366_v28 = vld [vmem:[%s8206_s6 + $0x150] sm:$0xff] }
  0x94   :  { %v75_v33 = vmul.f32 0.007575758, %v71_v32  ;;  %v330_v32 = vld [vmem:[%s8206_s6 + $0x30] sm:$0xff]  ;;  %v5206_v29 = vpack.c.bf16 %v366_v28, %v364_v27  ;;  %v380_v27 = vld [vmem:[%s8206_s6 + $0x1c0] sm:$0xff] }
  0x95   :  { %v6028_v34 = vsub.f32 %v51_v0, %v73_v31  ;;  %v6030_v35 = vsub.f32 %v52_v1, %v73_v31  ;;  %v167_v0 = vld [vmem:[%s8204_s4 + $0x90] sm:$0xff]  ;;  %v328_v31 = vld [vmem:[%s8206_s6 + $0x20] sm:$0xff]  ;;  %5169 = vmatprep.subr.bf16.mxu1 %v5168_v30 }
  0x96   :  { %v6032_v36 = vsub.f32 %v55_v2, %v75_v33  ;;  %v6034_v37 = vsub.f32 %v56_v4, %v75_v33  ;;  %v67_v38 = vpop.xlane.xlu0 %66  ;;  %v5150_v1 = vpack.c.bf16 %v167_v0, %v165_v63  ;;  %v170_v2 = vld [vmem:[%s8204_s4 + $0xa8] sm:$0xff]  ;;  %v351_v0 = vld [vmem:[%s8206_s6 + $0xd8] sm:$0xff]  ;;  %v382_v28 = vld [vmem:[%s8206_s6 + $0x1d0] sm:$0xff] }
  0x97   :  { %v74_v39 = vmul.f32 0.007575758, %v67_v38  ;;  %v82_v40 = vmul.f32 %v6028_v34, %v6028_v34  ;;  %v83_v41 = vmul.f32 %v6030_v35, %v6030_v35  ;;  %v5152_v4 = vpack.c.bf16 %v172_v3, %v170_v2  ;;  %v333_v33 = vld [vmem:[%s8206_s6 + $0x48] sm:$0xff]  ;;  %v335_v38 = vld [vmem:[%s8206_s6 + $0x58] sm:$0xff]  ;;  %v348_v3 = vld [vmem:[%s8206_s6 + $0xc0] sm:$0xff] }
  0x98   :  { %v86_v42 = vmul.f32 %v6032_v36, %v6032_v36  ;;  %v87_v43 = vmul.f32 %v6034_v37, %v6034_v37  ;;  %5151 = vmatpush1.bf16.msra.mxu0 %v5150_v1  ;;  %v349_v63 = vld [vmem:[%s8206_s6 + $0xc8] sm:$0xff]  ;;  %v5186_v1 = vpack.c.bf16 %v346_v62, %v344_v61 }
  0x99   :  { %v6044_v44 = vsub.f32 %v53_v5, %v74_v39  ;;  %v6046_v45 = vsub.f32 %v54_v6, %v74_v39  ;;  %v88_v46 = vsel %vm59_vm0, %v83_v41, 0.0  ;;  %v169_v5 = vld [vmem:[%s8204_s4 + $0xa0] sm:$0xff]  ;;  %v171_v6 = vld [vmem:[%s8204_s4 + $0xb0] sm:$0xff]  ;;  %5153 = vmatprep.subr.bf16.mxu0 %v5152_v4  ;;  %v5170_v39 = vpack.c.bf16 %v330_v32, %v328_v31 }
  0x9a   :  { %v89_v47 = vadd.f32 %v88_v46, %v82_v40  ;;  %v96_v48 = vsel %vm59_vm0, %v87_v43, 0.0  ;;  %v5154_v7 = vpack.c.bf16 %v171_v6, %v169_v5  ;;  %v5172_v40 = vpack.c.bf16 %v335_v38, %v333_v33  ;;  %v332_v41 = vld [vmem:[%s8206_s6 + $0x40] sm:$0xff]  ;;  %v337_v43 = vld [vmem:[%s8206_s6 + $0x68] sm:$0xff]  ;;  %v339_v46 = vld [vmem:[%s8206_s6 + $0x78] sm:$0xff] }
  0x9b   :  { %v84_v49 = vmul.f32 %v6044_v44, %v6044_v44  ;;  %v85_v50 = vmul.f32 %v6046_v45, %v6046_v45  ;;  %v97_v51 = vadd.f32 %v96_v48, %v86_v42  ;;  %v334_v42 = vld [vmem:[%s8206_s6 + $0x50] sm:$0xff]  ;;  %5171 = vmatpush1.bf16.msra.mxu1 %v5170_v39  ;;  %v5176_v48 = vpack.c.bf16 %v339_v46, %v337_v43  ;;  %v353_v5 = vld [vmem:[%s8206_s6 + $0xe8] sm:$0xff]  ;;  %v355_v6 = vld [vmem:[%s8206_s6 + $0xf8] sm:$0xff] }
  0x9c   :  { %90 = vadd.xlane.f32.xlu1 %v89_v47  ;;  %5155 = vmatpush1.bf16.msra.mxu0 %v5154_v7  ;;  %v5174_v47 = vpack.c.bf16 %v334_v42, %v332_v41  ;;  %v5188_v2 = vpack.c.bf16 %v351_v0, %v349_v63  ;;  %v350_v4 = vld [vmem:[%s8206_s6 + $0xd0] sm:$0xff]  ;;  %v5192_v8 = vpack.c.bf16 %v355_v6, %v353_v5  ;;  %v116_v32 = vlaneseq }
  0x9d   :  { %v92_v52 = vsel %vm59_vm0, %v85_v50, 0.0  ;;  %5157 = vmatprep.subr.bf16.mxu0 %v5156_v11  ;;  %5173 = vmatprep.subr.bf16.mxu1 %v5172_v40  ;;  %v338_v50 = vld [vmem:[%s8206_s6 + $0x70] sm:$0xff]  ;;  %v5190_v7 = vpack.c.bf16 %v350_v4, %v348_v3  ;;  %v357_v11 = vld [vmem:[%s8206_s6 + $0x108] sm:$0xff] }
  0x9e   :  { %v93_v53 = vadd.f32 %v92_v52, %v84_v49  ;;  %v336_v49 = vld [vmem:[%s8206_s6 + $0x60] sm:$0xff]  ;;  %v343_v52 = vld [vmem:[%s8206_s6 + $0x98] sm:$0xff]  ;;  %v5196_v14 = vpack.c.bf16 %v359_v12, %v357_v11  ;;  %v117_v42 = vshrl.u32 %v116_v32, 7  ;;  %v5210_v11 = vpack.c.bf16 %v370_v10, %v368_v9  ;;  %v373_v12 = vld [vmem:[%s8206_s6 + $0x188] sm:$0xff] }
  0x9f   :  { %5175 = vmatpush1.bf16.msra.mxu1 %v5174_v47 }
  0xa0   :  { %98 = vadd.xlane.f32.xlu1 %v97_v51  ;;  %94 = vadd.xlane.f32.xlu0 %v93_v53  ;;  %v341_v51 = vld [vmem:[%s8206_s6 + $0x88] sm:$0xff]  ;;  %v5178_v53 = vpack.c.bf16 %v338_v50, %v336_v49  ;;  %v6255_v47 = vsub.s32 0, %v117_v42  ;;  %v57_v49 = vld [vmem:[%s8202_s2] sm:$0x3] }
  0xa1   :  { %5159 = vmatpush1.bf16.msra.mxu0 %v5158_v15  ;;  %5177 = vmatprep.subr.bf16.mxu1 %v5176_v48  ;;  %v5180_v54 = vpack.c.bf16 %v343_v52, %v341_v51  ;;  %v356_v15 = vld [vmem:[%s8206_s6 + $0x100] sm:$0xff]  ;;  %v6257_v48 = vsub.s32 1, %v117_v42 }
  0xa2   :  { %5161 = vmatprep.subr.bf16.mxu0 %v5160_v16  ;;  %v358_v16 = vld [vmem:[%s8206_s6 + $0x110] sm:$0xff]  ;;  %v58_v50 = vld [vmem:[%s8203_s3] sm:$0x3]  ;;  %v119_v51 = vrot.slane %v57_v49, %v6255_v47 }
  0xa3   :  { %5179 = vmatpush1.bf16.msra.mxu1 %v5178_v53  ;;  %v123_v52 = vrot.slane %v57_v49, %v6257_v48  ;;  %v136_v55 = vrot.slane %v58_v50, %v6255_v47  ;;  %v140_v56 = vrot.slane %v58_v50, %v6257_v48 }
  0xa4   :  { %5181 = vmatprep.subr.bf16.mxu1 %v5180_v54 }
  0xa5   :  { %5163 = vmatpush1.bf16.msra.mxu0 %v5162_v19  ;;  %v5198_v19 = vpack.c.bf16 %v358_v16, %v356_v15  ;;  %v372_v15 = vld [vmem:[%s8206_s6 + $0x180] sm:$0xff]  ;;  %v374_v16 = vld [vmem:[%s8206_s6 + $0x190] sm:$0xff] }
  0xa6   :  { %4434 = vmatprep.subr.msk.mxu0 %vm204_vm1, %v182_v20  ;;  %v5200_v20 = vpack.c.bf16 %v363_v18, %v361_v17  ;;  %v5214_v17 = vpack.c.bf16 %v374_v16, %v372_v15  ;;  %v377_v18 = vld [vmem:[%s8206_s6 + $0x1a8] sm:$0xff] }
  0xa7   :  { %5183 = vmatpush1.bf16.msra.mxu1 %v5182_v59 }
  0xa8   :  { %5185 = vmatprep.subr.bf16.mxu1 %v5184_v60 }
  0xa9   :  { %4435 = vmatpush1.msk.msra.mxu0 %vm204_vm1, %v181_v21  ;;  %v360_v21 = vld [vmem:[%s8206_s6 + $0x120] sm:$0xff] }
  0xaa   :  { %v5202_v25 = vpack.c.bf16 %v362_v22, %v360_v21  ;;  %v376_v21 = vld [vmem:[%s8206_s6 + $0x1a0] sm:$0xff]  ;;  %v378_v22 = vld [vmem:[%s8206_s6 + $0x1b0] sm:$0xff] }
  0xab   :  { %5187 = vmatpush1.bf16.msra.mxu1 %v5186_v1  ;;  %v5218_v23 = vpack.c.bf16 %v378_v22, %v376_v21 }
  0xac   :  { %5189 = vmatprep.subr.bf16.mxu1 %v5188_v2 }
  0xaf   :  { %5191 = vmatpush1.bf16.msra.mxu1 %v5190_v7 }
  0xb0   :  { %5193 = vmatprep.subr.bf16.mxu1 %v5192_v8 }
  0xb3   :  { %5195 = vmatpush1.bf16.msra.mxu1 %v5194_v13  ;;  %v375_v13 = vld [vmem:[%s8206_s6 + $0x198] sm:$0xff] }
  0xb4   :  { %5197 = vmatprep.subr.bf16.mxu1 %v5196_v14  ;;  %v5212_v14 = vpack.c.bf16 %v375_v13, %v373_v12 }
  0xb7   :  { %5199 = vmatpush1.bf16.msra.mxu1 %v5198_v19  ;;  %v379_v19 = vld [vmem:[%s8206_s6 + $0x1b8] sm:$0xff] }
  0xb8   :  { %5201 = vmatprep.subr.bf16.mxu1 %v5200_v20  ;;  %v5216_v20 = vpack.c.bf16 %v379_v19, %v377_v18  ;;  %v388_v19 = vld [vmem:[%s8207_s7] sm:$0x3] }
  0xb9   :  { %v393_v21 = vrot.slane %v388_v19, %v6255_v47 }
  0xbb   :  { %5203 = vmatpush1.bf16.msra.mxu1 %v5202_v25  ;;  %v383_v25 = vld [vmem:[%s8206_s6 + $0x1d8] sm:$0xff] }
  0xbc   :  { %5205 = vmatprep.subr.bf16.mxu1 %v5204_v26  ;;  %v5220_v26 = vpack.c.bf16 %v383_v25, %v381_v24 }
  0xbf   :  { %5207 = vmatpush1.bf16.msra.mxu1 %v5206_v29  ;;  %v5222_v29 = vpack.c.bf16 %v382_v28, %v380_v27 }
 0x129   :  { %v91_v30 = vpop.xlane.xlu1 %90 }
 0x12a   :  { %v100_v31 = vmul.f32 0.007575758, %v91_v30  ;;  %v385_v30 = vld [vmem:[%s8206_s6 + $0x1e8] sm:$0xff] }
 0x12c   :  { %v103_v33 = vadd.f32 1e-05, %v100_v31  ;;  %v387_v31 = vld [vmem:[%s8206_s6 + $0x1f8] sm:$0xff] }
 0x12d   :  { %v99_v38 = vpop.xlane.xlu1 %98  ;;  %v95_v39 = vpop.xlane.xlu0 %94  ;;  %v5224_v32 = vpack.c.bf16 %v387_v31, %v385_v30 }
 0x12e   :  { %5762 = vrsqrt.f32 %v103_v33  ;;  %v102_v40 = vmul.f32 0.007575758, %v99_v38  ;;  %v101_v41 = vmul.f32 0.007575758, %v95_v39  ;;  %v384_v33 = vld [vmem:[%s8206_s6 + $0x1e0] sm:$0xff]  ;;  %v386_v38 = vld [vmem:[%s8206_s6 + $0x1f0] sm:$0xff] }
 0x12f   :  { %v5226_v39 = vpack.c.bf16 %v386_v38, %v384_v33 }
 0x130   :  { %v105_v43 = vadd.f32 1e-05, %v102_v40  ;;  %v104_v46 = vadd.f32 1e-05, %v101_v41  ;;  %v183_v40 = vld [vmem:[%s8205_s5] sm:$0x3] }
 0x131   :  { %v188_v41 = vrot.slane %v183_v40, %v6255_v47  ;;  %v192_v42 = vrot.slane %v183_v40, %v6257_v48 }
 0x132   :  { %5764 = vrsqrt.f32 %v105_v43 }
 0x133   :  { %5766 = vrsqrt.f32 %v104_v46 }
 0x138   :  { %v5763_v53 = vpop.eup %5762 }
 0x139   :  { %v110_v54 = vmul.f32 %v5763_v53, %v6030_v35  ;;  %v109_v57 = vmul.f32 %v5763_v53, %v6028_v34 }
 0x13b   :  { %v127_v58 = vmul.f32 %v123_v52, %v110_v54  ;;  %v126_v59 = vmul.f32 %v119_v51, %v109_v57 }
 0x13c   :  { %v5765_v60 = vpop.eup %5764 }
 0x13d   :  { %v5767_v61 = vpop.eup %5766  ;;  %v144_v62 = vadd.f32 %v140_v56, %v127_v58  ;;  %v143_v63 = vadd.f32 %v136_v55, %v126_v59  ;;  %v114_v0 = vmul.f32 %v5765_v60, %v6034_v37  ;;  %v113_v35 = vmul.f32 %v5765_v60, %v6032_v36  ;;  %v371_v36 = vld [vmem:[%s8206_s6 + $0x178] sm:$0xff] }
 0x13e   :  { %v112_v1 = vmul.f32 %v5767_v61, %v6046_v45  ;;  %v111_v2 = vmul.f32 %v5767_v61, %v6044_v44  ;;  %v369_v44 = vld [vmem:[%s8206_s6 + $0x168] sm:$0xff] }
 0x13f   :  { %4436 = vmatprep.mubr.msk.f32.mxu0 %vm59_vm0, %v144_v62  ;;  %v131_v34 = vmul.f32 %v123_v52, %v114_v0  ;;  %v130_v7 = vmul.f32 %v119_v51, %v113_v35  ;;  %v5208_v45 = vpack.c.bf16 %v371_v36, %v369_v44 }
 0x140   :  { %276 = vmatmul.mubr.f32.vlgmr.msra.gmra.mrb[0].mxu0 %v143_v63  ;;  %v129_v3 = vmul.f32 %v123_v52, %v112_v1  ;;  %v128_v4 = vmul.f32 %v119_v51, %v111_v2 }
 0x141   :  { %v148_v8 = vadd.f32 %v140_v56, %v131_v34  ;;  %v147_v37 = vadd.f32 %v136_v55, %v130_v7  ;;  %5209 = vmatprep.subr.bf16.mxu1 %v5208_v45 }
 0x142   :  { %v146_v5 = vadd.f32 %v140_v56, %v129_v3  ;;  %v145_v6 = vadd.f32 %v136_v55, %v128_v4  ;;  %5211 = vmatpush1.bf16.msra.mxu1 %v5210_v11 }
 0x143   :  { %5213 = vmatprep.subr.bf16.mxu1 %v5212_v14 }
 0x144   :  { %4437 = vmatprep.mubr.msk.f32.mxu0 %vm59_vm0, %v146_v5 }
 0x145   :  { %282 = vmatmul.mubr.f32.gmra.mrb[2].mxu0 %v145_v6 }
 0x146   :  { %4438 = vmatprep.mubr.msk.f32.mxu0 %vm59_vm0, %v148_v8  ;;  %5215 = vmatpush1.bf16.msra.mxu1 %v5214_v17 }
 0x147   :  { %5217 = vmatprep.subr.bf16.mxu1 %v5216_v20  ;;  %v397_v20 = vrot.slane %v388_v19, %v6257_v48 }
 0x149   :  { %288 = vmatmul.mubr.f32.gmra.mrb[4].mxu0 %v147_v37 }
 0x14a   :  { %5219 = vmatpush1.bf16.msra.mxu1 %v5218_v23 }
 0x14b   :  { %5221 = vmatprep.subr.bf16.mxu1 %v5220_v26 }
 0x14e   :  { %5223 = vmatpush1.bf16.msra.mxu1 %v5222_v29 }
 0x14f   :  { %5225 = vmatprep.subr.bf16.mxu1 %v5224_v32 }
 0x152   :  { %5227 = vmatpush1.bf16.msra.mxu1 %v5226_v39 }
 0x213   :  { %v277_v43 = vpop.f32.mrb[0].mxu0 }
 0x214   :  { %v278_v46 = vadd.f32 %v277_v43, %v188_v41  ;;  %v279_v49 = vpop.f32.mrb[1].mxu0 }
 0x215   :  { %v280_v50 = vadd.f32 %v279_v49, %v192_v42  ;;  %v577_v49 = vld [vmem:[%s8210_s10 + $0x8] sm:$0xff] }
 0x216   :  { %v300_v51 = vmul.f32 0.70710677, %v278_v46  ;;  %v294_v34 = vmul.f32 0.5, %v278_v46  ;;  %v576_v46 = vld [vmem:[%s8210_s10] sm:$0xff] }
 0x217   :  { %v301_v52 = vmul.f32 0.70710677, %v280_v50  ;;  %v295_v3 = vmul.f32 0.5, %v280_v50  ;;  %v688_v50 = vld [vmem:[%s8211_s11] sm:$0xff] }
 0x218   :  { %5768 = verf.f32 %v300_v51  ;;  %v283_v53 = vpop.f32.mrb[2].mxu0  ;;  %v5885_v51 = vmov 0.0|0.0  }
 0x219   :  { %5770 = verf.f32 %v301_v52  ;;  %v284_v54 = vadd.f32 %v283_v53, %v188_v41  ;;  %v285_v55 = vpop.f32.mrb[3].mxu0  ;;  %5228 = vmatprep.subr.bf16.mxu0 %v5885_v51  ;;  %v5229_v52 = vpack.c.bf16 %v577_v49, %v576_v46  ;;  %5252 = vmatprep.subr.bf16.mxu1 %v5885_v51  ;;  %v689_v53 = vld [vmem:[%s8211_s11 + $0x8] sm:$0xff] }
 0x21a   :  { %v286_v56 = vadd.f32 %v285_v55, %v192_v42  ;;  %v579_v55 = vld [vmem:[%s8210_s10 + $0x18] sm:$0xff]  ;;  %v589_v46 = vld [vmem:[%s8210_s10 + $0x68] sm:$0xff] }
 0x21b   :  { %v302_v57 = vmul.f32 0.70710677, %v284_v54  ;;  %v296_v45 = vmul.f32 0.5, %v284_v54  ;;  %v578_v54 = vld [vmem:[%s8210_s10 + $0x10] sm:$0xff]  ;;  %5230 = vmatpush1.bf16.msra.mxu0 %v5229_v52  ;;  %v701_v52 = vld [vmem:[%s8211_s11 + $0x68] sm:$0xff] }
 0x21c   :  { %v303_v58 = vmul.f32 0.70710677, %v286_v56  ;;  %v289_v59 = vpop.f32.mrb[4].mxu0  ;;  %v297_v44 = vmul.f32 0.5, %v286_v56  ;;  %v5253_v56 = vpack.c.bf16 %v689_v53, %v688_v50  ;;  %5231 = vmatprep.subr.bf16.mxu0 %v5885_v51  ;;  %v700_v50 = vld [vmem:[%s8211_s11 + $0x60] sm:$0xff] }
 0x21d   :  { %5772 = verf.f32 %v302_v57  ;;  %v290_v60 = vadd.f32 %v289_v59, %v188_v41  ;;  %v291_v61 = vpop.f32.mrb[5].mxu0  ;;  %v690_v57 = vld [vmem:[%s8211_s11 + $0x10] sm:$0xff]  ;;  %v5232_v59 = vpack.c.bf16 %v579_v55, %v578_v54  ;;  %v5271_v53 = vpack.c.bf16 %v701_v52, %v700_v50  ;;  %v591_v55 = vld [vmem:[%s8210_s10 + $0x78] sm:$0xff]  ;;  %v797_v50 = vld [vmem:[%s8212_s12 + $0x48] sm:$0xff] }
 0x21e   :  { %5774 = verf.f32 %v303_v58  ;;  %v292_v62 = vadd.f32 %v291_v61, %v192_v42  ;;  %v691_v58 = vld [vmem:[%s8211_s11 + $0x18] sm:$0xff]  ;;  %v580_v61 = vld [vmem:[%s8210_s10 + $0x20] sm:$0xff]  ;;  %v590_v54 = vld [vmem:[%s8210_s10 + $0x70] sm:$0xff] }
 0x21f   :  { %v304_v63 = vmul.f32 0.70710677, %v290_v60  ;;  %v298_v16 = vmul.f32 0.5, %v290_v60  ;;  %v5256_v60 = vpack.c.bf16 %v691_v58, %v690_v57  ;;  %5233 = vmatpush1.bf16.msra.mxu0 %v5232_v59  ;;  %v702_v57 = vld [vmem:[%s8211_s11 + $0x70] sm:$0xff]  ;;  %v703_v58 = vld [vmem:[%s8211_s11 + $0x78] sm:$0xff] }
 0x220   :  { %v305_v0 = vmul.f32 0.70710677, %v292_v62  ;;  %v299_v14 = vmul.f32 0.5, %v292_v62  ;;  %v581_v62 = vld [vmem:[%s8210_s10 + $0x28] sm:$0xff]  ;;  %5234 = vmatprep.subr.bf16.mxu0 %v5885_v51  ;;  %v5274_v59 = vpack.c.bf16 %v703_v58, %v702_v57 }
 0x221   :  { %5776 = verf.f32 %v304_v63  ;;  %v692_v63 = vld [vmem:[%s8211_s11 + $0x20] sm:$0xff]  ;;  %v801_v57 = vld [vmem:[%s8212_s12 + $0x68] sm:$0xff] }
 0x222   :  { %v5769_v1 = vpop.eup %5768  ;;  %5778 = verf.f32 %v305_v0  ;;  %v693_v0 = vld [vmem:[%s8211_s11 + $0x28] sm:$0xff] }
 0x223   :  { %v5771_v2 = vpop.eup %5770  ;;  %v312_v35 = vadd.f32 1.0, %v5769_v1  ;;  %v5235_v1 = vpack.c.bf16 %v581_v62, %v580_v61  ;;  %v592_v61 = vld [vmem:[%s8210_s10 + $0x80] sm:$0xf] }
 0x224   :  { %v313_v4 = vadd.f32 1.0, %v5771_v2  ;;  %v5259_v2 = vpack.c.bf16 %v693_v0, %v692_v63  ;;  %v704_v62 = vld [vmem:[%s8211_s11 + $0x80] sm:$0xf] }
 0x225   :  { %v318_v7 = vmul.f32 %v312_v35, %v294_v34  ;;  %5236 = vmatpush1.bf16.msra.mxu0 %v5235_v1 }
 0x226   :  { %v319_v5 = vmul.f32 %v313_v4, %v295_v3  ;;  %5237 = vmatprep.subr.bf16.mxu0 %v5885_v51 }
 0x227   :  { %v5773_v6 = vpop.eup %5772 }
 0x228   :  { %v5775_v8 = vpop.eup %5774  ;;  %v314_v37 = vadd.f32 1.0, %v5773_v6  ;;  %464 = vmatprep.mubr.f32.mxu1 %v319_v5 }
 0x229   :  { %v315_v36 = vadd.f32 1.0, %v5775_v8  ;;  %465 = vmatmul.mubr.f32.vlgmr.msra.gmra.mrb[0].mxu1 %v318_v7 }
 0x22a   :  { %v320_v13 = vmul.f32 %v314_v37, %v296_v45  ;;  %5254 = vmatpush1.bf16.msra.mxu1 %v5253_v56  ;;  %v5250_v56 = vpack.c.bf16 %v591_v55, %v590_v54  ;;  %v799_v54 = vld [vmem:[%s8212_s12 + $0x58] sm:$0xff] }
 0x22b   :  { %v5777_v9 = vpop.eup %5776  ;;  %v321_v10 = vmul.f32 %v315_v36, %v297_v44  ;;  %5255 = vmatprep.subr.bf16.mxu1 %v5885_v51 }
 0x22c   :  { %v5779_v11 = vpop.eup %5778  ;;  %v316_v12 = vadd.f32 1.0, %v5777_v9 }
 0x22d   :  { %v317_v15 = vadd.f32 1.0, %v5779_v11  ;;  %470 = vmatprep.mubr.f32.mxu1 %v321_v10 }
 0x22e   :  { %471 = vmatmul.mubr.f32.gmra.mrb[2].mxu1 %v320_v13  ;;  %v322_v18 = vmul.f32 %v316_v12, %v298_v16 }
 0x22f   :  { %v323_v17 = vmul.f32 %v317_v15, %v299_v14  ;;  %5257 = vmatpush1.bf16.msra.mxu1 %v5256_v60  ;;  %v5886_v60 = vmov 0.0  }
 0x230   :  { %5258 = vmatprep.subr.bf16.mxu1 %v5885_v51 }
 0x231   :  { %476 = vmatprep.mubr.f32.mxu1 %v323_v17 }
 0x232   :  { %477 = vmatmul.mubr.f32.gmra.mrb[4].mxu1 %v322_v18 }
 0x233   :  { %5260 = vmatpush1.bf16.msra.mxu1 %v5259_v2 }
 0x234   :  { %5261 = vmatprep.subr.bf16.mxu1 %v5885_v51 }
 0x2fc   :  { %v466_v22 = vpop.f32.mrb[0].mxu1 }
 0x2fd   :  { %v468_v23 = vpop.f32.mrb[1].mxu1  ;;  %v467_v25 = vadd.f32 %v466_v22, %v393_v21  ;;  %v583_v22 = vld [vmem:[%s8210_s10 + $0x38] sm:$0xff] }
 0x2fe   :  { %v469_v24 = vadd.f32 %v468_v23, %v397_v20 }
 0x300   :  { %v485_v26 = vsel %vm59_vm0, %v469_v24, 0.0 }
 0x301   :  { %v472_v27 = vpop.f32.mrb[2].mxu1  ;;  %v486_v28 = vadd.f32 %v485_v26, %v467_v25 }
 0x302   :  { %v474_v29 = vpop.f32.mrb[3].mxu1  ;;  %v473_v31 = vadd.f32 %v472_v27, %v393_v21  ;;  %v584_v27 = vld [vmem:[%s8210_s10 + $0x40] sm:$0xff] }
 0x303   :  { %v475_v30 = vadd.f32 %v474_v29, %v397_v20  ;;  %487 = vadd.xlane.f32.xlu0 %v486_v28  ;;  %v585_v28 = vld [vmem:[%s8210_s10 + $0x48] sm:$0xff] }
 0x304   :  { %v5241_v29 = vpack.c.bf16 %v585_v28, %v584_v27 }
 0x305   :  { %v478_v32 = vpop.f32.mrb[4].mxu1  ;;  %v489_v33 = vsel %vm59_vm0, %v475_v30, 0.0 }
 0x306   :  { %v480_v38 = vpop.f32.mrb[5].mxu1  ;;  %v490_v39 = vadd.f32 %v489_v33, %v473_v31  ;;  %v479_v41 = vadd.f32 %v478_v32, %v393_v21  ;;  %v582_v21 = vld [vmem:[%s8210_s10 + $0x30] sm:$0xff] }
 0x307   :  { %v481_v40 = vadd.f32 %v480_v38, %v397_v20  ;;  %v5238_v23 = vpack.c.bf16 %v583_v22, %v582_v21  ;;  %v586_v33 = vld [vmem:[%s8210_s10 + $0x50] sm:$0xff]  ;;  %v587_v38 = vld [vmem:[%s8210_s10 + $0x58] sm:$0xff] }
 0x308   :  { %491 = vadd.xlane.f32.xlu1 %v490_v39  ;;  %v5244_v39 = vpack.c.bf16 %v587_v38, %v586_v33  ;;  %v792_v33 = vld [vmem:[%s8212_s12 + $0x20] sm:$0xff]  ;;  %v793_v38 = vld [vmem:[%s8212_s12 + $0x28] sm:$0xff] }
 0x309   :  { %v493_v42 = vsel %vm59_vm0, %v481_v40, 0.0  ;;  %5239 = vmatpush1.bf16.msra.mxu0 %v5238_v23 }
 0x30a   :  { %v494_v43 = vadd.f32 %v493_v42, %v479_v41  ;;  %5240 = vmatprep.subr.bf16.mxu0 %v5885_v51 }
 0x30c   :  { %495 = vadd.xlane.f32.xlu0 %v494_v43  ;;  %v588_v43 = vld [vmem:[%s8210_s10 + $0x60] sm:$0xff] }
 0x30d   :  { %5242 = vmatpush1.bf16.msra.mxu0 %v5241_v29  ;;  %v5247_v49 = vpack.c.bf16 %v589_v46, %v588_v43  ;;  %v795_v43 = vld [vmem:[%s8212_s12 + $0x38] sm:$0xff] }
 0x30e   :  { %5243 = vmatprep.subr.bf16.mxu0 %v5885_v51 }
 0x311   :  { %5245 = vmatpush1.bf16.msra.mxu0 %v5244_v39 }
 0x312   :  { %5246 = vmatprep.subr.bf16.mxu0 %v5885_v51 }
 0x315   :  { %5248 = vmatpush1.bf16.msra.mxu0 %v5247_v49  ;;  %v796_v49 = vld [vmem:[%s8212_s12 + $0x40] sm:$0xff] }
 0x316   :  { %5249 = vmatprep.subr.bf16.mxu0 %v5885_v51  ;;  %v5289_v52 = vpack.c.bf16 %v797_v50, %v796_v49 }
 0x319   :  { %5251 = vmatpush1.bf16.msra.mxu0 %v5250_v56  ;;  %v800_v56 = vld [vmem:[%s8212_s12 + $0x60] sm:$0xff] }
 0x31a   :  { %637 = vmatprep.subr.mxu0 %v5886_v60  ;;  %v5295_v58 = vpack.c.bf16 %v801_v57, %v800_v56  ;;  %v4502_v57 = vld [vmem:[%s8212_s12 + $0x88] sm:$0xff] }
 0x31d   :  { %4439 = vmatpush1.msk.msra.mxu0 %vm204_vm1, %v592_v61  ;;  %v803_v61 = vld [vmem:[%s8212_s12 + $0x78] sm:$0xff] }
 0x31e   :  { %5276 = vmatprep.subr.bf16.mxu0 %v5885_v51 }
 0x390   :  { %v488_v35 = vpop.xlane.xlu0 %487 }
 0x391   :  { %v497_v3 = vmul.f32 0.007575758, %v488_v35 }
 0x393   :  { %v6395_v4 = vsub.f32 %v467_v25, %v497_v3  ;;  %v6397_v34 = vsub.f32 %v469_v24, %v497_v3  ;;  %v694_v24 = vld [vmem:[%s8211_s11 + $0x30] sm:$0xff]  ;;  %v695_v25 = vld [vmem:[%s8211_s11 + $0x38] sm:$0xff] }
 0x394   :  { %v5262_v26 = vpack.c.bf16 %v695_v25, %v694_v24  ;;  %v790_v25 = vld [vmem:[%s8212_s12 + $0x10] sm:$0xff] }
 0x395   :  { %v492_v5 = vpop.xlane.xlu1 %491  ;;  %v506_v6 = vmul.f32 %v6395_v4, %v6395_v4  ;;  %v507_v7 = vmul.f32 %v6397_v34, %v6397_v34 }
 0x396   :  { %v498_v8 = vmul.f32 0.007575758, %v492_v5  ;;  %5263 = vmatpush1.bf16.msra.mxu1 %v5262_v26  ;;  %v791_v26 = vld [vmem:[%s8212_s12 + $0x18] sm:$0xff] }
 0x397   :  { %v512_v37 = vsel %vm59_vm0, %v507_v7, 0.0  ;;  %5264 = vmatprep.subr.bf16.mxu1 %v5885_v51  ;;  %v483_v7 = vld [vmem:[%s8208_s8] sm:$0x3] }
 0x398   :  { %v6404_v44 = vsub.f32 %v473_v31, %v498_v8  ;;  %v6406_v36 = vsub.f32 %v475_v30, %v498_v8  ;;  %v513_v45 = vadd.f32 %v512_v37, %v506_v6  ;;  %v696_v30 = vld [vmem:[%s8211_s11 + $0x40] sm:$0xff]  ;;  %v697_v31 = vld [vmem:[%s8211_s11 + $0x48] sm:$0xff] }
 0x399   :  { %v496_v9 = vpop.xlane.xlu0 %495  ;;  %v5265_v32 = vpack.c.bf16 %v697_v31, %v696_v30  ;;  %v484_v37 = vld [vmem:[%s8209_s9] sm:$0x3] }
 0x39a   :  { %v499_v10 = vmul.f32 0.007575758, %v496_v9  ;;  %514 = vadd.xlane.f32.xlu1 %v513_v45  ;;  %v508_v11 = vmul.f32 %v6404_v44, %v6404_v44  ;;  %v509_v12 = vmul.f32 %v6406_v36, %v6406_v36  ;;  %v543_v45 = vrot.slane %v483_v7, %v6255_v47 }
 0x39b   :  { %5266 = vmatpush1.bf16.msra.mxu1 %v5265_v32  ;;  %v547_v9 = vrot.slane %v483_v7, %v6257_v48 }
 0x39c   :  { %v6412_v13 = vsub.f32 %v479_v41, %v499_v10  ;;  %v6414_v14 = vsub.f32 %v481_v40, %v499_v10  ;;  %v516_v15 = vsel %vm59_vm0, %v509_v12, 0.0  ;;  %5267 = vmatprep.subr.bf16.mxu1 %v5885_v51  ;;  %v698_v40 = vld [vmem:[%s8211_s11 + $0x50] sm:$0xff]  ;;  %v699_v41 = vld [vmem:[%s8211_s11 + $0x58] sm:$0xff]  ;;  %v564_v12 = vrot.slane %v484_v37, %v6257_v48 }
 0x39d   :  { %v517_v16 = vadd.f32 %v516_v15, %v508_v11  ;;  %v5268_v42 = vpack.c.bf16 %v699_v41, %v698_v40  ;;  %v560_v11 = vrot.slane %v484_v37, %v6255_v47  ;;  %v5283_v41 = vpack.c.bf16 %v793_v38, %v792_v33  ;;  %v4471_v33 = vld [vmem:[%s8210_s10 + $0xe0] sm:$0xff] }
 0x39e   :  { %v510_v17 = vmul.f32 %v6412_v13, %v6412_v13  ;;  %v511_v18 = vmul.f32 %v6414_v14, %v6414_v14 }
 0x39f   :  { %518 = vadd.xlane.f32.xlu0 %v517_v16  ;;  %5269 = vmatpush1.bf16.msra.mxu1 %v5268_v42  ;;  %v794_v42 = vld [vmem:[%s8212_s12 + $0x30] sm:$0xff] }
 0x3a0   :  { %v520_v19 = vsel %vm59_vm0, %v511_v18, 0.0  ;;  %5270 = vmatprep.subr.bf16.mxu1 %v5885_v51  ;;  %v789_v18 = vld [vmem:[%s8212_s12 + $0x8] sm:$0xff]  ;;  %v5286_v46 = vpack.c.bf16 %v795_v43, %v794_v42  ;;  %v4473_v42 = vld [vmem:[%s8210_s10 + $0xf0] sm:$0xff] }
 0x3a1   :  { %v521_v20 = vadd.f32 %v520_v19, %v510_v17  ;;  %v788_v17 = vld [vmem:[%s8212_s12] sm:$0xff] }
 0x3a2   :  { %v5277_v24 = vpack.c.bf16 %v789_v18, %v788_v17  ;;  %v4462_v18 = vld [vmem:[%s8210_s10 + $0x98] sm:$0xff] }
 0x3a3   :  { %522 = vadd.xlane.f32.xlu1 %v521_v20  ;;  %5272 = vmatpush1.bf16.msra.mxu1 %v5271_v53  ;;  %v798_v53 = vld [vmem:[%s8212_s12 + $0x50] sm:$0xff] }
 0x3a4   :  { %5273 = vmatprep.subr.bf16.mxu1 %v5885_v51  ;;  %v5292_v55 = vpack.c.bf16 %v799_v54, %v798_v53  ;;  %v4475_v53 = vld [vmem:[%s8210_s10 + $0x100] sm:$0xff] }
 0x3a7   :  { %5275 = vmatpush1.bf16.msra.mxu1 %v5274_v59  ;;  %v802_v59 = vld [vmem:[%s8212_s12 + $0x70] sm:$0xff] }
 0x3a8   :  { %740 = vmatprep.subr.mxu1 %v5886_v60 }
 0x3ab   :  { %4443 = vmatpush1.msk.msra.mxu1 %vm204_vm1, %v704_v62  ;;  %v5298_v62 = vpack.c.bf16 %v803_v61, %v802_v59  ;;  %v4476_v59 = vld [vmem:[%s8210_s10 + $0x108] sm:$0xf] }
 0x3ac   :  { %5300 = vmatprep.subr.bf16.mxu1 %v5885_v51 }
 0x427   :  { %v515_v63 = vpop.xlane.xlu1 %514 }
 0x428   :  { %v524_v0 = vmul.f32 0.007575758, %v515_v63  ;;  %v804_v63 = vld [vmem:[%s8212_s12 + $0x80] sm:$0xf] }
 0x42a   :  { %v527_v1 = vadd.f32 1e-05, %v524_v0 }
 0x42c   :  { %5780 = vrsqrt.f32 %v527_v1  ;;  %v519_v2 = vpop.xlane.xlu0 %518 }
 0x42d   :  { %v525_v35 = vmul.f32 0.007575758, %v519_v2 }
 0x42f   :  { %v528_v3 = vadd.f32 1e-05, %v525_v35 }
 0x430   :  { %v523_v5 = vpop.xlane.xlu1 %522 }
 0x431   :  { %5782 = vrsqrt.f32 %v528_v3  ;;  %v526_v6 = vmul.f32 0.007575758, %v523_v5 }
 0x433   :  { %v529_v8 = vadd.f32 1e-05, %v526_v6 }
 0x435   :  { %5784 = vrsqrt.f32 %v529_v8 }
 0x436   :  { %v5781_v10 = vpop.eup %5780 }
 0x437   :  { %v533_v15 = vmul.f32 %v5781_v10, %v6395_v4  ;;  %v534_v16 = vmul.f32 %v5781_v10, %v6397_v34 }
 0x439   :  { %v550_v19 = vmul.f32 %v543_v45, %v533_v15  ;;  %v551_v20 = vmul.f32 %v547_v9, %v534_v16  ;;  %v4461_v15 = vld [vmem:[%s8210_s10 + $0x90] sm:$0xff] }
 0x43b   :  { %v5783_v21 = vpop.eup %5782  ;;  %v6520_v22 = vadd.f32 %v560_v11, %v550_v19  ;;  %v6522_v23 = vadd.f32 %v564_v12, %v551_v20  ;;  %v4463_v19 = vld [vmem:[%s8210_s10 + $0xa0] sm:$0xff] }
 0x43c   :  { %v535_v4 = vmul.f32 %v5783_v21, %v6404_v44  ;;  %v536_v34 = vmul.f32 %v5783_v21, %v6406_v36  ;;  %v5280_v36 = vpack.c.bf16 %v791_v26, %v790_v25  ;;  %v5311_v20 = vpack.c.bf16 %v4463_v19, %v4462_v18  ;;  %v4466_v26 = vld [vmem:[%s8210_s10 + $0xb8] sm:$0xff]  ;;  %v4517_v18 = vld [vmem:[%s8212_s12 + $0x100] sm:$0xff] }
 0x43d   :  { %4440 = vmatprep.mubr.msk.f32.mxu0 %vm59_vm0, %v6522_v23  ;;  %4444 = vmatprep.mubr.msk.f32.mxu1 %vm59_vm0, %v6522_v23 }
 0x43e   :  { %v552_v27 = vmul.f32 %v543_v45, %v535_v4  ;;  %v553_v28 = vmul.f32 %v547_v9, %v536_v34  ;;  %670 = vmatmul.mubr.f32.vlgmr.msra.gmra.mrb[6].mxu0 %v6520_v22  ;;  %773 = vmatmul.mubr.f32.vlgmr.msra.gmra.mrb[6].mxu1 %v6520_v22  ;;  %v4465_v4 = vld [vmem:[%s8210_s10 + $0xb0] sm:$0xff] }
 0x43f   :  { %v5785_v44 = vpop.eup %5784  ;;  %5278 = vmatpush1.bf16.msra.mxu0 %v5277_v24  ;;  %v4464_v24 = vld [vmem:[%s8210_s10 + $0xa8] sm:$0xff] }
 0x440   :  { %v6538_v29 = vadd.f32 %v560_v11, %v552_v27  ;;  %v6540_v30 = vadd.f32 %v564_v12, %v553_v28  ;;  %v537_v31 = vmul.f32 %v5785_v44, %v6412_v13  ;;  %v538_v32 = vmul.f32 %v5785_v44, %v6414_v14  ;;  %5279 = vmatprep.subr.bf16.mxu0 %v5885_v51  ;;  %v4467_v27 = vld [vmem:[%s8210_s10 + $0xc0] sm:$0xff]  ;;  %v4468_v44 = vld [vmem:[%s8210_s10 + $0xc8] sm:$0xff] }
 0x441   :  { %v5314_v34 = vpack.c.bf16 %v4465_v4, %v4464_v24  ;;  %v5317_v28 = vpack.c.bf16 %v4467_v27, %v4466_v26  ;;  %v4518_v24 = vld [vmem:[%s8212_s12 + $0x108] sm:$0xf]  ;;  %v4552_v27 = vld [vmem:[%s8210_s10 + $0x130] sm:$0xff] }
 0x442   :  { %v554_v39 = vmul.f32 %v543_v45, %v537_v31  ;;  %v555_v40 = vmul.f32 %v547_v9, %v538_v32  ;;  %4441 = vmatprep.mubr.msk.f32.mxu0 %vm59_vm0, %v6540_v30  ;;  %4445 = vmatprep.mubr.msk.f32.mxu1 %vm59_vm0, %v6540_v30  ;;  %v4470_v32 = vld [vmem:[%s8210_s10 + $0xd8] sm:$0xff] }
 0x443   :  { %675 = vmatmul.mubr.f32.gmra.mrb[8].mxu0 %v6538_v29  ;;  %778 = vmatmul.mubr.f32.gmra.mrb[8].mxu1 %v6538_v29 }
 0x444   :  { %v6557_v13 = vadd.f32 %v560_v11, %v554_v39  ;;  %v6559_v14 = vadd.f32 %v564_v12, %v555_v40  ;;  %5281 = vmatpush1.bf16.msra.mxu0 %v5280_v36  ;;  %v4460_v12 = vld [vmem:[%s8210_s10 + $0x88] sm:$0xff]  ;;  %v4469_v36 = vld [vmem:[%s8210_s10 + $0xd0] sm:$0xff]  ;;  %v5323_v40 = vpack.c.bf16 %v4471_v33, %v4470_v32 }
 0x445   :  { %5282 = vmatprep.subr.bf16.mxu0 %v5885_v51  ;;  %v5308_v16 = vpack.c.bf16 %v4461_v15, %v4460_v12  ;;  %v5320_v31 = vpack.c.bf16 %v4469_v36, %v4468_v44  ;;  %v4514_v12 = vld [vmem:[%s8212_s12 + $0xe8] sm:$0xff]  ;;  %v4515_v15 = vld [vmem:[%s8212_s12 + $0xf0] sm:$0xff]  ;;  %v4554_v36 = vld [vmem:[%s8210_s10 + $0x140] sm:$0xff] }
 0x446   :  { %4442 = vmatprep.mubr.msk.f32.mxu0 %vm59_vm0, %v6559_v14  ;;  %4446 = vmatprep.mubr.msk.f32.mxu1 %vm59_vm0, %v6559_v14  ;;  %v4556_v33 = vld [vmem:[%s8210_s10 + $0x150] sm:$0xff] }
 0x447   :  { %680 = vmatmul.mubr.f32.gmra.mrb[10].mxu0 %v6557_v13  ;;  %783 = vmatmul.mubr.f32.gmra.mrb[10].mxu1 %v6557_v13 }
 0x448   :  { %5284 = vmatpush1.bf16.msra.mxu0 %v5283_v41  ;;  %4448 = vmatprep.mubr.msk.f32.mxu0 %vm59_vm0, %v6522_v23  ;;  %v4472_v41 = vld [vmem:[%s8210_s10 + $0xe8] sm:$0xff] }
 0x449   :  { %5285 = vmatprep.subr.bf16.mxu0 %v5885_v51  ;;  %4958 = vmatprep.mubr.msk.f32.mxu1 %vm5887_vm2, %v5886_v60  ;;  %v5326_v50 = vpack.c.bf16 %v4473_v42, %v4472_v41  ;;  %v4559_v41 = vld [vmem:[%s8210_s10 + $0x168] sm:$0xff] }
 0x44c   :  { %5287 = vmatpush1.bf16.msra.mxu0 %v5286_v46 }
 0x44d   :  { %5288 = vmatprep.subr.bf16.mxu0 %v5885_v51 }
 0x450   :  { %5290 = vmatpush1.bf16.msra.mxu0 %v5289_v52  ;;  %v4474_v52 = vld [vmem:[%s8210_s10 + $0xf8] sm:$0xff] }
 0x451   :  { %5291 = vmatprep.subr.bf16.mxu0 %v5885_v51  ;;  %v5329_v56 = vpack.c.bf16 %v4475_v53, %v4474_v52  ;;  %v4563_v52 = vld [vmem:[%s8210_s10 + $0x188] sm:$0xff] }
 0x454   :  { %5293 = vmatpush1.bf16.msra.mxu0 %v5292_v55 }
 0x455   :  { %5294 = vmatprep.subr.bf16.mxu0 %v5885_v51 }
 0x458   :  { %5296 = vmatpush1.bf16.msra.mxu0 %v5295_v58  ;;  %v4503_v58 = vld [vmem:[%s8212_s12 + $0x90] sm:$0xff] }
 0x459   :  { %5297 = vmatprep.subr.bf16.mxu0 %v5885_v51  ;;  %v5356_v61 = vpack.c.bf16 %v4503_v58, %v4502_v57  ;;  %v4592_v58 = vld [vmem:[%s8212_s12 + $0x120] sm:$0xff] }
 0x45c   :  { %5299 = vmatpush1.bf16.msra.mxu0 %v5298_v62  ;;  %v4504_v62 = vld [vmem:[%s8212_s12 + $0x98] sm:$0xff] }
 0x45d   :  { %840 = vmatprep.subr.mxu0 %v5886_v60 }
 0x460   :  { %4447 = vmatpush1.msk.msra.mxu0 %vm204_vm1, %v804_v63  ;;  %v4505_v63 = vld [vmem:[%s8212_s12 + $0xa0] sm:$0xff] }
 0x461   :  { %873 = vmatmul.mubr.f32.vlgmr.msra.gmra.mrb[12].mxu0 %v6520_v22  ;;  %5304 = vmatprep.subr.bf16.mxu0 %v5885_v51 }
 0x462   :  { %4449 = vmatprep.mubr.msk.f32.mxu0 %vm59_vm0, %v6540_v30 }
 0x465   :  { %878 = vmatmul.mubr.f32.gmra.mrb[14].mxu0 %v6538_v29 }
 0x466   :  { %4450 = vmatprep.mubr.msk.f32.mxu0 %vm59_vm0, %v6559_v14 }
 0x469   :  { %883 = vmatmul.mubr.f32.gmra.mrb[16].mxu0 %v6557_v13 }
 0x46a   :  { %4973 = vmatprep.mubr.msk.f32.mxu0 %vm5887_vm2, %v5886_v60 }
 0x511   :  { %v671_v0 = vpop.f32.mrb[6].mxu0  ;;  %v774_v1 = vpop.f32.mrb[6].mxu1 }
 0x512   :  { %v673_v2 = vpop.f32.mrb[7].mxu0  ;;  %v776_v35 = vpop.f32.mrb[7].mxu1  ;;  %v685_v17 = vmul.f32 0.21320072, %v671_v0  ;;  %v5359_v0 = vpack.c.bf16 %v4505_v63, %v4504_v62  ;;  %v4594_v62 = vld [vmem:[%s8212_s12 + $0x130] sm:$0xff]  ;;  %v4595_v63 = vld [vmem:[%s8212_s12 + $0x138] sm:$0xff] }
 0x513   :  { %v4507_v2 = vld [vmem:[%s8212_s12 + $0xb0] sm:$0xff] }
 0x516   :  { %v676_v3 = vpop.f32.mrb[8].mxu0  ;;  %v779_v5 = vpop.f32.mrb[8].mxu1 }
 0x517   :  { %v5301_v7 = vpack.c.bf16 %v779_v5, %v774_v1  ;;  %v678_v8 = vpop.f32.mrb[9].mxu0  ;;  %v781_v37 = vpop.f32.mrb[9].mxu1  ;;  %v686_v21 = vmul.f32 0.21320072, %v676_v3  ;;  %v4506_v1 = vld [vmem:[%s8212_s12 + $0xa8] sm:$0xff]  ;;  %v4508_v3 = vld [vmem:[%s8212_s12 + $0xb8] sm:$0xff] }
 0x518   :  { %v5362_v35 = vpack.c.bf16 %v4507_v2, %v4506_v1  ;;  %v4509_v5 = vld [vmem:[%s8212_s12 + $0xc0] sm:$0xff]  ;;  %v4510_v8 = vld [vmem:[%s8212_s12 + $0xc8] sm:$0xff]  ;;  %v4511_v37 = vld [vmem:[%s8212_s12 + $0xd0] sm:$0xff] }
 0x519   :  { %5303 = vmatpush3.bf16.xpose.msk.msra.mxu1 %vm6624_vm4, %v5301_v7  ;;  %v5365_v7 = vpack.c.bf16 %v4509_v5, %v4508_v3  ;;  %v4596_v1 = vld [vmem:[%s8212_s12 + $0x140] sm:$0xff]  ;;  %v4597_v2 = vld [vmem:[%s8212_s12 + $0x148] sm:$0xff]  ;;  %v4598_v3 = vld [vmem:[%s8212_s12 + $0x150] sm:$0xff] }
 0x51a   :  { %v681_v45 = vpop.f32.mrb[10].mxu0  ;;  %v784_v9 = vpop.f32.mrb[10].mxu1  ;;  %4956 = vmatprep.subr.mxu1 %v5886_v60  ;;  %v4599_v5 = vld [vmem:[%s8212_s12 + $0x158] sm:$0xff] }
 0x51b   :  { %v683_v10 = vpop.f32.mrb[11].mxu0  ;;  %v786_v11 = vpop.f32.mrb[11].mxu1  ;;  %v687_v25 = vmul.f32 0.21320072, %v681_v45  ;;  %v5368_v45 = vpack.c.bf16 %v4511_v37, %v4510_v8  ;;  %v4600_v8 = vld [vmem:[%s8212_s12 + $0x160] sm:$0xff]  ;;  %v4601_v37 = vld [vmem:[%s8212_s12 + $0x168] sm:$0xff] }
 0x51c   :  { %v4513_v10 = vld [vmem:[%s8212_s12 + $0xe0] sm:$0xff] }
 0x521   :  { %4957 = vmatpush3.xpose.msk.msra.mxu1 %vm888_vm3, %v784_v9  ;;  %v4512_v9 = vld [vmem:[%s8212_s12 + $0xd8] sm:$0xff] }
 0x522   :  { %5307 = vmatprep.subr.bf16.mxu1 %v5885_v51  ;;  %v5371_v11 = vpack.c.bf16 %v4513_v10, %v4512_v9  ;;  %v4602_v9 = vld [vmem:[%s8212_s12 + $0x170] sm:$0xff]  ;;  %v4603_v10 = vld [vmem:[%s8212_s12 + $0x178] sm:$0xff] }
 0x524   :  { %4959 = vmatmul.mubr.msk.f32.vlgmr.msra.gmra.mrb[12].mxu1 %vm888_vm3, %v685_v17  ;;  %v4516_v17 = vld [vmem:[%s8212_s12 + $0xf8] sm:$0xff] }
 0x525   :  { %5309 = vmatpush1.bf16.msra.mxu1 %v5308_v16  ;;  %4961 = vmatprep.mubr.msk.f32.mxu1 %vm5887_vm2, %v5886_v60  ;;  %v5374_v16 = vpack.c.bf16 %v4515_v15, %v4514_v12  ;;  %v5377_v19 = vpack.c.bf16 %v4517_v18, %v4516_v17  ;;  %v4604_v12 = vld [vmem:[%s8212_s12 + $0x180] sm:$0xff]  ;;  %v4605_v15 = vld [vmem:[%s8212_s12 + $0x188] sm:$0xff]  ;;  %v4631_v17 = vld [vmem:[%s8210_s10 + $0x198] sm:$0xff] }
 0x526   :  { %5310 = vmatprep.subr.bf16.mxu1 %v5885_v51  ;;  %v4632_v18 = vld [vmem:[%s8210_s10 + $0x1a0] sm:$0xff] }
 0x528   :  { %4962 = vmatmul.mubr.msk.f32.gmra.mrb[14].mxu1 %vm888_vm3, %v686_v21  ;;  %v4549_v21 = vld [vmem:[%s8210_s10 + $0x118] sm:$0xff] }
 0x529   :  { %5312 = vmatpush1.bf16.msra.mxu1 %v5311_v20  ;;  %4964 = vmatprep.mubr.msk.f32.mxu1 %vm5887_vm2, %v5886_v60  ;;  %v4548_v20 = vld [vmem:[%s8210_s10 + $0x110] sm:$0xff] }
 0x52a   :  { %5313 = vmatprep.subr.bf16.mxu1 %v5885_v51  ;;  %v5395_v4 = vpack.c.bf16 %v4549_v21, %v4548_v20  ;;  %v5478_v20 = vpack.c.bf16 %v4632_v18, %v4631_v17  ;;  %v4633_v21 = vld [vmem:[%s8210_s10 + $0x1a8] sm:$0xff]  ;;  %v4716_v18 = vld [vmem:[%s8210_s10 + $0x230] sm:$0xff] }
 0x52c   :  { %4965 = vmatmul.mubr.msk.f32.gmra.mrb[16].mxu1 %vm888_vm3, %v687_v25  ;;  %v4551_v25 = vld [vmem:[%s8210_s10 + $0x128] sm:$0xff] }
 0x52d   :  { %5315 = vmatpush1.bf16.msra.mxu1 %v5314_v34  ;;  %4478 = vmatprep.mubr.msk.f32.mxu1 %vm59_vm0, %v6522_v23  ;;  %v4550_v34 = vld [vmem:[%s8210_s10 + $0x120] sm:$0xff] }
 0x52e   :  { %5316 = vmatprep.subr.bf16.mxu1 %v5885_v51  ;;  %v5398_v26 = vpack.c.bf16 %v4551_v25, %v4550_v34  ;;  %v4635_v34 = vld [vmem:[%s8210_s10 + $0x1b8] sm:$0xff]  ;;  %v4636_v25 = vld [vmem:[%s8210_s10 + $0x1c0] sm:$0xff] }
 0x531   :  { %5318 = vmatpush1.bf16.msra.mxu1 %v5317_v28  ;;  %v4553_v28 = vld [vmem:[%s8210_s10 + $0x138] sm:$0xff] }
 0x532   :  { %5319 = vmatprep.subr.bf16.mxu1 %v5885_v51  ;;  %v5401_v44 = vpack.c.bf16 %v4553_v28, %v4552_v27  ;;  %v4637_v27 = vld [vmem:[%s8210_s10 + $0x1c8] sm:$0xff]  ;;  %v4638_v28 = vld [vmem:[%s8210_s10 + $0x1d0] sm:$0xff] }
 0x534   :  { %v874_v38 = vpop.f32.mrb[12].mxu0 }
 0x535   :  { %v876_v39 = vpop.f32.mrb[13].mxu0  ;;  %5321 = vmatpush1.bf16.msra.mxu1 %v5320_v31  ;;  %v4555_v31 = vld [vmem:[%s8210_s10 + $0x148] sm:$0xff] }
 0x536   :  { %5322 = vmatprep.subr.bf16.mxu1 %v5885_v51  ;;  %v5404_v32 = vpack.c.bf16 %v4555_v31, %v4554_v36  ;;  %v4639_v36 = vld [vmem:[%s8210_s10 + $0x1d8] sm:$0xff]  ;;  %v4640_v31 = vld [vmem:[%s8210_s10 + $0x1e0] sm:$0xff] }
 0x538   :  { %v879_v43 = vpop.f32.mrb[14].mxu0 }
 0x539   :  { %v5305_v46 = vpack.c.bf16 %v879_v43, %v874_v38  ;;  %v881_v49 = vpop.f32.mrb[15].mxu0  ;;  %5324 = vmatpush1.bf16.msra.mxu1 %v5323_v40  ;;  %v4557_v38 = vld [vmem:[%s8210_s10 + $0x158] sm:$0xff]  ;;  %v4558_v40 = vld [vmem:[%s8210_s10 + $0x160] sm:$0xff]  ;;  %v4560_v43 = vld [vmem:[%s8210_s10 + $0x170] sm:$0xff] }
 0x53a   :  { %5325 = vmatprep.subr.bf16.mxu1 %v5885_v51  ;;  %v5407_v39 = vpack.c.bf16 %v4557_v38, %v4556_v33  ;;  %v5410_v42 = vpack.c.bf16 %v4559_v41, %v4558_v40  ;;  %v4641_v33 = vld [vmem:[%s8210_s10 + $0x1e8] sm:$0xff]  ;;  %v4642_v38 = vld [vmem:[%s8210_s10 + $0x1f0] sm:$0xff]  ;;  %v4643_v40 = vld [vmem:[%s8210_s10 + $0x1f8] sm:$0xff] }
 0x53b   :  { %5306 = vmatpush3.bf16.msra.mxu0 %v5305_v46  ;;  %v4561_v46 = vld [vmem:[%s8210_s10 + $0x178] sm:$0xff]  ;;  %v4644_v41 = vld [vmem:[%s8210_s10 + $0x200] sm:$0xff] }
 0x53c   :  { %v884_v54 = vpop.f32.mrb[16].mxu0  ;;  %4971 = vmatprep.subr.mxu0 %v5886_v60  ;;  %v5413_v49 = vpack.c.bf16 %v4561_v46, %v4560_v43  ;;  %v4645_v43 = vld [vmem:[%s8210_s10 + $0x208] sm:$0xff]  ;;  %v4646_v46 = vld [vmem:[%s8210_s10 + $0x210] sm:$0xff] }
 0x53d   :  { %v886_v55 = vpop.f32.mrb[17].mxu0  ;;  %5327 = vmatpush1.bf16.msra.mxu1 %v5326_v50  ;;  %v4562_v50 = vld [vmem:[%s8210_s10 + $0x180] sm:$0xff] }
 0x53e   :  { %5328 = vmatprep.subr.bf16.mxu1 %v5885_v51  ;;  %v5416_v53 = vpack.c.bf16 %v4563_v52, %v4562_v50  ;;  %v4591_v55 = vld [vmem:[%s8212_s12 + $0x118] sm:$0xff]  ;;  %v4674_v52 = vld [vmem:[%s8212_s12 + $0x1a0] sm:$0xff] }
 0x53f   :  { %4972 = vmatpush3.msra.mxu0 %v884_v54  ;;  %v4590_v54 = vld [vmem:[%s8212_s12 + $0x110] sm:$0xff]  ;;  %v4673_v50 = vld [vmem:[%s8212_s12 + $0x198] sm:$0xff] }
 0x540   :  { %5331 = vmatprep.subr.bf16.mxu0 %v5885_v51  ;;  %v5443_v57 = vpack.c.bf16 %v4591_v55, %v4590_v54  ;;  %v5526_v54 = vpack.c.bf16 %v4674_v52, %v4673_v50  ;;  %v4675_v55 = vld [vmem:[%s8212_s12 + $0x1a8] sm:$0xff]  ;;  %v4725_v50 = vld [vmem:[%s8210_s10 + $0x278] sm:$0xff] }
 0x541   :  { %5330 = vmatpush1.bf16.msra.mxu1 %v5329_v56  ;;  %v4564_v56 = vld [vmem:[%s8210_s10 + $0x190] sm:$0xf] }
 0x542   :  { %1169 = vmatprep.subr.mxu1 %v5886_v60 }
 0x545   :  { %4477 = vmatpush1.msk.msra.mxu1 %vm204_vm1, %v4476_v59  ;;  %v4593_v59 = vld [vmem:[%s8212_s12 + $0x128] sm:$0xff] }
 0x546   :  { %1202 = vmatmul.mubr.f32.vlgmr.msra.gmra.mrb[18].mxu1 %v6520_v22  ;;  %5355 = vmatprep.subr.bf16.mxu1 %v5885_v51 }
 0x547   :  { %4479 = vmatprep.mubr.msk.f32.mxu1 %vm59_vm0, %v6540_v30  ;;  %5357 = vmatpush1.bf16.msra.mxu1 %v5356_v61  ;;  %v5446_v61 = vpack.c.bf16 %v4593_v59, %v4592_v58  ;;  %v4677_v58 = vld [vmem:[%s8212_s12 + $0x1b8] sm:$0xff]  ;;  %v4678_v59 = vld [vmem:[%s8212_s12 + $0x1c0] sm:$0xff] }
 0x548   :  { %5358 = vmatprep.subr.bf16.mxu1 %v5885_v51 }
 0x54a   :  { %1207 = vmatmul.mubr.f32.gmra.mrb[20].mxu1 %v6538_v29 }
 0x54b   :  { %4480 = vmatprep.mubr.msk.f32.mxu1 %vm59_vm0, %v6559_v14  ;;  %5360 = vmatpush1.bf16.msra.mxu1 %v5359_v0  ;;  %v5449_v0 = vpack.c.bf16 %v4595_v63, %v4594_v62  ;;  %v4679_v62 = vld [vmem:[%s8212_s12 + $0x1c8] sm:$0xff]  ;;  %v4680_v63 = vld [vmem:[%s8212_s12 + $0x1d0] sm:$0xff] }
 0x54c   :  { %5361 = vmatprep.subr.bf16.mxu1 %v5885_v51 }
 0x54e   :  { %1212 = vmatmul.mubr.f32.gmra.mrb[22].mxu1 %v6557_v13 }
 0x54f   :  { %5363 = vmatpush1.bf16.msra.mxu1 %v5362_v35  ;;  %4520 = vmatprep.mubr.msk.f32.mxu1 %vm59_vm0, %v6522_v23  ;;  %v5452_v35 = vpack.c.bf16 %v4597_v2, %v4596_v1  ;;  %v4681_v1 = vld [vmem:[%s8212_s12 + $0x1d8] sm:$0xff]  ;;  %v4682_v2 = vld [vmem:[%s8212_s12 + $0x1e0] sm:$0xff] }
 0x550   :  { %5364 = vmatprep.subr.bf16.mxu1 %v5885_v51 }
 0x553   :  { %5366 = vmatpush1.bf16.msra.mxu1 %v5365_v7  ;;  %v5455_v7 = vpack.c.bf16 %v4599_v5, %v4598_v3  ;;  %v4683_v3 = vld [vmem:[%s8212_s12 + $0x1e8] sm:$0xff]  ;;  %v4684_v5 = vld [vmem:[%s8212_s12 + $0x1f0] sm:$0xff] }
 0x554   :  { %5367 = vmatprep.subr.bf16.mxu1 %v5885_v51 }
 0x557   :  { %5369 = vmatpush1.bf16.msra.mxu1 %v5368_v45  ;;  %v5458_v45 = vpack.c.bf16 %v4601_v37, %v4600_v8  ;;  %v4685_v8 = vld [vmem:[%s8212_s12 + $0x1f8] sm:$0xff]  ;;  %v4686_v37 = vld [vmem:[%s8212_s12 + $0x200] sm:$0xff] }
 0x558   :  { %5370 = vmatprep.subr.bf16.mxu1 %v5885_v51 }
 0x55b   :  { %5372 = vmatpush1.bf16.msra.mxu1 %v5371_v11  ;;  %v5461_v11 = vpack.c.bf16 %v4603_v10, %v4602_v9  ;;  %v4687_v9 = vld [vmem:[%s8212_s12 + $0x208] sm:$0xff]  ;;  %v4688_v10 = vld [vmem:[%s8212_s12 + $0x210] sm:$0xff] }
 0x55c   :  { %5373 = vmatprep.subr.bf16.mxu1 %v5885_v51 }
 0x55f   :  { %5375 = vmatpush1.bf16.msra.mxu1 %v5374_v16  ;;  %v5464_v16 = vpack.c.bf16 %v4605_v15, %v4604_v12  ;;  %v4714_v12 = vld [vmem:[%s8210_s10 + $0x220] sm:$0xff]  ;;  %v4715_v15 = vld [vmem:[%s8210_s10 + $0x228] sm:$0xff] }
 0x560   :  { %5376 = vmatprep.subr.bf16.mxu1 %v5885_v51  ;;  %v5561_v17 = vpack.c.bf16 %v4715_v15, %v4714_v12 }
 0x563   :  { %5378 = vmatpush1.bf16.msra.mxu1 %v5377_v19  ;;  %v4606_v19 = vld [vmem:[%s8212_s12 + $0x190] sm:$0xf] }
 0x564   :  { %1374 = vmatprep.subr.mxu1 %v5886_v60 }
 0x567   :  { %4519 = vmatpush1.msk.msra.mxu1 %vm204_vm1, %v4518_v24  ;;  %v4634_v24 = vld [vmem:[%s8210_s10 + $0x1b0] sm:$0xff] }
 0x568   :  { %1407 = vmatmul.mubr.f32.vlgmr.msra.gmra.mrb[24].mxu1 %v6520_v22  ;;  %5394 = vmatprep.subr.bf16.mxu1 %v5885_v51 }
 0x569   :  { %4521 = vmatprep.mubr.msk.f32.mxu1 %vm59_vm0, %v6540_v30  ;;  %5396 = vmatpush1.bf16.msra.mxu1 %v5395_v4  ;;  %v5481_v4 = vpack.c.bf16 %v4634_v24, %v4633_v21  ;;  %v4718_v21 = vld [vmem:[%s8210_s10 + $0x240] sm:$0xff]  ;;  %v4719_v24 = vld [vmem:[%s8210_s10 + $0x248] sm:$0xff] }
 0x56a   :  { %5397 = vmatprep.subr.bf16.mxu1 %v5885_v51 }
 0x56c   :  { %1412 = vmatmul.mubr.f32.gmra.mrb[26].mxu1 %v6538_v29 }
 0x56d   :  { %4522 = vmatprep.mubr.msk.f32.mxu1 %vm59_vm0, %v6559_v14  ;;  %5399 = vmatpush1.bf16.msra.mxu1 %v5398_v26  ;;  %v5484_v26 = vpack.c.bf16 %v4636_v25, %v4635_v34  ;;  %v5567_v34 = vpack.c.bf16 %v4719_v24, %v4718_v21  ;;  %v4720_v25 = vld [vmem:[%s8210_s10 + $0x250] sm:$0xff]  ;;  %v4767_v24 = vld [vmem:[%s8212_s12 + $0x278] sm:$0xff] }
 0x56e   :  { %5400 = vmatprep.subr.bf16.mxu1 %v5885_v51  ;;  %v4766_v21 = vld [vmem:[%s8212_s12 + $0x270] sm:$0xff] }
 0x570   :  { %1417 = vmatmul.mubr.f32.gmra.mrb[28].mxu1 %v6557_v13 }
 0x571   :  { %5402 = vmatpush1.bf16.msra.mxu1 %v5401_v44  ;;  %4566 = vmatprep.mubr.msk.f32.mxu1 %vm59_vm0, %v6522_v23  ;;  %v5487_v44 = vpack.c.bf16 %v4638_v28, %v4637_v27 }
 0x572   :  { %5403 = vmatprep.subr.bf16.mxu1 %v5885_v51 }
 0x575   :  { %5405 = vmatpush1.bf16.msra.mxu1 %v5404_v32  ;;  %v5490_v32 = vpack.c.bf16 %v4640_v31, %v4639_v36  ;;  %v7101_v36 = vld [vmem:[%s8201_s1 + $0x8] sm:$0xff] }
 0x576   :  { %5406 = vmatprep.subr.bf16.mxu1 %v5885_v51 }
 0x579   :  { %5408 = vmatpush1.bf16.msra.mxu1 %v5407_v39  ;;  %v5493_v39 = vpack.c.bf16 %v4642_v38, %v4641_v33  ;;  %v4722_v33 = vld [vmem:[%s8210_s10 + $0x260] sm:$0xff]  ;;  %v4723_v38 = vld [vmem:[%s8210_s10 + $0x268] sm:$0xff] }
 0x57a   :  { %5409 = vmatprep.subr.bf16.mxu1 %v5885_v51 }
 0x57d   :  { %5411 = vmatpush1.bf16.msra.mxu1 %v5410_v42  ;;  %v5496_v42 = vpack.c.bf16 %v4644_v41, %v4643_v40 }
 0x57e   :  { %5412 = vmatprep.subr.bf16.mxu1 %v5885_v51 }
 0x581   :  { %5414 = vmatpush1.bf16.msra.mxu1 %v5413_v49  ;;  %v5499_v49 = vpack.c.bf16 %v4646_v46, %v4645_v43  ;;  %v5573_v43 = vpack.c.bf16 %v4723_v38, %v4722_v33  ;;  %v4771_v33 = vld [vmem:[%s8212_s12 + $0x298] sm:$0xff] }
 0x582   :  { %5415 = vmatprep.subr.bf16.mxu1 %v5885_v51 }
 0x585   :  { %5417 = vmatpush1.bf16.msra.mxu1 %v5416_v53  ;;  %v4647_v53 = vld [vmem:[%s8210_s10 + $0x218] sm:$0xf] }
 0x586   :  { %1899 = vmatprep.subr.mxu1 %v5886_v60 }
 0x589   :  { %4565 = vmatpush1.msk.msra.mxu1 %vm204_vm1, %v4564_v56  ;;  %v4676_v56 = vld [vmem:[%s8212_s12 + $0x1b0] sm:$0xff] }
 0x58a   :  { %1932 = vmatmul.mubr.f32.vlgmr.msra.gmra.mrb[30].mxu1 %v6520_v22  ;;  %5442 = vmatprep.subr.bf16.mxu1 %v5885_v51 }
 0x58b   :  { %4567 = vmatprep.mubr.msk.f32.mxu1 %vm59_vm0, %v6540_v30  ;;  %5444 = vmatpush1.bf16.msra.mxu1 %v5443_v57  ;;  %v5529_v57 = vpack.c.bf16 %v4676_v56, %v4675_v55 }
 0x58c   :  { %5445 = vmatprep.subr.bf16.mxu1 %v5885_v51 }
 0x58e   :  { %1937 = vmatmul.mubr.f32.gmra.mrb[32].mxu1 %v6538_v29 }
 0x58f   :  { %4568 = vmatprep.mubr.msk.f32.mxu1 %vm59_vm0, %v6559_v14  ;;  %5447 = vmatpush1.bf16.msra.mxu1 %v5446_v61  ;;  %v5532_v61 = vpack.c.bf16 %v4678_v59, %v4677_v58  ;;  %v4727_v58 = vld [vmem:[%s8210_s10 + $0x288] sm:$0xff] }
 0x590   :  { %5448 = vmatprep.subr.bf16.mxu1 %v5885_v51 }
 0x592   :  { %1942 = vmatmul.mubr.f32.gmra.mrb[34].mxu1 %v6557_v13 }
 0x593   :  { %5450 = vmatpush1.bf16.msra.mxu1 %v5449_v0  ;;  %4608 = vmatprep.mubr.msk.f32.mxu1 %vm59_vm0, %v6522_v23  ;;  %v5535_v0 = vpack.c.bf16 %v4680_v63, %v4679_v62  ;;  %v4729_v62 = vld [vmem:[%s8210_s10 + $0x298] sm:$0xff] }
 0x594   :  { %5451 = vmatprep.subr.bf16.mxu1 %v5885_v51 }
 0x597   :  { %5453 = vmatpush1.bf16.msra.mxu1 %v5452_v35  ;;  %v5538_v35 = vpack.c.bf16 %v4682_v2, %v4681_v1  ;;  %v4757_v1 = vld [vmem:[%s8212_s12 + $0x228] sm:$0xff]  ;;  %v4730_v2 = vld [vmem:[%s8210_s10 + $0x2a0] sm:$0xf] }
 0x598   :  { %5454 = vmatprep.subr.bf16.mxu1 %v5885_v51 }
 0x59b   :  { %5456 = vmatpush1.bf16.msra.mxu1 %v5455_v7  ;;  %v5541_v7 = vpack.c.bf16 %v4684_v5, %v4683_v3  ;;  %v4758_v3 = vld [vmem:[%s8212_s12 + $0x230] sm:$0xff]  ;;  %v4759_v5 = vld [vmem:[%s8212_s12 + $0x238] sm:$0xff] }
 0x59c   :  { %5457 = vmatprep.subr.bf16.mxu1 %v5885_v51 }
 0x59f   :  { %5459 = vmatpush1.bf16.msra.mxu1 %v5458_v45  ;;  %v5544_v45 = vpack.c.bf16 %v4686_v37, %v4685_v8  ;;  %v4760_v8 = vld [vmem:[%s8212_s12 + $0x240] sm:$0xff]  ;;  %v4761_v37 = vld [vmem:[%s8212_s12 + $0x248] sm:$0xff] }
 0x5a0   :  { %5460 = vmatprep.subr.bf16.mxu1 %v5885_v51 }
 0x5a3   :  { %5462 = vmatpush1.bf16.msra.mxu1 %v5461_v11  ;;  %v5547_v11 = vpack.c.bf16 %v4688_v10, %v4687_v9  ;;  %v4762_v9 = vld [vmem:[%s8212_s12 + $0x250] sm:$0xff]  ;;  %v4763_v10 = vld [vmem:[%s8212_s12 + $0x258] sm:$0xff] }
 0x5a4   :  { %5463 = vmatprep.subr.bf16.mxu1 %v5885_v51  ;;  %v5618_v15 = vpack.c.bf16 %v4763_v10, %v4762_v9  ;;  %v4809_v9 = vld [vmem:[%s8210_s10 + $0x308] sm:$0xff]  ;;  %v4810_v10 = vld [vmem:[%s8210_s10 + $0x310] sm:$0xff] }
 0x5a7   :  { %5465 = vmatpush1.bf16.msra.mxu1 %v5464_v16  ;;  %v4689_v16 = vld [vmem:[%s8212_s12 + $0x218] sm:$0xf] }
 0x5a8   :  { %2104 = vmatprep.subr.mxu1 %v5886_v60 }
 0x5ab   :  { %4607 = vmatpush1.msk.msra.mxu1 %vm204_vm1, %v4606_v19  ;;  %v4717_v19 = vld [vmem:[%s8210_s10 + $0x238] sm:$0xff] }
 0x5ac   :  { %2137 = vmatmul.mubr.f32.vlgmr.msra.gmra.mrb[36].mxu1 %v6520_v22  ;;  %5477 = vmatprep.subr.bf16.mxu1 %v5885_v51 }
 0x5ad   :  { %4609 = vmatprep.mubr.msk.f32.mxu1 %vm59_vm0, %v6540_v30  ;;  %5479 = vmatpush1.bf16.msra.mxu1 %v5478_v20  ;;  %v5564_v20 = vpack.c.bf16 %v4717_v19, %v4716_v18 }
 0x5ae   :  { %5480 = vmatprep.subr.bf16.mxu1 %v5885_v51 }
 0x5b0   :  { %2142 = vmatmul.mubr.f32.gmra.mrb[38].mxu1 %v6538_v29 }
 0x5b1   :  { %4610 = vmatprep.mubr.msk.f32.mxu1 %vm59_vm0, %v6559_v14  ;;  %5482 = vmatpush1.bf16.msra.mxu1 %v5481_v4  ;;  %v7083_v4 = vld [vmem:[%s8201_s1] sm:$0xff] }
 0x5b2   :  { %5483 = vmatprep.subr.bf16.mxu1 %v5885_v51 }
 0x5b4   :  { %2147 = vmatmul.mubr.f32.gmra.mrb[40].mxu1 %v6557_v13 }
 0x5b5   :  { %5485 = vmatpush1.bf16.msra.mxu1 %v5484_v26  ;;  %4649 = vmatprep.mubr.msk.f32.mxu1 %vm59_vm0, %v6522_v23  ;;  %v4721_v26 = vld [vmem:[%s8210_s10 + $0x258] sm:$0xff] }
 0x5b6   :  { %5486 = vmatprep.subr.bf16.mxu1 %v5885_v51  ;;  %v5570_v31 = vpack.c.bf16 %v4721_v26, %v4720_v25  ;;  %v5624_v26 = vpack.c.bf16 %v4767_v24, %v4766_v21  ;;  %v4813_v21 = vld [vmem:[%s8210_s10 + $0x328] sm:$0xf] }
 0x5b9   :  { %5488 = vmatpush1.bf16.msra.mxu1 %v5487_v44 }
 0x5ba   :  { %5489 = vmatprep.subr.bf16.mxu1 %v5885_v51 }
 0x5bd   :  { %5491 = vmatpush1.bf16.msra.mxu1 %v5490_v32 }
 0x5be   :  { %5492 = vmatprep.subr.bf16.mxu1 %v5885_v51 }
 0x5c1   :  { %5494 = vmatpush1.bf16.msra.mxu1 %v5493_v39 }
 0x5c2   :  { %5495 = vmatprep.subr.bf16.mxu1 %v5885_v51 }
 0x5c5   :  { %5497 = vmatpush1.bf16.msra.mxu1 %v5496_v42  ;;  %v7118_v42 = vld [vmem:[%s8201_s1 + $0x10] sm:$0xff] }
 0x5c6   :  { %5498 = vmatprep.subr.bf16.mxu1 %v5885_v51 }
 0x5c9   :  { %5500 = vmatpush1.bf16.msra.mxu1 %v5499_v49  ;;  %v4724_v49 = vld [vmem:[%s8210_s10 + $0x270] sm:$0xff] }
 0x5ca   :  { %2536 = vmatprep.subr.mxu1 %v5886_v60  ;;  %v5576_v55 = vpack.c.bf16 %v4725_v50, %v4724_v49  ;;  %v4799_v49 = vld [vmem:[%s8210_s10 + $0x2b8] sm:$0xff]  ;;  %v4800_v50 = vld [vmem:[%s8210_s10 + $0x2c0] sm:$0xff] }
 0x5cd   :  { %4648 = vmatpush1.msk.msra.mxu1 %vm204_vm1, %v4647_v53 }
 0x5ce   :  { %2569 = vmatmul.mubr.f32.vlgmr.msra.gmra.mrb[42].mxu1 %v6520_v22  ;;  %5525 = vmatprep.subr.bf16.mxu1 %v5885_v51 }
 0x5cf   :  { %4650 = vmatprep.mubr.msk.f32.mxu1 %vm59_vm0, %v6540_v30  ;;  %5527 = vmatpush1.bf16.msra.mxu1 %v5526_v54 }
 0x5d0   :  { %5528 = vmatprep.subr.bf16.mxu1 %v5885_v51 }
 0x5d2   :  { %2574 = vmatmul.mubr.f32.gmra.mrb[44].mxu1 %v6538_v29 }
 0x5d3   :  { %4651 = vmatprep.mubr.msk.f32.mxu1 %vm59_vm0, %v6559_v14  ;;  %5530 = vmatpush1.bf16.msra.mxu1 %v5529_v57  ;;  %v4726_v57 = vld [vmem:[%s8210_s10 + $0x280] sm:$0xff] }
 0x5d4   :  { %5531 = vmatprep.subr.bf16.mxu1 %v5885_v51  ;;  %v5579_v59 = vpack.c.bf16 %v4727_v58, %v4726_v57  ;;  %v4803_v57 = vld [vmem:[%s8210_s10 + $0x2d8] sm:$0xff]  ;;  %v4804_v58 = vld [vmem:[%s8210_s10 + $0x2e0] sm:$0xff] }
 0x5d6   :  { %2579 = vmatmul.mubr.f32.gmra.mrb[46].mxu1 %v6557_v13 }
 0x5d7   :  { %5533 = vmatpush1.bf16.msra.mxu1 %v5532_v61  ;;  %4691 = vmatprep.mubr.msk.f32.mxu1 %vm59_vm0, %v6522_v23  ;;  %v4728_v61 = vld [vmem:[%s8210_s10 + $0x290] sm:$0xff] }
 0x5d8   :  { %5534 = vmatprep.subr.bf16.mxu1 %v5885_v51  ;;  %v5582_v63 = vpack.c.bf16 %v4729_v62, %v4728_v61  ;;  %v5653_v62 = vpack.c.bf16 %v4804_v58, %v4803_v57 }
 0x5db   :  { %5536 = vmatpush1.bf16.msra.mxu1 %v5535_v0  ;;  %v4756_v0 = vld [vmem:[%s8212_s12 + $0x220] sm:$0xff] }
 0x5dc   :  { %5537 = vmatprep.subr.bf16.mxu1 %v5885_v51 }
 0x5df   :  { %5539 = vmatpush1.bf16.msra.mxu1 %v5538_v35  ;;  %v5609_v35 = vpack.c.bf16 %v4757_v1, %v4756_v0  ;;  %v4806_v0 = vld [vmem:[%s8210_s10 + $0x2f0] sm:$0xff] }
 0x5e0   :  { %5540 = vmatprep.subr.bf16.mxu1 %v5885_v51 }
 0x5e3   :  { %5542 = vmatpush1.bf16.msra.mxu1 %v5541_v7  ;;  %v5612_v7 = vpack.c.bf16 %v4759_v5, %v4758_v3  ;;  %v4807_v5 = vld [vmem:[%s8210_s10 + $0x2f8] sm:$0xff] }
 0x5e4   :  { %5543 = vmatprep.subr.bf16.mxu1 %v5885_v51 }
 0x5e7   :  { %5545 = vmatpush1.bf16.msra.mxu1 %v5544_v45  ;;  %v5615_v45 = vpack.c.bf16 %v4761_v37, %v4760_v8 }
 0x5e8   :  { %5546 = vmatprep.subr.bf16.mxu1 %v5885_v51 }
 0x5eb   :  { %5548 = vmatpush1.bf16.msra.mxu1 %v5547_v11 }
 0x5ec   :  { %2741 = vmatprep.subr.mxu1 %v5886_v60 }
 0x5ef   :  { %4690 = vmatpush1.msk.msra.mxu1 %vm204_vm1, %v4689_v16  ;;  %v4764_v16 = vld [vmem:[%s8212_s12 + $0x260] sm:$0xff] }
 0x5f0   :  { %2774 = vmatmul.mubr.f32.vlgmr.msra.gmra.mrb[48].mxu1 %v6520_v22  ;;  %5560 = vmatprep.subr.bf16.mxu1 %v5885_v51 }
 0x5f1   :  { %4692 = vmatprep.mubr.msk.f32.mxu1 %vm59_vm0, %v6540_v30  ;;  %5562 = vmatpush1.bf16.msra.mxu1 %v5561_v17  ;;  %v4765_v17 = vld [vmem:[%s8212_s12 + $0x268] sm:$0xff] }
 0x5f2   :  { %5563 = vmatprep.subr.bf16.mxu1 %v5885_v51 }
 0x5f4   :  { %2779 = vmatmul.mubr.f32.gmra.mrb[50].mxu1 %v6538_v29 }
 0x5f5   :  { %4693 = vmatprep.mubr.msk.f32.mxu1 %vm59_vm0, %v6559_v14  ;;  %5565 = vmatpush1.bf16.msra.mxu1 %v5564_v20  ;;  %v5621_v20 = vpack.c.bf16 %v4765_v17, %v4764_v16  ;;  %v4812_v16 = vld [vmem:[%s8210_s10 + $0x320] sm:$0xff] }
 0x5f6   :  { %5566 = vmatprep.subr.bf16.mxu1 %v5885_v51 }
 0x5f7   :  { %v973_v27 = vpop.f32.mrb[12].mxu1 }
 0x5f8   :  { %v7093_v28 = vadd.f32 %v973_v27, %v7083_v4  ;;  %v4960_v44 = vpop.f32.mrb[13].mxu1  ;;  %2784 = vmatmul.mubr.f32.gmra.mrb[52].mxu1 %v6557_v13  ;;  %v4768_v27 = vld [vmem:[%s8212_s12 + $0x280] sm:$0xff] }
 0x5f9   :  { %5568 = vmatpush1.bf16.msra.mxu1 %v5567_v34  ;;  %4732 = vmatprep.mubr.msk.f32.mxu1 %vm59_vm0, %v6522_v23  ;;  %v4769_v44 = vld [vmem:[%s8212_s12 + $0x288] sm:$0xff] }
 0x5fa   :  { %v988_v32 = vsel %vm987_vm5, %v7093_v28, -inf  ;;  %5569 = vmatprep.subr.bf16.mxu1 %v5885_v51 }
 0x5fb   :  { %989 = vmax.xlane.f32.xlu0 %v988_v32  ;;  %v978_v39 = vpop.f32.mrb[14].mxu1  ;;  %v4770_v32 = vld [vmem:[%s8212_s12 + $0x290] sm:$0xff] }
 0x5fc   :  { %v7113_v40 = vadd.f32 %v978_v39, %v7101_v36  ;;  %v4963_v41 = vpop.f32.mrb[15].mxu1  ;;  %v5630_v38 = vpack.c.bf16 %v4771_v33, %v4770_v32  ;;  %v4797_v39 = vld [vmem:[%s8210_s10 + $0x2a8] sm:$0xff]  ;;  %v4845_v33 = vld [vmem:[%s8212_s12 + $0x2d8] sm:$0xff] }
 0x5fd   :  { %5571 = vmatpush1.bf16.msra.mxu1 %v5570_v31  ;;  %v5627_v31 = vpack.c.bf16 %v4769_v44, %v4768_v27  ;;  %v4798_v41 = vld [vmem:[%s8210_s10 + $0x2b0] sm:$0xff]  ;;  %v4843_v44 = vld [vmem:[%s8212_s12 + $0x2c8] sm:$0xff] }
 0x5fe   :  { %v991_v46 = vsel %vm987_vm5, %v7113_v40, -inf  ;;  %5572 = vmatprep.subr.bf16.mxu1 %v5885_v51 }
 0x5ff   :  { %992 = vmax.xlane.f32.xlu1 %v991_v46  ;;  %v983_v52 = vpop.f32.mrb[16].mxu1  ;;  %v5644_v46 = vpack.c.bf16 %v4798_v41, %v4797_v39 }
 0x600   :  { %v7130_v53 = vadd.f32 %v983_v52, %v7118_v42  ;;  %v4966_v54 = vpop.f32.mrb[17].mxu1  ;;  %v5647_v52 = vpack.c.bf16 %v4800_v50, %v4799_v49  ;;  %v4848_v49 = vld [vmem:[%s8212_s12 + $0x2f0] sm:$0xff] }
 0x601   :  { %5574 = vmatpush1.bf16.msra.mxu1 %v5573_v43  ;;  %v4772_v43 = vld [vmem:[%s8212_s12 + $0x2a0] sm:$0xf]  ;;  %v4801_v54 = vld [vmem:[%s8210_s10 + $0x2c8] sm:$0xff] }
 0x602   :  { %v994_v56 = vsel %vm987_vm5, %v7130_v53, -inf  ;;  %5575 = vmatprep.subr.bf16.mxu1 %v5885_v51 }
 0x603   :  { %995 = vmax.xlane.f32.xlu0 %v994_v56 }
 0x605   :  { %5577 = vmatpush1.bf16.msra.mxu1 %v5576_v55  ;;  %v4802_v55 = vld [vmem:[%s8210_s10 + $0x2d0] sm:$0xff] }
 0x606   :  { %5578 = vmatprep.subr.bf16.mxu1 %v5885_v51  ;;  %v5650_v56 = vpack.c.bf16 %v4802_v55, %v4801_v54  ;;  %v4849_v55 = vld [vmem:[%s8212_s12 + $0x2f8] sm:$0xff] }
 0x609   :  { %5580 = vmatpush1.bf16.msra.mxu1 %v5579_v59 }
 0x60a   :  { %5581 = vmatprep.subr.bf16.mxu1 %v5885_v51 }
 0x60d   :  { %5583 = vmatpush1.bf16.msra.mxu1 %v5582_v63  ;;  %v4805_v63 = vld [vmem:[%s8210_s10 + $0x2e8] sm:$0xff] }
 0x60e   :  { %3173 = vmatprep.subr.mxu1 %v5886_v60  ;;  %v5656_v3 = vpack.c.bf16 %v4806_v0, %v4805_v63  ;;  %v4852_v63 = vld [vmem:[%s8212_s12 + $0x310] sm:$0xff] }
 0x611   :  { %4731 = vmatpush1.msk.msra.mxu1 %vm204_vm1, %v4730_v2 }
 0x612   :  { %3206 = vmatmul.mubr.f32.vlgmr.msra.gmra.mrb[54].mxu1 %v6520_v22  ;;  %5608 = vmatprep.subr.bf16.mxu1 %v5885_v51 }
 0x613   :  { %4733 = vmatprep.mubr.msk.f32.mxu1 %vm59_vm0, %v6540_v30  ;;  %5610 = vmatpush1.bf16.msra.mxu1 %v5609_v35 }
 0x614   :  { %5611 = vmatprep.subr.bf16.mxu1 %v5885_v51 }
 0x616   :  { %3211 = vmatmul.mubr.f32.gmra.mrb[56].mxu1 %v6538_v29 }
 0x617   :  { %4734 = vmatprep.mubr.msk.f32.mxu1 %vm59_vm0, %v6559_v14  ;;  %5613 = vmatpush1.bf16.msra.mxu1 %v5612_v7  ;;  %v4808_v7 = vld [vmem:[%s8210_s10 + $0x300] sm:$0xff] }
 0x618   :  { %5614 = vmatprep.subr.bf16.mxu1 %v5885_v51 }
 0x619   :  { %v7187_v11 = vpop.f32.mrb[18].mxu1 }
 0x61a   :  { %v1205_v12 = vpop.f32.mrb[19].mxu1  ;;  %3216 = vmatmul.mubr.f32.gmra.mrb[58].mxu1 %v6557_v13 }
 0x61b   :  { %5616 = vmatpush1.bf16.msra.mxu1 %v5615_v45  ;;  %4774 = vmatprep.mubr.msk.f32.mxu1 %vm59_vm0, %v6522_v23  ;;  %v5659_v45 = vpack.c.bf16 %v4808_v7, %v4807_v5  ;;  %v5662_v12 = vpack.c.bf16 %v4810_v10, %v4809_v9  ;;  %v4855_v7 = vld [vmem:[%s8212_s12 + $0x328] sm:$0xf] }
 0x61c   :  { %5617 = vmatprep.subr.bf16.mxu1 %v5885_v51 }
 0x61d   :  { %v7199_v18 = vpop.f32.mrb[20].mxu1 }
 0x61e   :  { %v1210_v19 = vpop.f32.mrb[21].mxu1 }
 0x61f   :  { %5619 = vmatpush1.bf16.msra.mxu1 %v5618_v15  ;;  %v4811_v15 = vld [vmem:[%s8210_s10 + $0x318] sm:$0xff]  ;;  %v4839_v19 = vld [vmem:[%s8212_s12 + $0x2a8] sm:$0xff] }
 0x620   :  { %5620 = vmatprep.subr.bf16.mxu1 %v5885_v51  ;;  %v5665_v17 = vpack.c.bf16 %v4812_v16, %v4811_v15 }
 0x621   :  { %v7208_v34 = vpop.f32.mrb[22].mxu1 }
 0x622   :  { %v1215_v25 = vpop.f32.mrb[23].mxu1 }
 0x623   :  { %5622 = vmatpush1.bf16.msra.mxu1 %v5621_v20  ;;  %v4840_v20 = vld [vmem:[%s8212_s12 + $0x2b0] sm:$0xff]  ;;  %v4841_v25 = vld [vmem:[%s8212_s12 + $0x2b8] sm:$0xff] }
 0x624   :  { %5623 = vmatprep.subr.bf16.mxu1 %v5885_v51  ;;  %v5692_v24 = vpack.c.bf16 %v4840_v20, %v4839_v19 }
 0x627   :  { %5625 = vmatpush1.bf16.msra.mxu1 %v5624_v26  ;;  %v4842_v26 = vld [vmem:[%s8212_s12 + $0x2c0] sm:$0xff] }
 0x628   :  { %5626 = vmatprep.subr.bf16.mxu1 %v5885_v51  ;;  %v5695_v27 = vpack.c.bf16 %v4842_v26, %v4841_v25 }
 0x62b   :  { %5628 = vmatpush1.bf16.msra.mxu1 %v5627_v31  ;;  %v4844_v31 = vld [vmem:[%s8212_s12 + $0x2d0] sm:$0xff] }
 0x62c   :  { %5629 = vmatprep.subr.bf16.mxu1 %v5885_v51  ;;  %v5698_v32 = vpack.c.bf16 %v4844_v31, %v4843_v44 }
 0x62f   :  { %5631 = vmatpush1.bf16.msra.mxu1 %v5630_v38  ;;  %v4846_v38 = vld [vmem:[%s8212_s12 + $0x2e0] sm:$0xff] }
 0x630   :  { %3378 = vmatprep.subr.mxu1 %v5886_v60 }
 0x633   :  { %4773 = vmatpush1.msk.msra.mxu1 %vm204_vm1, %v4772_v43  ;;  %v5701_v43 = vpack.c.bf16 %v4846_v38, %v4845_v33 }
 0x634   :  { %3411 = vmatmul.mubr.f32.vlgmr.msra.gmra.mrb[60].mxu1 %v6520_v22  ;;  %5643 = vmatprep.subr.bf16.mxu1 %v5885_v51 }
 0x635   :  { %4775 = vmatprep.mubr.msk.f32.mxu1 %vm59_vm0, %v6540_v30  ;;  %5645 = vmatpush1.bf16.msra.mxu1 %v5644_v46  ;;  %v4847_v46 = vld [vmem:[%s8212_s12 + $0x2e8] sm:$0xff] }
 0x636   :  { %5646 = vmatprep.subr.bf16.mxu1 %v5885_v51  ;;  %v5704_v54 = vpack.c.bf16 %v4848_v49, %v4847_v46 }
 0x638   :  { %3416 = vmatmul.mubr.f32.gmra.mrb[62].mxu1 %v6538_v29 }
 0x639   :  { %4776 = vmatprep.mubr.msk.f32.mxu1 %vm59_vm0, %v6559_v14  ;;  %5648 = vmatpush1.bf16.msra.mxu1 %v5647_v52 }
 0x63a   :  { %5649 = vmatprep.subr.bf16.mxu1 %v5885_v51 }
 0x63b   :  { %v7263_v59 = vpop.f32.mrb[24].mxu1 }
 0x63c   :  { %v1410_v61 = vpop.f32.mrb[25].mxu1  ;;  %3421 = vmatmul.mubr.f32.gmra.mrb[64].mxu1 %v6557_v13 }
 0x63d   :  { %5651 = vmatpush1.bf16.msra.mxu1 %v5650_v56  ;;  %4815 = vmatprep.mubr.msk.f32.mxu1 %vm59_vm0, %v6522_v23  ;;  %v4850_v56 = vld [vmem:[%s8212_s12 + $0x300] sm:$0xff] }
 0x63e   :  { %5652 = vmatprep.subr.bf16.mxu1 %v5885_v51  ;;  %v5707_v61 = vpack.c.bf16 %v4850_v56, %v4849_v55 }
 0x63f   :  { %v7275_v1 = vpop.f32.mrb[26].mxu1 }
 0x640   :  { %v5384_v2 = vpack.c.bf16 %v7275_v1, %v7263_v59  ;;  %v1415_v35 = vpop.f32.mrb[27].mxu1 }
 0x641   :  { %5654 = vmatpush1.bf16.msra.mxu1 %v5653_v62  ;;  %v4851_v62 = vld [vmem:[%s8212_s12 + $0x308] sm:$0xff]  ;;  %v4853_v35 = vld [vmem:[%s8212_s12 + $0x318] sm:$0xff] }
 0x642   :  { %5655 = vmatprep.subr.bf16.mxu1 %v5885_v51  ;;  %v5710_v0 = vpack.c.bf16 %v4852_v63, %v4851_v62 }
 0x643   :  { %v7286_v8 = vpop.f32.mrb[28].mxu1 }
 0x644   :  { %v1420_v37 = vpop.f32.mrb[29].mxu1 }
 0x645   :  { %5657 = vmatpush1.bf16.msra.mxu1 %v5656_v3  ;;  %v4854_v3 = vld [vmem:[%s8212_s12 + $0x320] sm:$0xff] }
 0x646   :  { %5658 = vmatprep.subr.bf16.mxu1 %v5885_v51  ;;  %v5713_v5 = vpack.c.bf16 %v4854_v3, %v4853_v35 }
 0x649   :  { %5660 = vmatpush1.bf16.msra.mxu1 %v5659_v45 }
 0x64a   :  { %5661 = vmatprep.subr.bf16.mxu1 %v5885_v51 }
 0x64d   :  { %5663 = vmatpush1.bf16.msra.mxu1 %v5662_v12 }
 0x64e   :  { %5664 = vmatprep.subr.bf16.mxu1 %v5885_v51 }
 0x651   :  { %5666 = vmatpush1.bf16.msra.mxu1 %v5665_v17 }
 0x652   :  { %3810 = vmatprep.subr.mxu1 %v5886_v60 }
 0x655   :  { %4814 = vmatpush1.msk.msra.mxu1 %vm204_vm1, %v4813_v21 }
 0x656   :  { %3843 = vmatmul.mubr.f32.vlgmr.msra.gmra.mrb[66].mxu1 %v6520_v22  ;;  %5691 = vmatprep.subr.bf16.mxu1 %v5885_v51 }
 0x657   :  { %4816 = vmatprep.mubr.msk.f32.mxu1 %vm59_vm0, %v6540_v30  ;;  %5693 = vmatpush1.bf16.msra.mxu1 %v5692_v24 }
 0x658   :  { %5694 = vmatprep.subr.bf16.mxu1 %v5885_v51 }
 0x65a   :  { %3848 = vmatmul.mubr.f32.gmra.mrb[68].mxu1 %v6538_v29 }
 0x65b   :  { %4817 = vmatprep.mubr.msk.f32.mxu1 %vm59_vm0, %v6559_v14  ;;  %5696 = vmatpush1.bf16.msra.mxu1 %v5695_v27 }
 0x65c   :  { %5697 = vmatprep.subr.bf16.mxu1 %v5885_v51 }
 0x65d   :  { %v7341_v39 = vpop.f32.mrb[30].mxu1 }
 0x65e   :  { %v1935_v41 = vpop.f32.mrb[31].mxu1  ;;  %3853 = vmatmul.mubr.f32.gmra.mrb[70].mxu1 %v6557_v13 }
 0x65f   :  { %5699 = vmatpush1.bf16.msra.mxu1 %v5698_v32  ;;  %4857 = vmatprep.mubr.msk.f32.mxu1 %vm59_vm0, %v6522_v23 }
 0x660   :  { %5700 = vmatprep.subr.bf16.mxu1 %v5885_v51 }
 0x661   :  { %v7353_v50 = vpop.f32.mrb[32].mxu1 }
 0x662   :  { %v1940_v52 = vpop.f32.mrb[33].mxu1 }
 0x663   :  { %5702 = vmatpush1.bf16.msra.mxu1 %v5701_v43 }
 0x664   :  { %5703 = vmatprep.subr.bf16.mxu1 %v5885_v51 }
 0x665   :  { %v7362_v57 = vpop.f32.mrb[34].mxu1 }
 0x666   :  { %v1945_v58 = vpop.f32.mrb[35].mxu1 }
 0x667   :  { %5705 = vmatpush1.bf16.msra.mxu1 %v5704_v54 }
 0x668   :  { %5706 = vmatprep.subr.bf16.mxu1 %v5885_v51 }
 0x66b   :  { %5708 = vmatpush1.bf16.msra.mxu1 %v5707_v61 }
 0x66c   :  { %5709 = vmatprep.subr.bf16.mxu1 %v5885_v51 }
 0x66f   :  { %5711 = vmatpush1.bf16.msra.mxu1 %v5710_v0 }
 0x670   :  { %5712 = vmatprep.subr.bf16.mxu1 %v5885_v51 }
 0x673   :  { %5714 = vmatpush1.bf16.msra.mxu1 %v5713_v5 }
 0x674   :  { %4015 = vmatprep.subr.mxu1 %v5886_v60 }
 0x677   :  { %4856 = vmatpush1.msk.msra.mxu1 %vm204_vm1, %v4855_v7 }
 0x678   :  { %4048 = vmatmul.mubr.f32.vlgmr.msra.gmra.mrb[72].mxu1 %v6520_v22  ;;  %5719 = vmatprep.subr.bf16.mxu1 %v5885_v51 }
 0x679   :  { %4858 = vmatprep.mubr.msk.f32.mxu1 %vm59_vm0, %v6540_v30 }
 0x67c   :  { %4053 = vmatmul.mubr.f32.gmra.mrb[74].mxu1 %v6538_v29 }
 0x67d   :  { %4859 = vmatprep.mubr.msk.f32.mxu1 %vm59_vm0, %v6559_v14 }
 0x67f   :  { %v7391_v37 = vpop.f32.mrb[36].mxu1 }
 0x680   :  { %v2140_v45 = vpop.f32.mrb[37].mxu1  ;;  %4058 = vmatmul.mubr.f32.gmra.mrb[76].mxu1 %v6557_v13 }
 0x681   :  { %5123 = vmatprep.mubr.msk.f32.mxu1 %vm5887_vm2, %v5886_v60 }
 0x683   :  { %v7396_v9 = vpop.f32.mrb[38].mxu1 }
 0x684   :  { %v5471_v10 = vpack.c.bf16 %v7396_v9, %v7391_v37  ;;  %v2145_v12 = vpop.f32.mrb[39].mxu1 }
 0x687   :  { %v7400_v15 = vpop.f32.mrb[40].mxu1 }
 0x688   :  { %v990_v16 = vpop.xlane.xlu0 %989  ;;  %v2150_v17 = vpop.f32.mrb[41].mxu1 }
 0x689   :  { %v997_v19 = vsub.f32 %v7093_v28, %v990_v16 }
 0x68b   :  { %v1000_v20 = vmul.f32 1.442695, %v997_v19 }
 0x68c   :  { %v993_v21 = vpop.xlane.xlu1 %992 }
 0x68d   :  { %5786 = vpow2.f32 %v1000_v20  ;;  %v998_v24 = vsub.f32 %v7113_v40, %v993_v21 }
 0x68f   :  { %v1002_v25 = vmul.f32 1.442695, %v998_v24 }
 0x690   :  { %v996_v26 = vpop.xlane.xlu0 %995 }
 0x691   :  { %5788 = vpow2.f32 %v1002_v25  ;;  %v999_v27 = vsub.f32 %v7130_v53, %v996_v26 }
 0x693   :  { %v1004_v44 = vmul.f32 1.442695, %v999_v27 }
 0x695   :  { %5790 = vpow2.f32 %v1004_v44 }
 0x697   :  { %v5787_v31 = vpop.eup %5786 }
 0x698   :  { %v1006_v32 = vsel %vm987_vm5, %v5787_v31, 0.0 }
 0x699   :  { %1007 = vadd.xlane.f32.xlu1 %v1006_v32 }
 0x69b   :  { %v5789_v33 = vpop.eup %5788 }
 0x69c   :  { %v1009_v38 = vsel %vm987_vm5, %v5789_v33, 0.0 }
 0x69d   :  { %1010 = vadd.xlane.f32.xlu0 %v1009_v38 }
 0x69f   :  { %v7407_v28 = vpop.eup %5790 }
 0x6a0   :  { %v1012_v40 = vsel %vm987_vm5, %v7407_v28, 0.0 }
 0x6a1   :  { %1013 = vadd.xlane.f32.xlu1 %v1012_v40  ;;  %v7411_v41 = vpop.f32.mrb[42].mxu1 }
 0x6a2   :  { %v2572_v43 = vpop.f32.mrb[43].mxu1 }
 0x6a3   :  { %v4481_v43 = vld [vmem:[%s8211_s11 + $0x88] sm:$0xff] }
 0x6a5   :  { %v7413_v53 = vpop.f32.mrb[44].mxu1 }
 0x6a6   :  { %v2577_v46 = vpop.f32.mrb[45].mxu1 }
 0x6a7   :  { %v4482_v46 = vld [vmem:[%s8211_s11 + $0x90] sm:$0xff] }
 0x6a9   :  { %v7415_v49 = vpop.f32.mrb[46].mxu1 }
 0x6aa   :  { %v2582_v52 = vpop.f32.mrb[47].mxu1 }
 0x6c3   :  { %v7417_v54 = vpop.f32.mrb[48].mxu1 }
 0x6c4   :  { %v2777_v55 = vpop.f32.mrb[49].mxu1 }
 0x6c7   :  { %v7419_v56 = vpop.f32.mrb[50].mxu1 }
 0x6c8   :  { %v5554_v58 = vpack.c.bf16 %v7419_v56, %v7417_v54  ;;  %v2782_v61 = vpop.f32.mrb[51].mxu1 }
 0x6c9   :  { %v5332_v61 = vpack.c.bf16 %v4482_v46, %v4481_v43  ;;  %v4490_v46 = vld [vmem:[%s8211_s11 + $0xd0] sm:$0xff] }
 0x6cb   :  { %v7423_v62 = vpop.f32.mrb[52].mxu1 }
 0x6cc   :  { %v2787_v63 = vpop.f32.mrb[53].mxu1 }
 0x6e5   :  { %v7425_v0 = vpop.f32.mrb[54].mxu1 }
 0x6e6   :  { %v3209_v35 = vpop.f32.mrb[55].mxu1 }
 0x6e9   :  { %v7427_v3 = vpop.f32.mrb[56].mxu1 }
 0x6ea   :  { %v3214_v5 = vpop.f32.mrb[57].mxu1 }
 0x6eb   :  { %v4483_v5 = vld [vmem:[%s8211_s11 + $0x98] sm:$0xff] }
 0x6ed   :  { %v7429_v7 = vpop.f32.mrb[58].mxu1 }
 0x6ee   :  { %v3219_v45 = vpop.f32.mrb[59].mxu1 }
 0x6ef   :  { %v4484_v45 = vld [vmem:[%s8211_s11 + $0xa0] sm:$0xff] }
 0x707   :  { %v7431_v12 = vpop.f32.mrb[60].mxu1 }
 0x708   :  { %v3414_v16 = vpop.f32.mrb[61].mxu1 }
 0x70b   :  { %v7433_v17 = vpop.f32.mrb[62].mxu1 }
 0x70c   :  { %v5637_v19 = vpack.c.bf16 %v7433_v17, %v7431_v12  ;;  %v3419_v20 = vpop.f32.mrb[63].mxu1 }
 0x70d   :  { %v5335_v20 = vpack.c.bf16 %v4484_v45, %v4483_v5  ;;  %v4493_v5 = vld [vmem:[%s8211_s11 + $0xe8] sm:$0xff]  ;;  %v4494_v45 = vld [vmem:[%s8211_s11 + $0xf0] sm:$0xff] }
 0x70f   :  { %v7437_v21 = vpop.f32.mrb[64].mxu1 }
 0x710   :  { %v3424_v24 = vpop.f32.mrb[65].mxu1 }
 0x711   :  { %v4485_v24 = vld [vmem:[%s8211_s11 + $0xa8] sm:$0xff] }
 0x726   :  { %v1008_v25 = vpop.xlane.xlu1 %1007 }
 0x727   :  { %5792 = vrcp.f32 %v1008_v25  ;;  %v4486_v25 = vld [vmem:[%s8211_s11 + $0xb0] sm:$0xff] }
 0x729   :  { %v7439_v26 = vpop.f32.mrb[66].mxu1 }
 0x72a   :  { %v1011_v27 = vpop.xlane.xlu0 %1010  ;;  %v3846_v44 = vpop.f32.mrb[67].mxu1 }
 0x72b   :  { %5794 = vrcp.f32 %v1011_v27  ;;  %v5338_v44 = vpack.c.bf16 %v4486_v25, %v4485_v24 }
 0x72d   :  { %v7441_v32 = vpop.f32.mrb[68].mxu1 }
 0x72e   :  { %v1014_v38 = vpop.xlane.xlu1 %1013  ;;  %v3851_v40 = vpop.f32.mrb[69].mxu1 }
 0x72f   :  { %5796 = vrcp.f32 %v1014_v38  ;;  %v4487_v38 = vld [vmem:[%s8211_s11 + $0xb8] sm:$0xff]  ;;  %v4488_v40 = vld [vmem:[%s8211_s11 + $0xc0] sm:$0xff] }
 0x730   :  { %v5341_v43 = vpack.c.bf16 %v4488_v40, %v4487_v38  ;;  %v4497_v40 = vld [vmem:[%s8211_s11 + $0x108] sm:$0xf] }
 0x731   :  { %v5793_v52 = vpop.eup %5792  ;;  %v7449_v55 = vpop.f32.mrb[70].mxu1 }
 0x732   :  { %v1016_v63 = vmul.f32 %v5793_v52, %v5787_v31  ;;  %v3856_v35 = vpop.f32.mrb[71].mxu1 }
 0x734   :  { %4974 = vmatmul.mubr.msk.f32.vlgmr.msra.gmra.mrb[18].mxu0 %vm987_vm5, %v1016_v63  ;;  %v4492_v63 = vld [vmem:[%s8211_s11 + $0xe0] sm:$0xff] }
 0x735   :  { %v5795_v16 = vpop.eup %5794  ;;  %5333 = vmatpush1.bf16.msra.mxu0 %v5332_v61  ;;  %4976 = vmatprep.mubr.msk.f32.mxu0 %vm5887_vm2, %v5886_v60  ;;  %v4491_v61 = vld [vmem:[%s8211_s11 + $0xd8] sm:$0xff] }
 0x736   :  { %5334 = vmatprep.subr.bf16.mxu0 %v5885_v51  ;;  %v1018_v31 = vmul.f32 %v5795_v16, %v5789_v33  ;;  %v5347_v35 = vpack.c.bf16 %v4492_v63, %v4491_v61  ;;  %v5350_v16 = vpack.c.bf16 %v4494_v45, %v4493_v5 }
 0x738   :  { %4977 = vmatmul.mubr.msk.f32.gmra.mrb[20].mxu0 %vm987_vm5, %v1018_v31  ;;  %v4496_v31 = vld [vmem:[%s8211_s11 + $0x100] sm:$0xff] }
 0x739   :  { %v5797_v27 = vpop.eup %5796  ;;  %5336 = vmatpush1.bf16.msra.mxu0 %v5335_v20  ;;  %4979 = vmatprep.mubr.msk.f32.mxu0 %vm5887_vm2, %v5886_v60  ;;  %v4495_v20 = vld [vmem:[%s8211_s11 + $0xf8] sm:$0xff] }
 0x73a   :  { %5337 = vmatprep.subr.bf16.mxu0 %v5885_v51  ;;  %v1020_v33 = vmul.f32 %v5797_v27, %v7407_v28  ;;  %v4489_v28 = vld [vmem:[%s8211_s11 + $0xc8] sm:$0xff]  ;;  %v5353_v27 = vpack.c.bf16 %v4496_v31, %v4495_v20 }
 0x73b   :  { %v5344_v52 = vpack.c.bf16 %v4490_v46, %v4489_v28 }
 0x73c   :  { %4980 = vmatmul.mubr.msk.f32.gmra.mrb[22].mxu0 %vm987_vm5, %v1020_v33 }
 0x73d   :  { %5339 = vmatpush1.bf16.msra.mxu0 %v5338_v44  ;;  %4499 = vmatprep.mubr.msk.f32.mxu0 %vm59_vm0, %v6522_v23 }
 0x73e   :  { %5340 = vmatprep.subr.bf16.mxu0 %v5885_v51 }
 0x741   :  { %5342 = vmatpush1.bf16.msra.mxu0 %v5341_v43 }
 0x742   :  { %5343 = vmatprep.subr.bf16.mxu0 %v5885_v51 }
 0x745   :  { %5345 = vmatpush1.bf16.msra.mxu0 %v5344_v52 }
 0x746   :  { %5346 = vmatprep.subr.bf16.mxu0 %v5885_v51 }
 0x749   :  { %5348 = vmatpush1.bf16.msra.mxu0 %v5347_v35 }
 0x74a   :  { %5349 = vmatprep.subr.bf16.mxu0 %v5885_v51 }
 0x74b   :  { %v4049_v24 = vpop.f32.mrb[72].mxu1 }
 0x74c   :  { %v4051_v25 = vpop.f32.mrb[73].mxu1 }
 0x74d   :  { %5351 = vmatpush1.bf16.msra.mxu0 %v5350_v16 }
 0x74e   :  { %5352 = vmatprep.subr.bf16.mxu0 %v5885_v51 }
 0x74f   :  { %v4054_v44 = vpop.f32.mrb[74].mxu1 }
 0x750   :  { %v5720_v33 = vpack.c.bf16 %v4054_v44, %v4049_v24  ;;  %v4056_v38 = vpop.f32.mrb[75].mxu1  ;;  %v1217_v44 = vmul.f32 0.21320072, %v7187_v11  ;;  %v1219_v11 = vmul.f32 0.21320072, %v7208_v34 }
 0x751   :  { %5354 = vmatpush1.bf16.msra.mxu0 %v5353_v27 }
 0x752   :  { %5721 = vmatpush3.bf16.msra.mxu1 %v5720_v33  ;;  %1273 = vmatprep.subr.mxu0 %v5886_v60  ;;  %v1218_v33 = vmul.f32 0.21320072, %v7199_v18 }
 0x753   :  { %v4059_v43 = vpop.f32.mrb[76].mxu1  ;;  %5121 = vmatprep.subr.mxu1 %v5886_v60 }
 0x754   :  { %v4061_v28 = vpop.f32.mrb[77].mxu1 }
 0x755   :  { %4498 = vmatpush1.msk.msra.mxu0 %vm204_vm1, %v4497_v40 }
 0x756   :  { %1306 = vmatmul.mubr.f32.vlgmr.msra.gmra.mrb[24].mxu0 %v6520_v22  ;;  %5122 = vmatpush3.msra.mxu1 %v4059_v43 }
 0x757   :  { %4500 = vmatprep.mubr.msk.f32.mxu0 %vm59_vm0, %v6540_v30  ;;  %5379 = vmatprep.subr.bf16.mxu0 %v5885_v51 }
 0x75a   :  { %1311 = vmatmul.mubr.f32.gmra.mrb[26].mxu0 %v6538_v29 }
 0x75b   :  { %4501 = vmatprep.mubr.msk.f32.mxu0 %vm59_vm0, %v6559_v14 }
 0x75e   :  { %1316 = vmatmul.mubr.f32.gmra.mrb[28].mxu0 %v6557_v13 }
 0x75f   :  { %4988 = vmatprep.mubr.msk.f32.mxu0 %vm5887_vm2, %v5886_v60 }
 0x807   :  { %v7526_v46 = vpop.f32.mrb[18].mxu0 }
 0x808   :  { %v4975_v52 = vpop.f32.mrb[19].mxu0 }
 0x80b   :  { %v7528_v61 = vpop.f32.mrb[20].mxu0 }
 0x80c   :  { %v4978_v63 = vpop.f32.mrb[21].mxu0 }
 0x80f   :  { %v7530_v35 = vpop.f32.mrb[22].mxu0 }
 0x810   :  { %v4981_v5 = vpop.f32.mrb[23].mxu0 }
 0x829   :  { %v1307_v45 = vpop.f32.mrb[24].mxu0 }
 0x82a   :  { %v1309_v16 = vpop.f32.mrb[25].mxu0 }
 0x82d   :  { %v1312_v20 = vpop.f32.mrb[26].mxu0 }
 0x82e   :  { %v5380_v31 = vpack.c.bf16 %v1312_v20, %v1307_v45  ;;  %v1314_v24 = vpop.f32.mrb[27].mxu0 }
 0x830   :  { %5382 = vmatpush3.bf16.xpose.msk.msra.mxu0 %vm6624_vm4, %v5380_v31 }
 0x831   :  { %v1317_v25 = vpop.f32.mrb[28].mxu0  ;;  %4986 = vmatprep.subr.mxu0 %v5886_v60 }
 0x832   :  { %v1319_v27 = vpop.f32.mrb[29].mxu0 }
 0x838   :  { %4987 = vmatpush3.xpose.msk.msra.mxu0 %vm888_vm3, %v1317_v25 }
 0x839   :  { %5383 = vmatprep.subr.bf16.mxu0 %v5885_v51 }
 0x83b   :  { %4989 = vmatmul.mubr.msk.f32.vlgmr.msra.gmra.mrb[30].mxu0 %vm888_vm3, %v1217_v44 }
 0x83c   :  { %5385 = vmatpush3.bf16.msra.mxu0 %v5384_v2  ;;  %4991 = vmatprep.mubr.msk.f32.mxu0 %vm5887_vm2, %v5886_v60 }
 0x83d   :  { %5001 = vmatprep.subr.mxu0 %v5886_v60 }
 0x83f   :  { %4992 = vmatmul.mubr.msk.f32.gmra.mrb[32].mxu0 %vm888_vm3, %v1218_v33 }
 0x840   :  { %5002 = vmatpush3.msra.mxu0 %v7286_v8  ;;  %4994 = vmatprep.mubr.msk.f32.mxu0 %vm5887_vm2, %v5886_v60 }
 0x843   :  { %4995 = vmatmul.mubr.msk.f32.gmra.mrb[34].mxu0 %vm888_vm3, %v1219_v11 }
 0x844   :  { %5003 = vmatprep.mubr.msk.f32.mxu0 %vm5887_vm2, %v5886_v60 }
 0x90e   :  { %v1506_v59 = vpop.f32.mrb[30].mxu0 }
 0x90f   :  { %v1507_v1 = vadd.f32 %v1506_v59, %v7083_v4  ;;  %v4990_v18 = vpop.f32.mrb[31].mxu0 }
 0x910   :  { %v4535_v18 = vld [vmem:[%s8213_s13 + $0x48] sm:$0xff] }
 0x911   :  { %v1520_v2 = vsel %vm987_vm5, %v1507_v1, -inf }
 0x912   :  { %1521 = vmax.xlane.f32.xlu0 %v1520_v2  ;;  %v1511_v38 = vpop.f32.mrb[32].mxu0 }
 0x913   :  { %v1512_v8 = vadd.f32 %v1511_v38, %v7101_v36  ;;  %v4993_v40 = vpop.f32.mrb[33].mxu0 }
 0x915   :  { %v1523_v43 = vsel %vm987_vm5, %v1512_v8, -inf }
 0x916   :  { %1524 = vmax.xlane.f32.xlu1 %v1523_v43  ;;  %v1516_v34 = vpop.f32.mrb[34].mxu0  ;;  %v4532_v43 = vld [vmem:[%s8213_s13 + $0x30] sm:$0xff] }
 0x917   :  { %v1517_v28 = vadd.f32 %v1516_v34, %v7118_v42  ;;  %v4996_v52 = vpop.f32.mrb[35].mxu0  ;;  %v4534_v34 = vld [vmem:[%s8213_s13 + $0x40] sm:$0xff] }
 0x918   :  { %v5388_v52 = vpack.c.bf16 %v4534_v34, %v4532_v43 }
 0x919   :  { %v1526_v63 = vsel %vm987_vm5, %v1517_v28, -inf }
 0x91a   :  { %1527 = vmax.xlane.f32.xlu0 %v1526_v63 }
 0x99f   :  { %v1522_v5 = vpop.xlane.xlu0 %1521 }
 0x9a0   :  { %v1529_v4 = vsub.f32 %v1507_v1, %v1522_v5  ;;  %v4533_v1 = vld [vmem:[%s8213_s13 + $0x38] sm:$0xff] }
 0x9a1   :  { %v5386_v2 = vpack.c.bf16 %v4535_v18, %v4533_v1  ;;  %v4537_v5 = vld [vmem:[%s8213_s13 + $0x58] sm:$0x3f]  ;;  %v1114_v1 = vld [vmem:[%s8213_s13 + $0x20] sm:$0x3f] }
 0x9a2   :  { %v1532_v45 = vmul.f32 1.442695, %v1529_v4 }
 0x9a3   :  { %v1525_v16 = vpop.xlane.xlu1 %1524  ;;  %5387 = vmatprep.subr.bf16.mxu0 %v5386_v2 }
 0x9a4   :  { %5798 = vpow2.f32 %v1532_v45  ;;  %v1530_v20 = vsub.f32 %v1512_v8, %v1525_v16  ;;  %v4536_v16 = vld [vmem:[%s8213_s13 + $0x50] sm:$0x3f] }
 0x9a6   :  { %v1534_v31 = vmul.f32 1.442695, %v1530_v20 }
 0x9a7   :  { %v1528_v24 = vpop.xlane.xlu0 %1527 }
 0x9a8   :  { %5800 = vpow2.f32 %v1534_v31  ;;  %v1531_v36 = vsub.f32 %v1517_v28, %v1528_v24  ;;  %v1111_v24 = vld [vmem:[%s8213_s13 + $0x8] sm:$0xff] }
 0x9aa   :  { %v1536_v25 = vmul.f32 1.442695, %v1531_v36  ;;  %v1113_v36 = vld [vmem:[%s8213_s13 + $0x18] sm:$0xff] }
 0x9ac   :  { %5802 = vpow2.f32 %v1536_v25  ;;  %v5390_v25 = vpack.c.bf16 %v1113_v36, %v1111_v24  ;;  %v4580_v36 = vld [vmem:[%s8211_s11 + $0x168] sm:$0xff] }
 0x9ae   :  { %v5799_v27 = vpop.eup %5798 }
 0x9af   :  { %v1538_v44 = vsel %vm987_vm5, %v5799_v27, 0.0 }
 0x9b0   :  { %1539 = vadd.xlane.f32.xlu1 %v1538_v44  ;;  %v1112_v44 = vld [vmem:[%s8213_s13 + $0x10] sm:$0xff] }
 0x9b2   :  { %v5801_v42 = vpop.eup %5800 }
 0x9b3   :  { %v1541_v33 = vsel %vm987_vm5, %v5801_v42, 0.0 }
 0x9b4   :  { %1542 = vadd.xlane.f32.xlu0 %v1541_v33 }
 0x9b6   :  { %v5803_v11 = vpop.eup %5802 }
 0x9b7   :  { %v1544_v59 = vsel %vm987_vm5, %v5803_v11, 0.0 }
 0x9b8   :  { %1545 = vadd.xlane.f32.xlu1 %v1544_v59 }
 0xa3d   :  { %v1540_v38 = vpop.xlane.xlu1 %1539 }
 0xa3e   :  { %5804 = vrcp.f32 %v1540_v38  ;;  %v4569_v38 = vld [vmem:[%s8211_s11 + $0x110] sm:$0xff] }
 0xa41   :  { %v1543_v8 = vpop.xlane.xlu0 %1542 }
 0xa42   :  { %5806 = vrcp.f32 %v1543_v8  ;;  %v4570_v8 = vld [vmem:[%s8211_s11 + $0x118] sm:$0xff] }
 0xa43   :  { %v5419_v34 = vpack.c.bf16 %v4570_v8, %v4569_v38 }
 0xa45   :  { %v1546_v40 = vpop.xlane.xlu1 %1545 }
 0xa46   :  { %5808 = vrcp.f32 %v1546_v40 }
 0xa48   :  { %v5805_v28 = vpop.eup %5804 }
 0xa49   :  { %v1548_v63 = vmul.f32 %v5805_v28, %v5799_v27  ;;  %v1110_v27 = vld [vmem:[%s8213_s13] sm:$0xff] }
 0xa4a   :  { %v4571_v28 = vld [vmem:[%s8211_s11 + $0x120] sm:$0xff] }
 0xa4b   :  { %5004 = vmatmul.mubr.msk.f32.vlgmr.msra.gmra.mrb[36].mxu0 %vm987_vm5, %v1548_v63 }
 0xa4c   :  { %v5807_v4 = vpop.eup %5806  ;;  %5006 = vmatprep.mubr.msk.f32.mxu0 %vm5887_vm2, %v5886_v60  ;;  %5389 = vmatpush1.bf16.msra.mxu0 %v5388_v52  ;;  %v4572_v52 = vld [vmem:[%s8211_s11 + $0x128] sm:$0xff] }
 0xa4d   :  { %v1550_v45 = vmul.f32 %v5807_v4, %v5801_v42  ;;  %4538 = vmatprep.subr.msk.mxu0 %vm1658_vm6, %v4537_v5  ;;  %v5392_v42 = vpack.c.bf16 %v1112_v44, %v1110_v27  ;;  %v5422_v63 = vpack.c.bf16 %v4572_v52, %v4571_v28  ;;  %v4573_v5 = vld [vmem:[%s8211_s11 + $0x130] sm:$0xff]  ;;  %v4574_v4 = vld [vmem:[%s8211_s11 + $0x138] sm:$0xff]  ;;  %v1947_v28 = vmul.f32 0.21320072, %v7341_v39 }
 0xa4e   :  { %v4581_v27 = vld [vmem:[%s8211_s11 + $0x170] sm:$0xff]  ;;  %v4582_v44 = vld [vmem:[%s8211_s11 + $0x178] sm:$0xff]  ;;  %v1948_v52 = vmul.f32 0.21320072, %v7353_v50  ;;  %v1949_v39 = vmul.f32 0.21320072, %v7362_v57 }
 0xa4f   :  { %5007 = vmatmul.mubr.msk.f32.gmra.mrb[38].mxu0 %vm987_vm5, %v1550_v45  ;;  %v4575_v45 = vld [vmem:[%s8211_s11 + $0x140] sm:$0xff]  ;;  %v7730_v57 = vld [vmem:[%s8201_s1 + $0x8] sm:$0xff] }
 0xa50   :  { %v5809_v20 = vpop.eup %5808  ;;  %5009 = vmatprep.mubr.msk.f32.mxu0 %vm5887_vm2, %v5886_v60  ;;  %4539 = vmatpush1.msk.msra.mxu0 %vm1658_vm6, %v4536_v16  ;;  %v4576_v16 = vld [vmem:[%s8211_s11 + $0x148] sm:$0xff]  ;;  %v7723_v50 = vld [vmem:[%s8201_s1] sm:$0xff] }
 0xa51   :  { %v1552_v31 = vmul.f32 %v5809_v20, %v5803_v11  ;;  %5391 = vmatprep.subr.bf16.mxu0 %v5390_v25  ;;  %v1115_v11 = vld [vmem:[%s8213_s13 + $0x28] sm:$0x3f]  ;;  %v4577_v20 = vld [vmem:[%s8211_s11 + $0x150] sm:$0xff] }
 0xa53   :  { %5010 = vmatmul.mubr.msk.f32.gmra.mrb[40].mxu0 %vm987_vm5, %v1552_v31  ;;  %v4578_v31 = vld [vmem:[%s8211_s11 + $0x158] sm:$0xff] }
 0xa54   :  { %1729 = vmatprep.mubr.f32.mxu0 %v5886_v60  ;;  %v5431_v24 = vpack.c.bf16 %v4578_v31, %v4577_v20 }
 0xb1e   :  { %v1628_v33 = vpop.f32.mrb[36].mxu0 }
 0xb1f   :  { %v5005_v59 = vpop.f32.mrb[37].mxu0  ;;  %4540 = vmatmul.mubr.msk.f32.vlgmr.msra.gmra.mrb[42].mxu0 %vm888_vm3, %v1628_v33  ;;  %v4583_v33 = vld [vmem:[%s8211_s11 + $0x180] sm:$0xff] }
 0xb20   :  { %1735 = vmatprep.mubr.f32.mxu0 %v5886_v60  ;;  %5393 = vmatpush1.bf16.msra.mxu0 %v5392_v42  ;;  %v5437_v42 = vpack.c.bf16 %v4582_v44, %v4581_v27 }
 0xb21   :  { %4543 = vmatprep.subr.msk.mxu0 %vm1658_vm6, %v1115_v11  ;;  %v4584_v11 = vld [vmem:[%s8211_s11 + $0x188] sm:$0xff] }
 0xb22   :  { %v1633_v18 = vpop.f32.mrb[38].mxu0  ;;  %v5440_v59 = vpack.c.bf16 %v4584_v11, %v4583_v33 }
 0xb23   :  { %v5008_v2 = vpop.f32.mrb[39].mxu0  ;;  %4541 = vmatmul.mubr.msk.f32.gmra.mrb[44].mxu0 %vm888_vm3, %v1633_v18 }
 0xb24   :  { %1741 = vmatprep.mubr.f32.mxu0 %v5886_v60  ;;  %4544 = vmatpush1.msk.msra.mxu0 %vm1658_vm6, %v1114_v1  ;;  %v4585_v1 = vld [vmem:[%s8211_s11 + $0x190] sm:$0xf] }
 0xb25   :  { %5418 = vmatprep.subr.bf16.mxu0 %v5885_v51 }
 0xb26   :  { %v1638_v40 = vpop.f32.mrb[40].mxu0 }
 0xb27   :  { %v5011_v43 = vpop.f32.mrb[41].mxu0  ;;  %4542 = vmatmul.mubr.msk.f32.gmra.mrb[46].mxu0 %vm888_vm3, %v1638_v40 }
 0xb28   :  { %1827 = vmatprep.mubr.f32.mxu0 %v5886_v60 }
 0xb2b   :  { %4545 = vmatmul.mubr.msk.f32.vlgmr.msra.gmra.mrb[42].mxu0 %vm888_vm3, %v7526_v46  ;;  %v5425_v46 = vpack.c.bf16 %v4574_v4, %v4573_v5 }
 0xb2c   :  { %5420 = vmatpush1.bf16.msra.mxu0 %v5419_v34  ;;  %1833 = vmatprep.mubr.f32.mxu0 %v5886_v60 }
 0xb2d   :  { %5421 = vmatprep.subr.bf16.mxu0 %v5885_v51 }
 0xb2f   :  { %4546 = vmatmul.mubr.msk.f32.gmra.mrb[44].mxu0 %vm888_vm3, %v7528_v61  ;;  %v5428_v61 = vpack.c.bf16 %v4576_v16, %v4575_v45  ;;  %v7737_v16 = vld [vmem:[%s8201_s1 + $0x10] sm:$0xff] }
 0xb30   :  { %5423 = vmatpush1.bf16.msra.mxu0 %v5422_v63  ;;  %1839 = vmatprep.mubr.f32.mxu0 %v5886_v60 }
 0xb31   :  { %5424 = vmatprep.subr.bf16.mxu0 %v5885_v51 }
 0xb33   :  { %4547 = vmatmul.mubr.msk.f32.gmra.mrb[46].mxu0 %vm888_vm3, %v7530_v35  ;;  %v4579_v35 = vld [vmem:[%s8211_s11 + $0x160] sm:$0xff] }
 0xb34   :  { %5426 = vmatpush1.bf16.msra.mxu0 %v5425_v46  ;;  %4587 = vmatprep.mubr.msk.f32.mxu0 %vm59_vm0, %v6522_v23  ;;  %v5434_v25 = vpack.c.bf16 %v4580_v36, %v4579_v35 }
 0xb35   :  { %5427 = vmatprep.subr.bf16.mxu0 %v5885_v51 }
 0xb38   :  { %5429 = vmatpush1.bf16.msra.mxu0 %v5428_v61 }
 0xb39   :  { %5430 = vmatprep.subr.bf16.mxu0 %v5885_v51 }
 0xb3c   :  { %5432 = vmatpush1.bf16.msra.mxu0 %v5431_v24 }
 0xb3d   :  { %5433 = vmatprep.subr.bf16.mxu0 %v5885_v51 }
 0xb40   :  { %5435 = vmatpush1.bf16.msra.mxu0 %v5434_v25 }
 0xb41   :  { %5436 = vmatprep.subr.bf16.mxu0 %v5885_v51 }
 0xb44   :  { %5438 = vmatpush1.bf16.msra.mxu0 %v5437_v42 }
 0xb45   :  { %5439 = vmatprep.subr.bf16.mxu0 %v5885_v51 }
 0xb48   :  { %5441 = vmatpush1.bf16.msra.mxu0 %v5440_v59 }
 0xb49   :  { %2003 = vmatprep.subr.mxu0 %v5886_v60 }
 0xb4c   :  { %4586 = vmatpush1.msk.msra.mxu0 %vm204_vm1, %v4585_v1 }
 0xb4d   :  { %2036 = vmatmul.mubr.f32.vlgmr.msra.gmra.mrb[48].mxu0 %v6520_v22  ;;  %5466 = vmatprep.subr.bf16.mxu0 %v5885_v51 }
 0xb4e   :  { %4588 = vmatprep.mubr.msk.f32.mxu0 %vm59_vm0, %v6540_v30 }
 0xb51   :  { %2041 = vmatmul.mubr.f32.gmra.mrb[50].mxu0 %v6538_v29 }
 0xb52   :  { %4589 = vmatprep.mubr.msk.f32.mxu0 %vm59_vm0, %v6559_v14 }
 0xb55   :  { %2046 = vmatmul.mubr.f32.gmra.mrb[52].mxu0 %v6557_v13 }
 0xb56   :  { %5018 = vmatprep.mubr.msk.f32.mxu0 %vm5887_vm2, %v5886_v60 }
 0xc20   :  { %v2037_v18 = vpop.f32.mrb[48].mxu0 }
 0xc21   :  { %v2039_v2 = vpop.f32.mrb[49].mxu0 }
 0xc24   :  { %v2042_v38 = vpop.f32.mrb[50].mxu0 }
 0xc25   :  { %v5467_v8 = vpack.c.bf16 %v2042_v38, %v2037_v18  ;;  %v2044_v40 = vpop.f32.mrb[51].mxu0 }
 0xc26   :  { %v4621_v40 = vld [vmem:[%s8213_s13 + $0x68] sm:$0xff] }
 0xc27   :  { %5469 = vmatpush3.bf16.xpose.msk.msra.mxu0 %vm6624_vm4, %v5467_v8 }
 0xc28   :  { %v2047_v43 = vpop.f32.mrb[52].mxu0  ;;  %5016 = vmatprep.subr.mxu0 %v5886_v60 }
 0xc29   :  { %v2049_v34 = vpop.f32.mrb[53].mxu0 }
 0xc2f   :  { %5017 = vmatpush3.xpose.msk.msra.mxu0 %vm888_vm3, %v2047_v43  ;;  %v4623_v43 = vld [vmem:[%s8213_s13 + $0x78] sm:$0xff] }
 0xc30   :  { %5470 = vmatprep.subr.bf16.mxu0 %v5885_v51  ;;  %v5473_v34 = vpack.c.bf16 %v4623_v43, %v4621_v40 }
 0xc32   :  { %5019 = vmatmul.mubr.msk.f32.vlgmr.msra.gmra.mrb[54].mxu0 %vm888_vm3, %v1947_v28 }
 0xc33   :  { %5472 = vmatpush3.bf16.msra.mxu0 %v5471_v10  ;;  %5021 = vmatprep.mubr.msk.f32.mxu0 %vm5887_vm2, %v5886_v60 }
 0xc34   :  { %5031 = vmatprep.subr.mxu0 %v5886_v60 }
 0xc36   :  { %5022 = vmatmul.mubr.msk.f32.gmra.mrb[56].mxu0 %vm888_vm3, %v1948_v52 }
 0xc37   :  { %5032 = vmatpush3.msra.mxu0 %v7400_v15  ;;  %5024 = vmatprep.mubr.msk.f32.mxu0 %vm5887_vm2, %v5886_v60 }
 0xc38   :  { %5474 = vmatprep.subr.bf16.mxu0 %v5473_v34  ;;  %v4660_v34 = vld [vmem:[%s8211_s11 + $0x1d8] sm:$0xff] }
 0xc3a   :  { %5025 = vmatmul.mubr.msk.f32.gmra.mrb[58].mxu0 %vm888_vm3, %v1949_v39 }
 0xc3b   :  { %5033 = vmatprep.mubr.msk.f32.mxu0 %vm5887_vm2, %v5886_v60 }
 0xd05   :  { %v2236_v37 = vpop.f32.mrb[54].mxu0 }
 0xd06   :  { %v2237_v9 = vadd.f32 %v7723_v50, %v2236_v37  ;;  %v5020_v10 = vpop.f32.mrb[55].mxu0  ;;  %v4620_v37 = vld [vmem:[%s8213_s13 + $0x60] sm:$0xff] }
 0xd08   :  { %v2250_v15 = vsel %vm987_vm5, %v2237_v9, -inf }
 0xd09   :  { %2251 = vmax.xlane.f32.xlu0 %v2250_v15  ;;  %v2241_v63 = vpop.f32.mrb[56].mxu0 }
 0xd0a   :  { %v2242_v5 = vadd.f32 %v7730_v57, %v2241_v63  ;;  %v5023_v4 = vpop.f32.mrb[57].mxu0 }
 0xd0c   :  { %v2253_v46 = vsel %vm987_vm5, %v2242_v5, -inf }
 0xd0d   :  { %2254 = vmax.xlane.f32.xlu1 %v2253_v46  ;;  %v2246_v45 = vpop.f32.mrb[58].mxu0 }
 0xd0e   :  { %v2247_v61 = vadd.f32 %v7737_v16, %v2246_v45  ;;  %v5026_v20 = vpop.f32.mrb[59].mxu0  ;;  %v4624_v45 = vld [vmem:[%s8213_s13 + $0x80] sm:$0x3f] }
 0xd10   :  { %v2256_v31 = vsel %vm987_vm5, %v2247_v61, -inf }
 0xd11   :  { %2257 = vmax.xlane.f32.xlu0 %v2256_v31  ;;  %v4652_v31 = vld [vmem:[%s8211_s11 + $0x198] sm:$0xff] }
 0xd96   :  { %v2252_v24 = vpop.xlane.xlu0 %2251 }
 0xd97   :  { %v2259_v35 = vsub.f32 %v2237_v9, %v2252_v24  ;;  %v4622_v9 = vld [vmem:[%s8213_s13 + $0x70] sm:$0xff]  ;;  %v4653_v24 = vld [vmem:[%s8211_s11 + $0x1a0] sm:$0xff] }
 0xd98   :  { %v5475_v15 = vpack.c.bf16 %v4622_v9, %v4620_v37  ;;  %v4663_v37 = vld [vmem:[%s8211_s11 + $0x1f0] sm:$0xff] }
 0xd99   :  { %v2262_v36 = vmul.f32 1.442695, %v2259_v35  ;;  %v5502_v35 = vpack.c.bf16 %v4653_v24, %v4652_v31 }
 0xd9a   :  { %v2255_v25 = vpop.xlane.xlu1 %2254 }
 0xd9b   :  { %5810 = vpow2.f32 %v2262_v36  ;;  %v2260_v27 = vsub.f32 %v2242_v5, %v2255_v25  ;;  %v4625_v5 = vld [vmem:[%s8213_s13 + $0x88] sm:$0x3f]  ;;  %v4655_v25 = vld [vmem:[%s8211_s11 + $0x1b0] sm:$0xff] }
 0xd9c   :  { %v4654_v36 = vld [vmem:[%s8211_s11 + $0x1a8] sm:$0xff] }
 0xd9d   :  { %v2264_v44 = vmul.f32 1.442695, %v2260_v27 }
 0xd9e   :  { %v2258_v42 = vpop.xlane.xlu0 %2257 }
 0xd9f   :  { %5812 = vpow2.f32 %v2264_v44  ;;  %v2261_v33 = vsub.f32 %v2247_v61, %v2258_v42  ;;  %v5505_v42 = vpack.c.bf16 %v4655_v25, %v4654_v36 }
 0xda1   :  { %v2266_v11 = vmul.f32 1.442695, %v2261_v33  ;;  %v4656_v33 = vld [vmem:[%s8211_s11 + $0x1b8] sm:$0xff] }
 0xda3   :  { %5814 = vpow2.f32 %v2266_v11  ;;  %v4657_v11 = vld [vmem:[%s8211_s11 + $0x1c0] sm:$0xff] }
 0xda5   :  { %v5811_v59 = vpop.eup %5810 }
 0xda6   :  { %v2268_v1 = vsel %vm987_vm5, %v5811_v59, 0.0 }
 0xda7   :  { %2269 = vadd.xlane.f32.xlu1 %v2268_v1 }
 0xda9   :  { %v5813_v18 = vpop.eup %5812 }
 0xdaa   :  { %v2271_v2 = vsel %vm987_vm5, %v5813_v18, 0.0 }
 0xdab   :  { %2272 = vadd.xlane.f32.xlu0 %v2271_v2  ;;  %v4658_v2 = vld [vmem:[%s8211_s11 + $0x1c8] sm:$0xff] }
 0xdad   :  { %v5815_v38 = vpop.eup %5814 }
 0xdae   :  { %v2274_v8 = vsel %vm987_vm5, %v5815_v38, 0.0 }
 0xdaf   :  { %2275 = vadd.xlane.f32.xlu1 %v2274_v8 }
 0xe34   :  { %v2270_v28 = vpop.xlane.xlu1 %2269 }
 0xe35   :  { %5816 = vrcp.f32 %v2270_v28  ;;  %v4661_v28 = vld [vmem:[%s8211_s11 + $0x1e0] sm:$0xff] }
 0xe38   :  { %v2273_v52 = vpop.xlane.xlu0 %2272 }
 0xe39   :  { %5818 = vrcp.f32 %v2273_v52  ;;  %v5514_v52 = vpack.c.bf16 %v4661_v28, %v4660_v34 }
 0xe3c   :  { %v2276_v39 = vpop.xlane.xlu1 %2275 }
 0xe3d   :  { %5820 = vrcp.f32 %v2276_v39  ;;  %v4662_v39 = vld [vmem:[%s8211_s11 + $0x1e8] sm:$0xff] }
 0xe3e   :  { %v5517_v9 = vpack.c.bf16 %v4663_v37, %v4662_v39 }
 0xe3f   :  { %v5817_v10 = vpop.eup %5816 }
 0xe40   :  { %v2278_v63 = vmul.f32 %v5817_v10, %v5811_v59  ;;  %v4664_v10 = vld [vmem:[%s8211_s11 + $0x1f8] sm:$0xff] }
 0xe42   :  { %5034 = vmatmul.mubr.msk.f32.vlgmr.msra.gmra.mrb[60].mxu0 %vm987_vm5, %v2278_v63 }
 0xe43   :  { %v5819_v4 = vpop.eup %5818  ;;  %5036 = vmatprep.mubr.msk.f32.mxu0 %vm5887_vm2, %v5886_v60  ;;  %5476 = vmatpush1.bf16.msra.mxu0 %v5475_v15  ;;  %v4665_v15 = vld [vmem:[%s8211_s11 + $0x200] sm:$0xff] }
 0xe44   :  { %v2280_v46 = vmul.f32 %v5819_v4, %v5813_v18  ;;  %4626 = vmatprep.subr.msk.mxu0 %vm1658_vm6, %v4625_v5  ;;  %v5508_v18 = vpack.c.bf16 %v4657_v11, %v4656_v33  ;;  %v5520_v63 = vpack.c.bf16 %v4665_v15, %v4664_v10  ;;  %v4666_v5 = vld [vmem:[%s8211_s11 + $0x208] sm:$0xff]  ;;  %v4667_v4 = vld [vmem:[%s8211_s11 + $0x210] sm:$0xff] }
 0xe46   :  { %5037 = vmatmul.mubr.msk.f32.gmra.mrb[62].mxu0 %vm987_vm5, %v2280_v46  ;;  %v5523_v46 = vpack.c.bf16 %v4667_v4, %v4666_v5  ;;  %v4704_v4 = vld [vmem:[%s8213_s13 + $0x98] sm:$0xff] }
 0xe47   :  { %v5821_v61 = vpop.eup %5820  ;;  %5039 = vmatprep.mubr.msk.f32.mxu0 %vm5887_vm2, %v5886_v60  ;;  %4627 = vmatpush1.msk.msra.mxu0 %vm1658_vm6, %v4624_v45  ;;  %v4668_v45 = vld [vmem:[%s8211_s11 + $0x218] sm:$0xf] }
 0xe48   :  { %v2282_v20 = vmul.f32 %v5821_v61, %v5815_v38  ;;  %5501 = vmatprep.subr.bf16.mxu0 %v5885_v51  ;;  %v4659_v38 = vld [vmem:[%s8211_s11 + $0x1d0] sm:$0xff] }
 0xe49   :  { %v5511_v43 = vpack.c.bf16 %v4659_v38, %v4658_v2 }
 0xe4a   :  { %5040 = vmatmul.mubr.msk.f32.gmra.mrb[64].mxu0 %vm987_vm5, %v2282_v20 }
 0xe4b   :  { %2458 = vmatprep.mubr.f32.mxu0 %v5886_v60 }
 0xf15   :  { %v2358_v27 = vpop.f32.mrb[60].mxu0 }
 0xf16   :  { %v5035_v44 = vpop.f32.mrb[61].mxu0  ;;  %4628 = vmatmul.mubr.msk.f32.vlgmr.msra.gmra.mrb[42].mxu0 %vm888_vm3, %v2358_v27  ;;  %v2584_v27 = vmul.f32 0.21320072, %v7411_v41  ;;  %v2586_v41 = vmul.f32 0.21320072, %v7415_v49 }
 0xf17   :  { %5503 = vmatpush1.bf16.msra.mxu0 %v5502_v35  ;;  %2464 = vmatprep.mubr.f32.mxu0 %v5886_v60  ;;  %v2585_v44 = vmul.f32 0.21320072, %v7413_v53 }
 0xf18   :  { %5504 = vmatprep.subr.bf16.mxu0 %v5885_v51 }
 0xf19   :  { %v2363_v59 = vpop.f32.mrb[62].mxu0 }
 0xf1a   :  { %v5038_v1 = vpop.f32.mrb[63].mxu0  ;;  %4629 = vmatmul.mubr.msk.f32.gmra.mrb[44].mxu0 %vm888_vm3, %v2363_v59 }
 0xf1b   :  { %5506 = vmatpush1.bf16.msra.mxu0 %v5505_v42  ;;  %2470 = vmatprep.mubr.f32.mxu0 %v5886_v60 }
 0xf1c   :  { %5507 = vmatprep.subr.bf16.mxu0 %v5885_v51 }
 0xf1d   :  { %v2368_v8 = vpop.f32.mrb[64].mxu0 }
 0xf1e   :  { %v5041_v40 = vpop.f32.mrb[65].mxu0  ;;  %4630 = vmatmul.mubr.msk.f32.gmra.mrb[46].mxu0 %vm888_vm3, %v2368_v8 }
 0xf1f   :  { %5509 = vmatpush1.bf16.msra.mxu0 %v5508_v18  ;;  %4670 = vmatprep.mubr.msk.f32.mxu0 %vm59_vm0, %v6522_v23 }
 0xf20   :  { %5510 = vmatprep.subr.bf16.mxu0 %v5885_v51 }
 0xf23   :  { %5512 = vmatpush1.bf16.msra.mxu0 %v5511_v43 }
 0xf24   :  { %5513 = vmatprep.subr.bf16.mxu0 %v5885_v51 }
 0xf27   :  { %5515 = vmatpush1.bf16.msra.mxu0 %v5514_v52 }
 0xf28   :  { %5516 = vmatprep.subr.bf16.mxu0 %v5885_v51 }
 0xf2b   :  { %5518 = vmatpush1.bf16.msra.mxu0 %v5517_v9 }
 0xf2c   :  { %5519 = vmatprep.subr.bf16.mxu0 %v5885_v51 }
 0xf2f   :  { %5521 = vmatpush1.bf16.msra.mxu0 %v5520_v63 }
 0xf30   :  { %5522 = vmatprep.subr.bf16.mxu0 %v5885_v51 }
 0xf33   :  { %5524 = vmatpush1.bf16.msra.mxu0 %v5523_v46  ;;  %v4706_v46 = vld [vmem:[%s8213_s13 + $0xa8] sm:$0xff] }
 0xf34   :  { %2640 = vmatprep.subr.mxu0 %v5886_v60 }
 0xf37   :  { %4669 = vmatpush1.msk.msra.mxu0 %vm204_vm1, %v4668_v45  ;;  %v5556_v45 = vpack.c.bf16 %v4706_v46, %v4704_v4  ;;  %v4747_v46 = vld [vmem:[%s8211_s11 + $0x280] sm:$0xff] }
 0xf38   :  { %2673 = vmatmul.mubr.f32.vlgmr.msra.gmra.mrb[66].mxu0 %v6520_v22  ;;  %5549 = vmatprep.subr.bf16.mxu0 %v5885_v51 }
 0xf39   :  { %4671 = vmatprep.mubr.msk.f32.mxu0 %vm59_vm0, %v6540_v30 }
 0xf3c   :  { %2678 = vmatmul.mubr.f32.gmra.mrb[68].mxu0 %v6538_v29 }
 0xf3d   :  { %4672 = vmatprep.mubr.msk.f32.mxu0 %vm59_vm0, %v6559_v14 }
 0xf40   :  { %2683 = vmatmul.mubr.f32.gmra.mrb[70].mxu0 %v6557_v13 }
 0xf41   :  { %5048 = vmatprep.mubr.msk.f32.mxu0 %vm5887_vm2, %v5886_v60 }
0x100b   :  { %v2674_v61 = vpop.f32.mrb[66].mxu0 }
0x100c   :  { %v2676_v20 = vpop.f32.mrb[67].mxu0 }
0x100f   :  { %v2679_v31 = vpop.f32.mrb[68].mxu0 }
0x1010   :  { %v5550_v24 = vpack.c.bf16 %v2679_v31, %v2674_v61  ;;  %v2681_v35 = vpop.f32.mrb[69].mxu0 }
0x1011   :  { %v4705_v35 = vld [vmem:[%s8213_s13 + $0xa0] sm:$0xff] }
0x1012   :  { %5552 = vmatpush3.bf16.xpose.msk.msra.mxu0 %vm6624_vm4, %v5550_v24  ;;  %v4703_v24 = vld [vmem:[%s8213_s13 + $0x90] sm:$0xff] }
0x1013   :  { %v2684_v36 = vpop.f32.mrb[70].mxu0  ;;  %5046 = vmatprep.subr.mxu0 %v5886_v60 }
0x1014   :  { %v2686_v25 = vpop.f32.mrb[71].mxu0 }
0x1015   :  { %v5558_v25 = vpack.c.bf16 %v4705_v35, %v4703_v24  ;;  %v4751_v35 = vld [vmem:[%s8211_s11 + $0x2a0] sm:$0xf] }
0x101a   :  { %5047 = vmatpush3.xpose.msk.msra.mxu0 %vm888_vm3, %v2684_v36 }
0x101b   :  { %5553 = vmatprep.subr.bf16.mxu0 %v5885_v51 }
0x101d   :  { %5049 = vmatmul.mubr.msk.f32.vlgmr.msra.gmra.mrb[72].mxu0 %vm888_vm3, %v2584_v27 }
0x101e   :  { %5555 = vmatpush3.bf16.msra.mxu0 %v5554_v58  ;;  %5051 = vmatprep.mubr.msk.f32.mxu0 %vm5887_vm2, %v5886_v60 }
0x101f   :  { %5061 = vmatprep.subr.mxu0 %v5886_v60 }
0x1021   :  { %5052 = vmatmul.mubr.msk.f32.gmra.mrb[74].mxu0 %vm888_vm3, %v2585_v44  ;;  %v4708_v44 = vld [vmem:[%s8213_s13 + $0xb8] sm:$0x3f] }
0x1022   :  { %5062 = vmatpush3.msra.mxu0 %v7423_v62  ;;  %5054 = vmatprep.mubr.msk.f32.mxu0 %vm5887_vm2, %v5886_v60 }
0x1023   :  { %5557 = vmatprep.subr.bf16.mxu0 %v5556_v45  ;;  %v4748_v45 = vld [vmem:[%s8211_s11 + $0x288] sm:$0xff] }
0x1025   :  { %5055 = vmatmul.mubr.msk.f32.gmra.mrb[76].mxu0 %vm888_vm3, %v2586_v41 }
0x1026   :  { %5063 = vmatprep.mubr.msk.f32.mxu0 %vm5887_vm2, %v5886_v60 }
0x10f0   :  { %v2873_v54 = vpop.f32.mrb[72].mxu0 }
0x10f1   :  { %v2874_v56 = vadd.f32 %v7723_v50, %v2873_v54  ;;  %v5050_v53 = vpop.f32.mrb[73].mxu0 }
0x10f3   :  { %v2887_v58 = vsel %vm987_vm5, %v2874_v56, -inf }
0x10f4   :  { %2888 = vmax.xlane.f32.xlu0 %v2887_v58  ;;  %v2878_v42 = vpop.f32.mrb[74].mxu0 }
0x10f5   :  { %v2879_v62 = vadd.f32 %v7730_v57, %v2878_v42  ;;  %v5053_v33 = vpop.f32.mrb[75].mxu0  ;;  %v4735_v42 = vld [vmem:[%s8211_s11 + $0x220] sm:$0xff] }
0x10f7   :  { %v2890_v11 = vsel %vm987_vm5, %v2879_v62, -inf }
0x10f8   :  { %2891 = vmax.xlane.f32.xlu1 %v2890_v11  ;;  %v2883_v49 = vpop.f32.mrb[76].mxu0  ;;  %v4737_v11 = vld [vmem:[%s8211_s11 + $0x230] sm:$0xff] }
0x10f9   :  { %v2884_v59 = vadd.f32 %v7737_v16, %v2883_v49  ;;  %v5056_v1 = vpop.f32.mrb[77].mxu0  ;;  %v4738_v49 = vld [vmem:[%s8211_s11 + $0x238] sm:$0xff] }
0x10fb   :  { %v2893_v18 = vsel %vm987_vm5, %v2884_v59, -inf }
0x10fc   :  { %2894 = vmax.xlane.f32.xlu0 %v2893_v18  ;;  %v5588_v18 = vpack.c.bf16 %v4738_v49, %v4737_v11 }
0x1181   :  { %v2889_v2 = vpop.xlane.xlu0 %2888 }
0x1182   :  { %v2896_v38 = vsub.f32 %v2874_v56, %v2889_v2  ;;  %v4707_v56 = vld [vmem:[%s8213_s13 + $0xb0] sm:$0x3f]  ;;  %v4739_v2 = vld [vmem:[%s8211_s11 + $0x240] sm:$0xff] }
0x1184   :  { %v2899_v8 = vmul.f32 1.442695, %v2896_v38  ;;  %v4740_v38 = vld [vmem:[%s8211_s11 + $0x248] sm:$0xff] }
0x1185   :  { %v2892_v40 = vpop.xlane.xlu1 %2891 }
0x1186   :  { %5822 = vpow2.f32 %v2899_v8  ;;  %v2897_v43 = vsub.f32 %v2879_v62, %v2892_v40  ;;  %v4736_v62 = vld [vmem:[%s8211_s11 + $0x228] sm:$0xff] }
0x1187   :  { %v5585_v33 = vpack.c.bf16 %v4736_v62, %v4735_v42 }
0x1188   :  { %v2901_v34 = vmul.f32 1.442695, %v2897_v43  ;;  %v5591_v43 = vpack.c.bf16 %v4740_v38, %v4739_v2 }
0x1189   :  { %v2895_v28 = vpop.xlane.xlu0 %2894 }
0x118a   :  { %5824 = vpow2.f32 %v2901_v34  ;;  %v2898_v52 = vsub.f32 %v2884_v59, %v2895_v28  ;;  %v4741_v34 = vld [vmem:[%s8211_s11 + $0x250] sm:$0xff]  ;;  %v4742_v28 = vld [vmem:[%s8211_s11 + $0x258] sm:$0xff] }
0x118c   :  { %v2903_v39 = vmul.f32 1.442695, %v2898_v52 }
0x118e   :  { %5826 = vpow2.f32 %v2903_v39 }
0x1190   :  { %v5823_v37 = vpop.eup %5822 }
0x1191   :  { %v2905_v9 = vsel %vm987_vm5, %v5823_v37, 0.0 }
0x1192   :  { %2906 = vadd.xlane.f32.xlu1 %v2905_v9  ;;  %v4743_v9 = vld [vmem:[%s8211_s11 + $0x260] sm:$0xff] }
0x1194   :  { %v5825_v10 = vpop.eup %5824 }
0x1195   :  { %v2908_v15 = vsel %vm987_vm5, %v5825_v10, 0.0 }
0x1196   :  { %2909 = vadd.xlane.f32.xlu0 %v2908_v15 }
0x1198   :  { %v5827_v63 = vpop.eup %5826 }
0x1199   :  { %v2911_v5 = vsel %vm987_vm5, %v5827_v63, 0.0 }
0x119a   :  { %2912 = vadd.xlane.f32.xlu1 %v2911_v5  ;;  %v4746_v5 = vld [vmem:[%s8211_s11 + $0x278] sm:$0xff] }
0x121f   :  { %v2907_v61 = vpop.xlane.xlu1 %2906 }
0x1220   :  { %5828 = vrcp.f32 %v2907_v61  ;;  %v5603_v61 = vpack.c.bf16 %v4748_v45, %v4747_v46 }
0x1223   :  { %v2910_v20 = vpop.xlane.xlu0 %2909 }
0x1224   :  { %5830 = vrcp.f32 %v2910_v20  ;;  %v4749_v20 = vld [vmem:[%s8211_s11 + $0x290] sm:$0xff] }
0x1227   :  { %v2913_v31 = vpop.xlane.xlu1 %2912 }
0x1228   :  { %5832 = vrcp.f32 %v2913_v31  ;;  %v4750_v31 = vld [vmem:[%s8211_s11 + $0x298] sm:$0xff] }
0x1229   :  { %v5606_v24 = vpack.c.bf16 %v4750_v31, %v4749_v20  ;;  %v4786_v20 = vld [vmem:[%s8213_s13 + $0xc0] sm:$0xff]  ;;  %v4788_v31 = vld [vmem:[%s8213_s13 + $0xd0] sm:$0xff] }
0x122a   :  { %v5829_v36 = vpop.eup %5828 }
0x122b   :  { %v2915_v27 = vmul.f32 %v5829_v36, %v5823_v37  ;;  %v5594_v37 = vpack.c.bf16 %v4742_v28, %v4741_v34 }
0x122d   :  { %5064 = vmatmul.mubr.msk.f32.vlgmr.msra.gmra.mrb[78].mxu0 %vm987_vm5, %v2915_v27 }
0x122e   :  { %v5831_v41 = vpop.eup %5830  ;;  %5066 = vmatprep.mubr.msk.f32.mxu0 %vm5887_vm2, %v5886_v60  ;;  %5559 = vmatpush1.bf16.msra.mxu0 %v5558_v25 }
0x122f   :  { %v2917_v54 = vmul.f32 %v5831_v41, %v5825_v10  ;;  %4709 = vmatprep.subr.msk.mxu0 %vm1658_vm6, %v4708_v44  ;;  %v4744_v10 = vld [vmem:[%s8211_s11 + $0x268] sm:$0xff] }
0x1230   :  { %v5597_v15 = vpack.c.bf16 %v4744_v10, %v4743_v9 }
0x1231   :  { %5067 = vmatmul.mubr.msk.f32.gmra.mrb[80].mxu0 %vm987_vm5, %v2917_v54 }
0x1232   :  { %v5833_v53 = vpop.eup %5832  ;;  %5069 = vmatprep.mubr.msk.f32.mxu0 %vm5887_vm2, %v5886_v60  ;;  %4710 = vmatpush1.msk.msra.mxu0 %vm1658_vm6, %v4707_v56 }
0x1233   :  { %v2919_v58 = vmul.f32 %v5833_v53, %v5827_v63  ;;  %5584 = vmatprep.subr.bf16.mxu0 %v5885_v51  ;;  %v4745_v63 = vld [vmem:[%s8211_s11 + $0x270] sm:$0xff]  ;;  %v3221_v53 = vmul.f32 0.21320072, %v7425_v0  ;;  %v3223_v0 = vmul.f32 0.21320072, %v7429_v7 }
0x1234   :  { %v5600_v4 = vpack.c.bf16 %v4746_v5, %v4745_v63  ;;  %v4787_v63 = vld [vmem:[%s8213_s13 + $0xc8] sm:$0xff]  ;;  %v4789_v5 = vld [vmem:[%s8213_s13 + $0xd8] sm:$0xff] }
0x1235   :  { %5070 = vmatmul.mubr.msk.f32.gmra.mrb[82].mxu0 %vm987_vm5, %v2919_v58  ;;  %v3222_v58 = vmul.f32 0.21320072, %v7427_v3 }
0x1236   :  { %3095 = vmatprep.mubr.f32.mxu0 %v5886_v60 }
0x1300   :  { %v2995_v59 = vpop.f32.mrb[78].mxu0 }
0x1301   :  { %v5065_v1 = vpop.f32.mrb[79].mxu0  ;;  %4711 = vmatmul.mubr.msk.f32.vlgmr.msra.gmra.mrb[42].mxu0 %vm888_vm3, %v2995_v59 }
0x1302   :  { %5586 = vmatpush1.bf16.msra.mxu0 %v5585_v33  ;;  %3101 = vmatprep.mubr.f32.mxu0 %v5886_v60 }
0x1303   :  { %5587 = vmatprep.subr.bf16.mxu0 %v5885_v51 }
0x1304   :  { %v3000_v8 = vpop.f32.mrb[80].mxu0 }
0x1305   :  { %v5068_v40 = vpop.f32.mrb[81].mxu0  ;;  %4712 = vmatmul.mubr.msk.f32.gmra.mrb[44].mxu0 %vm888_vm3, %v3000_v8 }
0x1306   :  { %5589 = vmatpush1.bf16.msra.mxu0 %v5588_v18  ;;  %3107 = vmatprep.mubr.f32.mxu0 %v5886_v60 }
0x1307   :  { %5590 = vmatprep.subr.bf16.mxu0 %v5885_v51 }
0x1308   :  { %v3005_v52 = vpop.f32.mrb[82].mxu0 }
0x1309   :  { %v5071_v39 = vpop.f32.mrb[83].mxu0  ;;  %4713 = vmatmul.mubr.msk.f32.gmra.mrb[46].mxu0 %vm888_vm3, %v3005_v52 }
0x130a   :  { %5592 = vmatpush1.bf16.msra.mxu0 %v5591_v43  ;;  %4753 = vmatprep.mubr.msk.f32.mxu0 %vm59_vm0, %v6522_v23 }
0x130b   :  { %5593 = vmatprep.subr.bf16.mxu0 %v5885_v51 }
0x130e   :  { %5595 = vmatpush1.bf16.msra.mxu0 %v5594_v37 }
0x130f   :  { %5596 = vmatprep.subr.bf16.mxu0 %v5885_v51 }
0x1312   :  { %5598 = vmatpush1.bf16.msra.mxu0 %v5597_v15 }
0x1313   :  { %5599 = vmatprep.subr.bf16.mxu0 %v5885_v51 }
0x1316   :  { %5601 = vmatpush1.bf16.msra.mxu0 %v5600_v4  ;;  %v5639_v4 = vpack.c.bf16 %v4789_v5, %v4787_v63 }
0x1317   :  { %5602 = vmatprep.subr.bf16.mxu0 %v5885_v51 }
0x131a   :  { %5604 = vmatpush1.bf16.msra.mxu0 %v5603_v61 }
0x131b   :  { %5605 = vmatprep.subr.bf16.mxu0 %v5885_v51 }
0x131e   :  { %5607 = vmatpush1.bf16.msra.mxu0 %v5606_v24 }
0x131f   :  { %3277 = vmatprep.subr.mxu0 %v5886_v60 }
0x1322   :  { %4752 = vmatpush1.msk.msra.mxu0 %vm204_vm1, %v4751_v35  ;;  %v5641_v35 = vpack.c.bf16 %v4788_v31, %v4786_v20 }
0x1323   :  { %3310 = vmatmul.mubr.f32.vlgmr.msra.gmra.mrb[84].mxu0 %v6520_v22  ;;  %5632 = vmatprep.subr.bf16.mxu0 %v5885_v51 }
0x1324   :  { %4754 = vmatprep.mubr.msk.f32.mxu0 %vm59_vm0, %v6540_v30 }
0x1327   :  { %3315 = vmatmul.mubr.f32.gmra.mrb[86].mxu0 %v6538_v29 }
0x1328   :  { %4755 = vmatprep.mubr.msk.f32.mxu0 %vm59_vm0, %v6559_v14 }
0x132b   :  { %3320 = vmatmul.mubr.f32.gmra.mrb[88].mxu0 %v6557_v13 }
0x132c   :  { %5078 = vmatprep.mubr.msk.f32.mxu0 %vm5887_vm2, %v5886_v60 }
0x13f6   :  { %v3311_v36 = vpop.f32.mrb[84].mxu0 }
0x13f7   :  { %v3313_v25 = vpop.f32.mrb[85].mxu0 }
0x13f8   :  { %v4791_v25 = vld [vmem:[%s8213_s13 + $0xe8] sm:$0x3f] }
0x13fa   :  { %v3316_v27 = vpop.f32.mrb[86].mxu0 }
0x13fb   :  { %v5633_v44 = vpack.c.bf16 %v3316_v27, %v3311_v36  ;;  %v3318_v41 = vpop.f32.mrb[87].mxu0 }
0x13fc   :  { %v4790_v41 = vld [vmem:[%s8213_s13 + $0xe0] sm:$0x3f] }
0x13fd   :  { %5635 = vmatpush3.bf16.xpose.msk.msra.mxu0 %vm6624_vm4, %v5633_v44 }
0x13fe   :  { %v3321_v54 = vpop.f32.mrb[88].mxu0  ;;  %5076 = vmatprep.subr.mxu0 %v5886_v60 }
0x13ff   :  { %v3323_v56 = vpop.f32.mrb[89].mxu0 }
0x1405   :  { %5077 = vmatpush3.xpose.msk.msra.mxu0 %vm888_vm3, %v3321_v54 }
0x1406   :  { %5636 = vmatprep.subr.bf16.mxu0 %v5885_v51 }
0x1408   :  { %5079 = vmatmul.mubr.msk.f32.vlgmr.msra.gmra.mrb[90].mxu0 %vm888_vm3, %v3221_v53  ;;  %v4818_v53 = vld [vmem:[%s8211_s11 + $0x2a8] sm:$0xff] }
0x1409   :  { %5638 = vmatpush3.bf16.msra.mxu0 %v5637_v19  ;;  %5081 = vmatprep.mubr.msk.f32.mxu0 %vm5887_vm2, %v5886_v60 }
0x140a   :  { %5091 = vmatprep.subr.mxu0 %v5886_v60 }
0x140c   :  { %5082 = vmatmul.mubr.msk.f32.gmra.mrb[92].mxu0 %vm888_vm3, %v3222_v58  ;;  %v4819_v58 = vld [vmem:[%s8211_s11 + $0x2b0] sm:$0xff] }
0x140d   :  { %5092 = vmatpush3.msra.mxu0 %v7437_v21  ;;  %5084 = vmatprep.mubr.msk.f32.mxu0 %vm5887_vm2, %v5886_v60 }
0x140e   :  { %5640 = vmatprep.subr.bf16.mxu0 %v5639_v4 }
0x1410   :  { %5085 = vmatmul.mubr.msk.f32.gmra.mrb[94].mxu0 %vm888_vm3, %v3223_v0  ;;  %v5668_v0 = vpack.c.bf16 %v4819_v58, %v4818_v53 }
0x1411   :  { %5093 = vmatprep.mubr.msk.f32.mxu0 %vm5887_vm2, %v5886_v60 }
0x14db   :  { %v3510_v12 = vpop.f32.mrb[90].mxu0 }
0x14dc   :  { %v3511_v17 = vadd.f32 %v7723_v50, %v3510_v12  ;;  %v5080_v3 = vpop.f32.mrb[91].mxu0  ;;  %v4820_v12 = vld [vmem:[%s8211_s11 + $0x2b8] sm:$0xff] }
0x14de   :  { %v3524_v19 = vsel %vm987_vm5, %v3511_v17, -inf }
0x14df   :  { %3525 = vmax.xlane.f32.xlu0 %v3524_v19  ;;  %v3515_v42 = vpop.f32.mrb[92].mxu0 }
0x14e0   :  { %v3516_v21 = vadd.f32 %v7730_v57, %v3515_v42  ;;  %v5083_v62 = vpop.f32.mrb[93].mxu0 }
0x14e1   :  { %v4823_v62 = vld [vmem:[%s8211_s11 + $0x2d0] sm:$0xff] }
0x14e2   :  { %v3527_v33 = vsel %vm987_vm5, %v3516_v21, -inf }
0x14e3   :  { %3528 = vmax.xlane.f32.xlu1 %v3527_v33  ;;  %v3520_v7 = vpop.f32.mrb[94].mxu0 }
0x14e4   :  { %v3521_v11 = vadd.f32 %v7737_v16, %v3520_v7  ;;  %v5086_v49 = vpop.f32.mrb[95].mxu0 }
0x14e5   :  { %v4824_v49 = vld [vmem:[%s8211_s11 + $0x2d8] sm:$0xff] }
0x14e6   :  { %v3530_v59 = vsel %vm987_vm5, %v3521_v11, -inf }
0x14e7   :  { %3531 = vmax.xlane.f32.xlu0 %v3530_v59  ;;  %v4825_v59 = vld [vmem:[%s8211_s11 + $0x2e0] sm:$0xff] }
0x156c   :  { %v3526_v1 = vpop.xlane.xlu0 %3525 }
0x156d   :  { %v3533_v18 = vsub.f32 %v3511_v17, %v3526_v1  ;;  %v4821_v17 = vld [vmem:[%s8211_s11 + $0x2c0] sm:$0xff] }
0x156e   :  { %v5671_v42 = vpack.c.bf16 %v4821_v17, %v4820_v12 }
0x156f   :  { %v3536_v2 = vmul.f32 1.442695, %v3533_v18 }
0x1570   :  { %v3529_v38 = vpop.xlane.xlu1 %3528 }
0x1571   :  { %5834 = vpow2.f32 %v3536_v2  ;;  %v3534_v8 = vsub.f32 %v3516_v21, %v3529_v38  ;;  %v4822_v21 = vld [vmem:[%s8211_s11 + $0x2c8] sm:$0xff]  ;;  %v5677_v2 = vpack.c.bf16 %v4825_v59, %v4824_v49  ;;  %v4874_v49 = vld [vmem:[%s8213_s13 + $0x118] sm:$0x3f]  ;;  %v4873_v59 = vld [vmem:[%s8213_s13 + $0x110] sm:$0x3f] }
0x1572   :  { %v4826_v38 = vld [vmem:[%s8211_s11 + $0x2e8] sm:$0xff] }
0x1573   :  { %v3538_v40 = vmul.f32 1.442695, %v3534_v8  ;;  %v4827_v8 = vld [vmem:[%s8211_s11 + $0x2f0] sm:$0xff] }
0x1574   :  { %v3532_v43 = vpop.xlane.xlu0 %3531 }
0x1575   :  { %5836 = vpow2.f32 %v3538_v40  ;;  %v3535_v34 = vsub.f32 %v3521_v11, %v3532_v43  ;;  %v5674_v11 = vpack.c.bf16 %v4823_v62, %v4822_v21  ;;  %v5680_v40 = vpack.c.bf16 %v4827_v8, %v4826_v38  ;;  %v4828_v43 = vld [vmem:[%s8211_s11 + $0x2f8] sm:$0xff]  ;;  %v4872_v21 = vld [vmem:[%s8213_s13 + $0x108] sm:$0xff]  ;;  %v4869_v62 = vld [vmem:[%s8213_s13 + $0xf0] sm:$0xff] }
0x1577   :  { %v3540_v28 = vmul.f32 1.442695, %v3535_v34 }
0x1579   :  { %5838 = vpow2.f32 %v3540_v28  ;;  %v4830_v28 = vld [vmem:[%s8211_s11 + $0x308] sm:$0xff] }
0x157b   :  { %v5835_v52 = vpop.eup %5834 }
0x157c   :  { %v3542_v39 = vsel %vm987_vm5, %v5835_v52, 0.0 }
0x157d   :  { %3543 = vadd.xlane.f32.xlu1 %v3542_v39 }
0x157f   :  { %v5837_v37 = vpop.eup %5836 }
0x1580   :  { %v3545_v9 = vsel %vm987_vm5, %v5837_v37, 0.0 }
0x1581   :  { %3546 = vadd.xlane.f32.xlu0 %v3545_v9  ;;  %v4833_v9 = vld [vmem:[%s8211_s11 + $0x320] sm:$0xff] }
0x1583   :  { %v5839_v10 = vpop.eup %5838 }
0x1584   :  { %v3548_v15 = vsel %vm987_vm5, %v5839_v10, 0.0 }
0x1585   :  { %3549 = vadd.xlane.f32.xlu1 %v3548_v15  ;;  %v4834_v15 = vld [vmem:[%s8211_s11 + $0x328] sm:$0xf] }
0x160a   :  { %v3544_v46 = vpop.xlane.xlu1 %3543 }
0x160b   :  { %5840 = vrcp.f32 %v3544_v46 }
0x160e   :  { %v3547_v45 = vpop.xlane.xlu0 %3546 }
0x160f   :  { %5842 = vrcp.f32 %v3547_v45 }
0x1612   :  { %v3550_v61 = vpop.xlane.xlu1 %3549 }
0x1613   :  { %5844 = vrcp.f32 %v3550_v61 }
0x1615   :  { %v5841_v24 = vpop.eup %5840 }
0x1616   :  { %v3552_v36 = vmul.f32 %v5841_v24, %v5835_v52  ;;  %v4831_v52 = vld [vmem:[%s8211_s11 + $0x310] sm:$0xff] }
0x1617   :  { %v5686_v39 = vpack.c.bf16 %v4831_v52, %v4830_v28 }
0x1618   :  { %5094 = vmatmul.mubr.msk.f32.vlgmr.msra.gmra.mrb[96].mxu0 %vm987_vm5, %v3552_v36 }
0x1619   :  { %v5843_v27 = vpop.eup %5842  ;;  %5096 = vmatprep.mubr.msk.f32.mxu0 %vm5887_vm2, %v5886_v60  ;;  %5642 = vmatpush1.bf16.msra.mxu0 %v5641_v35 }
0x161a   :  { %v3554_v44 = vmul.f32 %v5843_v27, %v5837_v37  ;;  %4792 = vmatprep.subr.msk.mxu0 %vm1658_vm6, %v4791_v25  ;;  %v4832_v37 = vld [vmem:[%s8211_s11 + $0x318] sm:$0xff] }
0x161c   :  { %5097 = vmatmul.mubr.msk.f32.gmra.mrb[98].mxu0 %vm987_vm5, %v3554_v44 }
0x161d   :  { %v5845_v54 = vpop.eup %5844  ;;  %5099 = vmatprep.mubr.msk.f32.mxu0 %vm5887_vm2, %v5886_v60  ;;  %4793 = vmatpush1.msk.msra.mxu0 %vm1658_vm6, %v4790_v41 }
0x161e   :  { %v3556_v56 = vmul.f32 %v5845_v54, %v5839_v10  ;;  %5667 = vmatprep.subr.bf16.mxu0 %v5885_v51  ;;  %v5689_v10 = vpack.c.bf16 %v4833_v9, %v4832_v37 }
0x1620   :  { %5100 = vmatmul.mubr.msk.f32.gmra.mrb[100].mxu0 %vm987_vm5, %v3556_v56 }
0x1621   :  { %3732 = vmatprep.mubr.f32.mxu0 %v5886_v60 }
0x16eb   :  { %v3632_v3 = vpop.f32.mrb[96].mxu0 }
0x16ec   :  { %v5095_v19 = vpop.f32.mrb[97].mxu0  ;;  %4794 = vmatmul.mubr.msk.f32.vlgmr.msra.gmra.mrb[42].mxu0 %vm888_vm3, %v3632_v3 }
0x16ed   :  { %5669 = vmatpush1.bf16.msra.mxu0 %v5668_v0  ;;  %3738 = vmatprep.mubr.f32.mxu0 %v5886_v60 }
0x16ee   :  { %5670 = vmatprep.subr.bf16.mxu0 %v5885_v51 }
0x16ef   :  { %v3637_v33 = vpop.f32.mrb[98].mxu0 }
0x16f0   :  { %v5098_v7 = vpop.f32.mrb[99].mxu0  ;;  %4795 = vmatmul.mubr.msk.f32.gmra.mrb[44].mxu0 %vm888_vm3, %v3637_v33 }
0x16f1   :  { %5672 = vmatpush1.bf16.msra.mxu0 %v5671_v42  ;;  %3744 = vmatprep.mubr.f32.mxu0 %v5886_v60  ;;  %v4870_v42 = vld [vmem:[%s8213_s13 + $0xf8] sm:$0xff]  ;;  %v4871_v7 = vld [vmem:[%s8213_s13 + $0x100] sm:$0xff] }
0x16f2   :  { %5673 = vmatprep.subr.bf16.mxu0 %v5885_v51  ;;  %v5722_v33 = vpack.c.bf16 %v4872_v21, %v4870_v42 }
0x16f3   :  { %v3642_v1 = vpop.f32.mrb[100].mxu0 }
0x16f4   :  { %v5101_v18 = vpop.f32.mrb[101].mxu0  ;;  %4796 = vmatmul.mubr.msk.f32.gmra.mrb[46].mxu0 %vm888_vm3, %v3642_v1 }
0x16f5   :  { %5675 = vmatpush1.bf16.msra.mxu0 %v5674_v11  ;;  %4836 = vmatprep.mubr.msk.f32.mxu0 %vm59_vm0, %v6522_v23  ;;  %v4829_v23 = vld [vmem:[%s8211_s11 + $0x300] sm:$0xff]  ;;  %v5724_v11 = vpack.c.bf16 %v4871_v7, %v4869_v62 }
0x16f6   :  { %5676 = vmatprep.subr.bf16.mxu0 %v5885_v51  ;;  %v5683_v34 = vpack.c.bf16 %v4829_v23, %v4828_v43 }
0x16f9   :  { %5678 = vmatpush1.bf16.msra.mxu0 %v5677_v2 }
0x16fa   :  { %5679 = vmatprep.subr.bf16.mxu0 %v5885_v51 }
0x16fd   :  { %5681 = vmatpush1.bf16.msra.mxu0 %v5680_v40 }
0x16fe   :  { %5682 = vmatprep.subr.bf16.mxu0 %v5885_v51 }
0x1701   :  { %5684 = vmatpush1.bf16.msra.mxu0 %v5683_v34 }
0x1702   :  { %5685 = vmatprep.subr.bf16.mxu0 %v5885_v51 }
0x1705   :  { %5687 = vmatpush1.bf16.msra.mxu0 %v5686_v39 }
0x1706   :  { %5688 = vmatprep.subr.bf16.mxu0 %v5885_v51 }
0x1709   :  { %5690 = vmatpush1.bf16.msra.mxu0 %v5689_v10 }
0x170a   :  { %3914 = vmatprep.subr.mxu0 %v5886_v60 }
0x170d   :  { %4835 = vmatpush1.msk.msra.mxu0 %vm204_vm1, %v4834_v15  ;;  %v4394_v15 = vld [vmem:[%s8214_s14] sm:$0x3]  ;;  %s5861_s14 = scalar_lea.vmem %s4424_s17, 768 }
0x170e   :  { %3947 = vmatmul.mubr.f32.vlgmr.msra.gmra.mrb[102].mxu0 %v6520_v22  ;;  %5715 = vmatprep.subr.bf16.mxu0 %v5885_v51  ;;  %p5862_p0 = scmp.ne.s32.totalorder %s4424_s17, %s5861_s14  ;;  %p5867_p2 = scmp.lt.s32.totalorder %s5861_s14, %s5861_s14 }
0x170f   :  { %4837 = vmatprep.mubr.msk.f32.mxu0 %vm59_vm0, %v6540_v30  ;;  %v3858_v30 = vmul.f32 0.21320072, %v7439_v26 }
0x1710   :  { %p5868_p3 = por %p5867_p2, %p5866_p1 }
0x1712   :  { %3952 = vmatmul.mubr.f32.gmra.mrb[104].mxu0 %v6538_v29  ;;  %p5869_p4 = pnand %p5868_p3, %p5862_p0 }
0x1713   :  { %4838 = vmatprep.mubr.msk.f32.mxu0 %vm59_vm0, %v6559_v14  ;;  %v3860_v14 = vmul.f32 0.21320072, %v7449_v55 }
0x1716   :  { %3957 = vmatmul.mubr.f32.gmra.mrb[106].mxu0 %v6557_v13  ;;  %v3859_v13 = vmul.f32 0.21320072, %v7441_v32 }
0x1717   :  { %5108 = vmatprep.mubr.msk.f32.mxu0 %vm5887_vm2, %v5886_v60 }
0x17e1   :  { %v3948_v63 = vpop.f32.mrb[102].mxu0 }
0x17e2   :  { %v3950_v5 = vpop.f32.mrb[103].mxu0 }
0x17e3   :  { %v4403_v5 = vrot.slane %v4394_v15, %v6257_v48 }
0x17e5   :  { %v3953_v4 = vpop.f32.mrb[104].mxu0 }
0x17e6   :  { %v5716_v46 = vpack.c.bf16 %v3953_v4, %v3948_v63  ;;  %v3955_v22 = vpop.f32.mrb[105].mxu0  ;;  %v4399_v63 = vrot.slane %v4394_v15, %v6255_v47 }
0x17e8   :  { %5718 = vmatpush3.bf16.xpose.msk.msra.mxu0 %vm6624_vm4, %v5716_v46 }
0x17e9   :  { %v3958_v51 = vpop.f32.mrb[106].mxu0  ;;  %5106 = vmatprep.subr.mxu0 %v5886_v60 }
0x17ea   :  { %v3960_v29 = vpop.f32.mrb[107].mxu0 }
0x17f0   :  { %5107 = vmatpush3.xpose.msk.msra.mxu0 %vm888_vm3, %v3958_v51 }
0x17f1   :  { %5723 = vmatprep.subr.bf16.mxu0 %v5722_v33 }
0x17f3   :  { %5109 = vmatmul.mubr.msk.f32.vlgmr.msra.gmra.mrb[108].mxu0 %vm888_vm3, %v3858_v30 }
0x17f4   :  { %5111 = vmatprep.mubr.msk.f32.mxu0 %vm5887_vm2, %v5886_v60  ;;  %5725 = vmatpush1.bf16.msra.mxu0 %v5724_v11 }
0x17f5   :  { %4875 = vmatprep.subr.msk.mxu0 %vm1658_vm6, %v4874_v49 }
0x17f7   :  { %5112 = vmatmul.mubr.msk.f32.gmra.mrb[110].mxu0 %vm888_vm3, %v3859_v13 }
0x17f8   :  { %5114 = vmatprep.mubr.msk.f32.mxu0 %vm5887_vm2, %v5886_v60  ;;  %4876 = vmatpush1.msk.msra.mxu0 %vm1658_vm6, %v4873_v59 }
0x17fb   :  { %5115 = vmatmul.mubr.msk.f32.gmra.mrb[112].mxu0 %vm888_vm3, %v3860_v14 }
0x17fc   :  { %4369 = vmatprep.mubr.f32.mxu0 %v5886_v60 }
0x18c6   :  { %v4147_v6 = vpop.f32.mrb[108].mxu0 }
0x18c7   :  { %v4148_v26 = vadd.f32 %v7723_v50, %v4147_v6  ;;  %v5110_v45 = vpop.f32.mrb[109].mxu0 }
0x18c9   :  { %v4161_v61 = vsel %vm987_vm5, %v4148_v26, -inf }
0x18ca   :  { %4162 = vmax.xlane.f32.xlu0 %v4161_v61  ;;  %v4152_v20 = vpop.f32.mrb[110].mxu0 }
0x18cb   :  { %v4153_v32 = vadd.f32 %v7730_v57, %v4152_v20  ;;  %v5113_v31 = vpop.f32.mrb[111].mxu0 }
0x18cd   :  { %v4164_v24 = vsel %vm987_vm5, %v4153_v32, -inf }
0x18ce   :  { %4165 = vmax.xlane.f32.xlu1 %v4164_v24  ;;  %v4157_v35 = vpop.f32.mrb[112].mxu0 }
0x18cf   :  { %v4158_v55 = vadd.f32 %v7737_v16, %v4157_v35  ;;  %v5116_v36 = vpop.f32.mrb[113].mxu0 }
0x18d1   :  { %v4167_v25 = vsel %vm987_vm5, %v4158_v55, -inf }
0x18d2   :  { %4168 = vmax.xlane.f32.xlu0 %v4167_v25 }
0x1957   :  { %v4163_v27 = vpop.xlane.xlu0 %4162 }
0x1958   :  { %v4170_v50 = vsub.f32 %v4148_v26, %v4163_v27 }
0x195a   :  { %v4173_v44 = vmul.f32 1.442695, %v4170_v50 }
0x195b   :  { %v4166_v41 = vpop.xlane.xlu1 %4165 }
0x195c   :  { %5846 = vpow2.f32 %v4173_v44  ;;  %v4171_v54 = vsub.f32 %v4153_v32, %v4166_v41 }
0x195e   :  { %v4175_v56 = vmul.f32 1.442695, %v4171_v54 }
0x195f   :  { %v4169_v53 = vpop.xlane.xlu0 %4168 }
0x1960   :  { %5848 = vpow2.f32 %v4175_v56  ;;  %v4172_v57 = vsub.f32 %v4158_v55, %v4169_v53 }
0x1962   :  { %v4177_v58 = vmul.f32 1.442695, %v4172_v57 }
0x1964   :  { %5850 = vpow2.f32 %v4177_v58 }
0x1966   :  { %v5847_v0 = vpop.eup %5846 }
0x1967   :  { %v4179_v12 = vsel %vm987_vm5, %v5847_v0, 0.0 }
0x1968   :  { %4180 = vadd.xlane.f32.xlu1 %v4179_v12 }
0x196a   :  { %v5849_v16 = vpop.eup %5848 }
0x196b   :  { %v4182_v17 = vsel %vm987_vm5, %v5849_v16, 0.0 }
0x196c   :  { %4183 = vadd.xlane.f32.xlu0 %v4182_v17 }
0x196e   :  { %v5851_v3 = vpop.eup %5850 }
0x196f   :  { %v4185_v19 = vsel %vm987_vm5, %v5851_v3, 0.0 }
0x1970   :  { %4186 = vadd.xlane.f32.xlu1 %v4185_v19 }
0x19f5   :  { %v4181_v1 = vpop.xlane.xlu1 %4180 }
0x19f6   :  { %5852 = vrcp.f32 %v4181_v1 }
0x19f9   :  { %v4184_v18 = vpop.xlane.xlu0 %4183 }
0x19fa   :  { %5854 = vrcp.f32 %v4184_v18 }
0x19fd   :  { %v4187_v2 = vpop.xlane.xlu1 %4186 }
0x19fe   :  { %5856 = vrcp.f32 %v4187_v2 }
0x1a00   :  { %v5853_v38 = vpop.eup %5852 }
0x1a01   :  { %v4189_v8 = vmul.f32 %v5853_v38, %v5847_v0 }
0x1a03   :  { %5124 = vmatmul.mubr.msk.f32.vlgmr.msra.gmra.mrb[78].mxu1 %vm987_vm5, %v4189_v8 }
0x1a04   :  { %v5855_v40 = vpop.eup %5854  ;;  %5126 = vmatprep.mubr.msk.f32.mxu1 %vm5887_vm2, %v5886_v60 }
0x1a05   :  { %v4191_v43 = vmul.f32 %v5855_v40, %v5849_v16 }
0x1a07   :  { %5127 = vmatmul.mubr.msk.f32.gmra.mrb[80].mxu1 %vm987_vm5, %v4191_v43 }
0x1a08   :  { %v5857_v23 = vpop.eup %5856  ;;  %5129 = vmatprep.mubr.msk.f32.mxu1 %vm5887_vm2, %v5886_v60 }
0x1a09   :  { %v4193_v34 = vmul.f32 %v5857_v23, %v5851_v3 }
0x1a0b   :  { %5130 = vmatmul.mubr.msk.f32.gmra.mrb[82].mxu1 %vm987_vm5, %v4193_v34 }
0x1ad6   :  { %v4269_v28 = vpop.f32.mrb[78].mxu1 }
0x1ad7   :  { %v5125_v52 = vpop.f32.mrb[79].mxu1  ;;  %4877 = vmatmul.mubr.msk.f32.vlgmr.msra.gmra.mrb[42].mxu0 %vm888_vm3, %v4269_v28 }
0x1ad8   :  { %4375 = vmatprep.mubr.f32.mxu0 %v5886_v60 }
0x1ada   :  { %v4274_v39 = vpop.f32.mrb[80].mxu1 }
0x1adb   :  { %v5128_v37 = vpop.f32.mrb[81].mxu1  ;;  %4878 = vmatmul.mubr.msk.f32.gmra.mrb[44].mxu0 %vm888_vm3, %v4274_v39 }
0x1adc   :  { %4381 = vmatprep.mubr.f32.mxu0 %v5886_v60 }
0x1ade   :  { %v4279_v9 = vpop.f32.mrb[82].mxu1 }
0x1adf   :  { %v5131_v10 = vpop.f32.mrb[83].mxu1  ;;  %4879 = vmatmul.mubr.msk.f32.gmra.mrb[46].mxu0 %vm888_vm3, %v4279_v9 }
0x1baa   :  { %v4371_v4 = vpop.f32.mrb[42].mxu0 }
0x1bab   :  { %v4406_v46 = vadd.f32 %v4399_v63, %v4371_v4  ;;  %v4373_v22 = vpop.f32.mrb[43].mxu0 }
0x1bac   :  { %v4407_v51 = vadd.f32 %v4403_v5, %v4373_v22 }
0x1bad   :  { %4412 = vst [vmem:[#allocation2] sm:$0xff] %v4406_v46 }
0x1bae   :  { %4413 = vst.msk [vmem:[#allocation2 + $0x8] sm:$0xff] %vm59_vm0, %v4407_v51  ;;  %v4377_v60 = vpop.f32.mrb[44].mxu0 }
0x1baf   :  { %v4408_v29 = vadd.f32 %v4399_v63, %v4377_v60  ;;  %v4379_v30 = vpop.f32.mrb[45].mxu0 }
0x1bb0   :  { %v4409_v13 = vadd.f32 %v4403_v5, %v4379_v30 }
0x1bb1   :  { %4414 = vst [vmem:[#allocation2 + $0x10] sm:$0xff] %v4408_v29 }
0x1bb2   :  { %4415 = vst.msk [vmem:[#allocation2 + $0x18] sm:$0xff] %vm59_vm0, %v4409_v13  ;;  %v4383_v14 = vpop.f32.mrb[46].mxu0 }
0x1bb3   :  { %v4410_v47 = vadd.f32 %v4399_v63, %v4383_v14  ;;  %v4385_v6 = vpop.f32.mrb[47].mxu0 }
0x1bb4   :  { %v4411_v48 = vadd.f32 %v4403_v5, %v4385_v6 }
0x1bb5   :  { %4416 = vst [vmem:[#allocation2 + $0x20] sm:$0xff] %v4410_v47 }
0x1bb6   :  { %4417 = vst.msk [vmem:[#allocation2 + $0x28] sm:$0xff] %vm59_vm0, %v4411_v48 }
0x1bb7   :  { %5872 = shalt.err (!%p5869_p4)
}
0x1bb8   :  { %s5873_s0 = scalar_lea.hbm %s8215_s15, 768 }
0x1bb9   :  { %p5874_p5 = scmp.ne.s32.totalorder %s8215_s15, %s5873_s0  ;;  %p5877_p6 = scmp.lt.u32.totalorder %s5873_s0, %s8215_s15 }
0x1bbb   :  { %p5879_p7 = pnand %p5877_p6, %p5874_p5 }
0x1bbd   :  { %5882 = shalt.err (!%p5879_p7)
}
0x1bbe   :  { %s5889_s23 = smov 256   ;;  %s5890_s24 = smov 16  }
0x1bbf   :  { %4429 = dma.vmem_to_hbm [thread:$0]  %s4424_s17, 768, %s8215_s15, [#allocation3], %s5889_s23, %s5889_s23, %s5890_s24  }
0x1bc0   :  { %5883 = dma.done.wait [#allocation3], 768  }
0x1bc1   :  { %5884 = vsyncadd [#allocation3], 4294966528 }
0x1bc2   :  { %4433 = vsyncpa [#allocation3], 1 }

</bundles_post_ra>
